<compile_context>
chip_gen: v7x
topology: tpu7x:2x2x1
jax: 0.10.0
libtpu: 0.0.40
codegen_flags: <defaults>
</compile_context>

<pallas_src>
import functools
import math

import jax
import jax.numpy as jnp
import numpy as np
from jax import lax
from jax.experimental import pallas as pl
from jax.experimental.pallas import tpu as pltpu

PATCH = 4
NUM_HEADS = 4
VMEM_LIMIT = 32 * 1024 * 1024   # safe scoped-VMEM budget on v5e/v6e/v7x


def _matT(a, b):
    # a @ b.T, contracting the last dim of both (single MXU pass, f32 accum).
    return lax.dot_general(a, b, (((1,), (1,)), ((), ())),
                           preferred_element_type=jnp.float32)


# ------------------------------ attention kernel -----------------------------

def attn_kernel(p_ref, w_ref, b_ref, x_ref, o_ref, *, scale, nh, hd, emd):
    """One batch: fused QKV projection + per-head softmax attention + residual.

    p_ref : (1, N, C*p^3)  patch matrix
    w_ref : (3*emd, C*p^3) fused [Wq; Wk; Wv]
    b_ref : (1, 3*emd)     fused [bq | bk | bv]
    x_ref : (1, N, emd)    residual (raw flat view of x)
    o_ref : (1, N, emd)    heads concatenated on lanes (lane-dense store)
    """
    pm = p_ref[0]                                    # (N, Cp3)
    qkv = _matT(pm, w_ref[...]) + b_ref[...]         # (N, 3*emd): one MXU matmul
    outs = []
    for h in range(nh):                              # static unroll (nh small)
        q = qkv[:, h * hd:(h + 1) * hd]
        k = qkv[:, emd + h * hd:emd + (h + 1) * hd]
        v = qkv[:, 2 * emd + h * hd:2 * emd + (h + 1) * hd]
        s = _matT(q, k) * scale                      # (N, N)
        s = s - jnp.max(s, axis=-1, keepdims=True)
        e = jnp.exp(s)
        inv = pl.reciprocal(jnp.sum(e, axis=-1, keepdims=True), approx=True)
        outs.append(jnp.dot(e * inv, v, preferred_element_type=jnp.float32))
    o_ref[0] = jnp.concatenate(outs, axis=-1) + x_ref[0]   # + residual, lane-dense


# ------------------------------ fused conv kernel ----------------------------

def conv_kernel(yp_ref, w27_ref, bo_ref, ws_ref, bs_ref, wd_ref, bd_ref,
                same_ref, down_ref, *, offs, na, cout):
    """conv_out(3x3x3, pad 1) -> conv_same(1x1x1) + dense conv_down(1x1x1).

    Works on the flat padded-anchor grid: anchor a = h*Wp*Dp + w*Dp + d reads
    yp[:, a + off(kh,kw,kd)] for each tap, which is a contiguous lane slice.
    Invalid anchors (w >= W or d >= D) are computed and discarded by the crop
    in the wrapper.

    yp_ref   : (1, C, LPAD)  channels-first, flattened zero-padded spatial
    w27_ref  : (27, C, C)    conv_out weight, tap-major (kh, kw, kd)
    bo/bs/bd : (C, 1)        biases (broadcast over anchors)
    ws/wd    : (C, C)        1x1x1 conv weights
    same_ref / down_ref : (1, C, na)   lane-dense outputs
    """
    yp = yp_ref[0]                                   # (C, LPAD)
    acc = jnp.zeros((cout, na), jnp.float32)
    for t, off in enumerate(offs):                   # static unroll: 27 taps
        acc = acc + jnp.dot(w27_ref[t], yp[:, off:off + na],
                            preferred_element_type=jnp.float32)
    t_out = acc + bo_ref[...]                        # conv_out stays in VMEM
    same_ref[0] = jnp.dot(ws_ref[...], t_out,
                          preferred_element_type=jnp.float32) + bs_ref[...]
    down_ref[0] = jnp.dot(wd_ref[...], t_out,
                          preferred_element_type=jnp.float32) + bd_ref[...]


# ------------------------------ forward (Pallas) -----------------------------

@jax.jit
def transformer_block(x, params):
    B, C, H, W, D = x.shape
    p, nh = PATCH, NUM_HEADS
    emd = C * p ** 3
    hd = emd // nh
    N = (H * W * D) // p ** 3
    Cp3 = C * p ** 3
    scale = hd ** -0.5

    # ---------------- attention (+ residual, fused in-kernel) ----------------
    # patch gather (== Conv3d(kernel=stride=p) input gather; pure layout glue)
    patches = x.reshape(B, C, H // p, p, W // p, p, D // p, p)
    patches = patches.transpose(0, 2, 4, 6, 1, 3, 5, 7).reshape(B, N, Cp3)
    x_res = x.reshape(B, N, emd)                      # raw view; matches o_ref layout

    w_qkv = jnp.concatenate([params['wq'].reshape(emd, Cp3),
                             params['wk'].reshape(emd, Cp3),
                             params['wv'].reshape(emd, Cp3)], axis=0)   # (3*emd, Cp3)
    b_qkv = jnp.concatenate([params['bq'], params['bk'],
                             params['bv']]).reshape(1, 3 * emd)

    y_flat = pl.pallas_call(
        functools.partial(attn_kernel, scale=scale, nh=nh, hd=hd, emd=emd),
        out_shape=jax.ShapeDtypeStruct((B, N, emd), jnp.float32),
        grid=(B,),
        in_specs=[pl.BlockSpec((1, N, Cp3), lambda b: (b, 0, 0)),
                  pl.BlockSpec((3 * emd, Cp3), lambda b: (0, 0)),
                  pl.BlockSpec((1, 3 * emd), lambda b: (0, 0)),
                  pl.BlockSpec((1, N, emd), lambda b: (b, 0, 0))],
        out_specs=pl.BlockSpec((1, N, emd), lambda b: (b, 0, 0)),
        compiler_params=pltpu.CompilerParams(
            dimension_semantics=("parallel",),
            vmem_limit_bytes=VMEM_LIMIT),
    )(patches, w_qkv, b_qkv, x_res)

    # y already includes the residual; raw reshape back to NCDHW is free.
    y = y_flat.reshape(B, C, H, W, D)

    # ---------------- conv chain: flat padded channels-first layout ----------
    Hp, Wp, Dp = H + 2, W + 2, D + 2
    NA = H * Wp * Dp                                  # dense anchor count (valid + crop)
    max_off = 2 * (Wp * Dp) + 2 * Dp + 2              # largest tap offset
    LPAD = ((max(Hp * Wp * Dp, NA + max_off) + 127) // 128) * 128

    ypad = jnp.pad(y, ((0, 0), (0, 0), (1, 1), (1, 1), (1, 1)))   # (B,C,Hp,Wp,Dp)
    ypf = jnp.pad(ypad.reshape(B, C, Hp * Wp * Dp),
                  ((0, 0), (0, 0), (0, LPAD - Hp * Wp * Dp)))      # (B,C,LPAD)

    # tap offsets in padded-flat space; tap order (kh, kw, kd) matches w27
    offs = tuple(kh * Wp * Dp + kw * Dp + kd
                 for kh in range(3) for kw in range(3) for kd in range(3))
    w27 = params['wo'].transpose(2, 3, 4, 0, 1).reshape(27, C, C)  # [tap, o, c]
    bo = params['bo'].reshape(C, 1)
    ws = params['ws'].reshape(C, C)
    bs = params['bs'].reshape(C, 1)
    wd = params['wd'].reshape(C, C)
    bd = params['bd'].reshape(C, 1)

    same_a, down_a = pl.pallas_call(
        functools.partial(conv_kernel, offs=offs, na=NA, cout=C),
        out_shape=(jax.ShapeDtypeStruct((B, C, NA), jnp.float32),
                   jax.ShapeDtypeStruct((B, C, NA), jnp.float32)),
        grid=(B,),
        in_specs=[pl.BlockSpec((1, C, LPAD), lambda b: (b, 0, 0)),
                  pl.BlockSpec((27, C, C), lambda b: (0, 0, 0)),
                  pl.BlockSpec((C, 1), lambda b: (0, 0)),
                  pl.BlockSpec((C, C), lambda b: (0, 0)),
                  pl.BlockSpec((C, 1), lambda b: (0, 0)),
                  pl.BlockSpec((C, C), lambda b: (0, 0)),
                  pl.BlockSpec((C, 1), lambda b: (0, 0))],
        out_specs=(pl.BlockSpec((1, C, NA), lambda b: (b, 0, 0)),
                   pl.BlockSpec((1, C, NA), lambda b: (b, 0, 0))),
        compiler_params=pltpu.CompilerParams(
            dimension_semantics=("parallel",),
            vmem_limit_bytes=VMEM_LIMIT),
    )(ypf, w27, bo, ws, bs, wd, bd)

    # crop valid anchors (anchor = h*Wp*Dp + w*Dp + d with w < W, d < D);
    # conv_down additionally keeps only the stride-2 positions.
    y_same = same_a.reshape(B, C, H, Wp, Dp)[:, :, :, :W, :D]
    y_opt = down_a.reshape(B, C, H, Wp, Dp)[:, :, ::2, :W:2, :D:2]
    return y_same, y_opt


# ------------------------------ pure-JAX reference ---------------------------

def conv3d_ref(x, w, b, stride, padding):
    dn = lax.conv_dimension_numbers(x.shape, w.shape, ('NCDHW', 'OIDHW', 'NCDHW'))
    y = lax.conv_general_dilated(x, w, window_strides=(stride,) * 3,
                                 padding=padding, dimension_numbers=dn)
    return y + b.reshape(1, -1, 1, 1, 1)


def reference(x, params):
    B, C, H, W, D = x.shape
    p, nh = PATCH, NUM_HEADS
    emd = C * p ** 3
    hd = emd // nh
    N = (H * W * D) // p ** 3
    q = conv3d_ref(x, params['wq'], params['bq'], p, 'VALID')
    k = conv3d_ref(x, params['wk'], params['bk'], p, 'VALID')
    v = conv3d_ref(x, params['wv'], params['bv'], p, 'VALID')

    def heads(t):
        t = t.reshape(B, emd, N).transpose(0, 2, 1)
        return t.reshape(B, N, nh, hd).transpose(0, 2, 1, 3)

    q, k, v = heads(q), heads(k), heads(v)
    attn = jnp.einsum('bhnd,bhmd->bhnm', q, k) * (hd ** -0.5)
    attn = jax.nn.softmax(attn, axis=-1)
    y = jnp.einsum('bhnm,bhmd->bhnd', attn, v)
    y = y.transpose(0, 2, 1, 3).reshape(B, C, H, W, D)
    y = y + x
    y = conv3d_ref(y, params['wo'], params['bo'], 1, [(1, 1)] * 3)
    y_same = conv3d_ref(y, params['ws'], params['bs'], 1, 'VALID')
    y_opt = conv3d_ref(y, params['wd'], params['bd'], 2, 'VALID')
    return y_same, y_opt


# ------------------------------ params / main --------------------------------

def init_params(key, dim, patch):
    emd = dim * patch ** 3
    ks = jax.random.split(key, 12)

    def w(k, shape, fan_in):
        return jax.random.normal(k, shape, jnp.float32) * (1.0 / math.sqrt(fan_in))

    return {
        'wq': w(ks[0], (emd, dim, patch, patch, patch), dim * patch ** 3),
        'bq': w(ks[1], (emd,), emd),
        'wk': w(ks[2], (emd, dim, patch, patch, patch), dim * patch ** 3),
        'bk': w(ks[3], (emd,), emd),
        'wv': w(ks[4], (emd, dim, patch, patch, patch), dim * patch ** 3),
        'bv': w(ks[5], (emd,), emd),
        'wo': w(ks[6], (dim, dim, 3, 3, 3), dim * 27),
        'bo': w(ks[7], (dim,), dim * 27),
        'ws': w(ks[8], (dim, dim, 1, 1, 1), dim),
        'bs': w(ks[9], (dim,), dim),
        'wd': w(ks[10], (dim, dim, 1, 1, 1), dim),
        'bd': w(ks[11], (dim,), dim),
    }


if __name__ == "__main__":
    B, C, H, W, D = 2, 4, 8, 8, 8   # dim=4, patch_size=4 -> N=8 patches, emd_dim=256
    key = jax.random.PRNGKey(0)
    kx, kp = jax.random.split(key)
    x = jax.random.normal(kx, (B, C, H, W, D), jnp.float32)
    params = init_params(kp, C, PATCH)

    y_same, y_opt = jax.block_until_ready(transformer_block(x, params))

    r_same, r_opt = reference(x, params)
    assert y_same.shape == r_same.shape == (B, C, H, W, D)
    assert y_opt.shape == r_opt.shape == (B, C, H // 2, W // 2, D // 2)
    np.testing.assert_allclose(np.asarray(y_same), np.asarray(r_same),
                               rtol=2e-2, atol=2e-2)
    np.testing.assert_allclose(np.asarray(y_opt), np.asarray(r_opt),
                               rtol=2e-2, atol=2e-2)
    print("KERNEL_OK")
</pallas_src>

<mosaic_0001>
module attributes {stable_mosaic.version = 11 : i64} {
  func.func @attn_kernel(%arg0: i32, %arg1: memref<1x8x256xf32, #tpu.memory_space<vmem>>, %arg2: memref<768x256xf32, #tpu.memory_space<vmem>>, %arg3: memref<1x768xf32, #tpu.memory_space<vmem>>, %arg4: memref<1x8x256xf32, #tpu.memory_space<vmem>>, %arg5: memref<1x8x256xf32, #tpu.memory_space<vmem>>) attributes {dimension_semantics = [#tpu.dimension_semantics<parallel>], iteration_bounds = array<i64: 2>, scalar_prefetch = 0 : i64, scratch_operands = 0 : i64, tpu.core_type = #tpu.core_type<tc>, window_params = [{transform_indices = @transform_0, window_bounds = array<i64: 1, 8, 256>}, {pipeline_mode = #tpu.pipeline_mode<synchronous>, transform_indices = @transform_1, window_bounds = array<i64: 768, 256>}, {pipeline_mode = #tpu.pipeline_mode<synchronous>, transform_indices = @transform_2, window_bounds = array<i64: 1, 768>}, {transform_indices = @transform_3, window_bounds = array<i64: 1, 8, 256>}, {transform_indices = @transform_4, window_bounds = array<i64: 1, 8, 256>}]} {
    %c0 = arith.constant 0 : index
    %c0_0 = arith.constant 0 : index
    %c0_1 = arith.constant 0 : index
    %0 = vector.load %arg1[%c0, %c0_0, %c0_1] : memref<1x8x256xf32, #tpu.memory_space<vmem>>, vector<1x8x256xf32>
    %1 = vector.shape_cast %0 : vector<1x8x256xf32> to vector<8x256xf32>
    %c0_2 = arith.constant 0 : index
    %c0_3 = arith.constant 0 : index
    %2 = vector.load %arg2[%c0_2, %c0_3] : memref<768x256xf32, #tpu.memory_space<vmem>>, vector<768x256xf32>
    %cst = arith.constant dense<0.000000e+00> : vector<8x768xf32>
    %3 = tpu.matmul %1, %2, %cst {dimension_numbers = #tpu.dot_dimension_numbers<[1], [1], [0], [0], [0, 0, 1, 0], [], []>} : vector<8x256xf32>, vector<768x256xf32>, vector<8x768xf32> -> vector<8x768xf32>
    %c0_4 = arith.constant 0 : index
    %c0_5 = arith.constant 0 : index
    %4 = vector.load %arg3[%c0_4, %c0_5] : memref<1x768xf32, #tpu.memory_space<vmem>>, vector<1x768xf32>
    %5 = vector.broadcast %4 : vector<1x768xf32> to vector<8x768xf32>
    %6 = arith.addf %3, %5 : vector<8x768xf32>
    %7 = vector.extract_strided_slice %6 {offsets = [0, 0], sizes = [8, 64], strides = [1, 1]} : vector<8x768xf32> to vector<8x64xf32>
    %8 = vector.extract_strided_slice %6 {offsets = [0, 256], sizes = [8, 64], strides = [1, 1]} : vector<8x768xf32> to vector<8x64xf32>
    %9 = vector.extract_strided_slice %6 {offsets = [0, 512], sizes = [8, 64], strides = [1, 1]} : vector<8x768xf32> to vector<8x64xf32>
    %cst_6 = arith.constant dense<0.000000e+00> : vector<8x8xf32>
    %10 = tpu.matmul %7, %8, %cst_6 {dimension_numbers = #tpu.dot_dimension_numbers<[1], [1], [0], [0], [0, 0, 1, 0], [], []>} : vector<8x64xf32>, vector<8x64xf32>, vector<8x8xf32> -> vector<8x8xf32>
    %cst_7 = arith.constant 1.250000e-01 : f32
    %11 = vector.broadcast %cst_7 : f32 to vector<8x8xf32>
    %12 = arith.mulf %10, %11 : vector<8x8xf32>
    %cst_8 = arith.constant dense<0xFF800000> : vector<8xf32>
    %13 = vector.multi_reduction <maximumf>, %12, %cst_8 [1] : vector<8x8xf32> to vector<8xf32>
    %14 = vector.shape_cast %13 : vector<8xf32> to vector<8x1xf32>
    %15 = vector.broadcast %14 : vector<8x1xf32> to vector<8x8xf32>
    %16 = arith.subf %12, %15 : vector<8x8xf32>
    %17 = math.exp %16 : vector<8x8xf32>
    %cst_9 = arith.constant dense<0.000000e+00> : vector<8xf32>
    %18 = vector.multi_reduction <add>, %17, %cst_9 [1] : vector<8x8xf32> to vector<8xf32>
    %19 = vector.shape_cast %18 : vector<8xf32> to vector<8x1xf32>
    %20 = tpu.reciprocal %19 {approx = true} : vector<8x1xf32> -> vector<8x1xf32>
    %21 = vector.broadcast %20 : vector<8x1xf32> to vector<8x8xf32>
    %22 = arith.mulf %17, %21 : vector<8x8xf32>
    %cst_10 = arith.constant dense<0.000000e+00> : vector<8x64xf32>
    %23 = tpu.matmul %22, %9, %cst_10 {dimension_numbers = #tpu.dot_dimension_numbers<[1], [0], [0], [1], [0, 0, 1, 1], [], []>} : vector<8x8xf32>, vector<8x64xf32>, vector<8x64xf32> -> vector<8x64xf32>
    %24 = vector.extract_strided_slice %6 {offsets = [0, 64], sizes = [8, 64], strides = [1, 1]} : vector<8x768xf32> to vector<8x64xf32>
    %25 = vector.extract_strided_slice %6 {offsets = [0, 320], sizes = [8, 64], strides = [1, 1]} : vector<8x768xf32> to vector<8x64xf32>
    %26 = vector.extract_strided_slice %6 {offsets = [0, 576], sizes = [8, 64], strides = [1, 1]} : vector<8x768xf32> to vector<8x64xf32>
    %cst_11 = arith.constant dense<0.000000e+00> : vector<8x8xf32>
    %27 = tpu.matmul %24, %25, %cst_11 {dimension_numbers = #tpu.dot_dimension_numbers<[1], [1], [0], [0], [0, 0, 1, 0], [], []>} : vector<8x64xf32>, vector<8x64xf32>, vector<8x8xf32> -> vector<8x8xf32>
    %cst_12 = arith.constant 1.250000e-01 : f32
    %28 = vector.broadcast %cst_12 : f32 to vector<8x8xf32>
    %29 = arith.mulf %27, %28 : vector<8x8xf32>
    %cst_13 = arith.constant dense<0xFF800000> : vector<8xf32>
    %30 = vector.multi_reduction <maximumf>, %29, %cst_13 [1] : vector<8x8xf32> to vector<8xf32>
    %31 = vector.shape_cast %30 : vector<8xf32> to vector<8x1xf32>
    %32 = vector.broadcast %31 : vector<8x1xf32> to vector<8x8xf32>
    %33 = arith.subf %29, %32 : vector<8x8xf32>
    %34 = math.exp %33 : vector<8x8xf32>
    %cst_14 = arith.constant dense<0.000000e+00> : vector<8xf32>
    %35 = vector.multi_reduction <add>, %34, %cst_14 [1] : vector<8x8xf32> to vector<8xf32>
    %36 = vector.shape_cast %35 : vector<8xf32> to vector<8x1xf32>
    %37 = tpu.reciprocal %36 {approx = true} : vector<8x1xf32> -> vector<8x1xf32>
    %38 = vector.broadcast %37 : vector<8x1xf32> to vector<8x8xf32>
    %39 = arith.mulf %34, %38 : vector<8x8xf32>
    %cst_15 = arith.constant dense<0.000000e+00> : vector<8x64xf32>
    %40 = tpu.matmul %39, %26, %cst_15 {dimension_numbers = #tpu.dot_dimension_numbers<[1], [0], [0], [1], [0, 0, 1, 1], [], []>} : vector<8x8xf32>, vector<8x64xf32>, vector<8x64xf32> -> vector<8x64xf32>
    %41 = vector.extract_strided_slice %6 {offsets = [0, 128], sizes = [8, 64], strides = [1, 1]} : vector<8x768xf32> to vector<8x64xf32>
    %42 = vector.extract_strided_slice %6 {offsets = [0, 384], sizes = [8, 64], strides = [1, 1]} : vector<8x768xf32> to vector<8x64xf32>
    %43 = vector.extract_strided_slice %6 {offsets = [0, 640], sizes = [8, 64], strides = [1, 1]} : vector<8x768xf32> to vector<8x64xf32>
    %cst_16 = arith.constant dense<0.000000e+00> : vector<8x8xf32>
    %44 = tpu.matmul %41, %42, %cst_16 {dimension_numbers = #tpu.dot_dimension_numbers<[1], [1], [0], [0], [0, 0, 1, 0], [], []>} : vector<8x64xf32>, vector<8x64xf32>, vector<8x8xf32> -> vector<8x8xf32>
    %cst_17 = arith.constant 1.250000e-01 : f32
    %45 = vector.broadcast %cst_17 : f32 to vector<8x8xf32>
    %46 = arith.mulf %44, %45 : vector<8x8xf32>
    %cst_18 = arith.constant dense<0xFF800000> : vector<8xf32>
    %47 = vector.multi_reduction <maximumf>, %46, %cst_18 [1] : vector<8x8xf32> to vector<8xf32>
    %48 = vector.shape_cast %47 : vector<8xf32> to vector<8x1xf32>
    %49 = vector.broadcast %48 : vector<8x1xf32> to vector<8x8xf32>
    %50 = arith.subf %46, %49 : vector<8x8xf32>
    %51 = math.exp %50 : vector<8x8xf32>
    %cst_19 = arith.constant dense<0.000000e+00> : vector<8xf32>
    %52 = vector.multi_reduction <add>, %51, %cst_19 [1] : vector<8x8xf32> to vector<8xf32>
    %53 = vector.shape_cast %52 : vector<8xf32> to vector<8x1xf32>
    %54 = tpu.reciprocal %53 {approx = true} : vector<8x1xf32> -> vector<8x1xf32>
    %55 = vector.broadcast %54 : vector<8x1xf32> to vector<8x8xf32>
    %56 = arith.mulf %51, %55 : vector<8x8xf32>
    %cst_20 = arith.constant dense<0.000000e+00> : vector<8x64xf32>
    %57 = tpu.matmul %56, %43, %cst_20 {dimension_numbers = #tpu.dot_dimension_numbers<[1], [0], [0], [1], [0, 0, 1, 1], [], []>} : vector<8x8xf32>, vector<8x64xf32>, vector<8x64xf32> -> vector<8x64xf32>
    %58 = vector.extract_strided_slice %6 {offsets = [0, 192], sizes = [8, 64], strides = [1, 1]} : vector<8x768xf32> to vector<8x64xf32>
    %59 = vector.extract_strided_slice %6 {offsets = [0, 448], sizes = [8, 64], strides = [1, 1]} : vector<8x768xf32> to vector<8x64xf32>
    %60 = vector.extract_strided_slice %6 {offsets = [0, 704], sizes = [8, 64], strides = [1, 1]} : vector<8x768xf32> to vector<8x64xf32>
    %cst_21 = arith.constant dense<0.000000e+00> : vector<8x8xf32>
    %61 = tpu.matmul %58, %59, %cst_21 {dimension_numbers = #tpu.dot_dimension_numbers<[1], [1], [0], [0], [0, 0, 1, 0], [], []>} : vector<8x64xf32>, vector<8x64xf32>, vector<8x8xf32> -> vector<8x8xf32>
    %cst_22 = arith.constant 1.250000e-01 : f32
    %62 = vector.broadcast %cst_22 : f32 to vector<8x8xf32>
    %63 = arith.mulf %61, %62 : vector<8x8xf32>
    %cst_23 = arith.constant dense<0xFF800000> : vector<8xf32>
    %64 = vector.multi_reduction <maximumf>, %63, %cst_23 [1] : vector<8x8xf32> to vector<8xf32>
    %65 = vector.shape_cast %64 : vector<8xf32> to vector<8x1xf32>
    %66 = vector.broadcast %65 : vector<8x1xf32> to vector<8x8xf32>
    %67 = arith.subf %63, %66 : vector<8x8xf32>
    %68 = math.exp %67 : vector<8x8xf32>
    %cst_24 = arith.constant dense<0.000000e+00> : vector<8xf32>
    %69 = vector.multi_reduction <add>, %68, %cst_24 [1] : vector<8x8xf32> to vector<8xf32>
    %70 = vector.shape_cast %69 : vector<8xf32> to vector<8x1xf32>
    %71 = tpu.reciprocal %70 {approx = true} : vector<8x1xf32> -> vector<8x1xf32>
    %72 = vector.broadcast %71 : vector<8x1xf32> to vector<8x8xf32>
    %73 = arith.mulf %68, %72 : vector<8x8xf32>
    %cst_25 = arith.constant dense<0.000000e+00> : vector<8x64xf32>
    %74 = tpu.matmul %73, %60, %cst_25 {dimension_numbers = #tpu.dot_dimension_numbers<[1], [0], [0], [1], [0, 0, 1, 1], [], []>} : vector<8x8xf32>, vector<8x64xf32>, vector<8x64xf32> -> vector<8x64xf32>
    %75 = tpu.concatenate %23, %40, %57, %74 in 1 : vector<8x64xf32>, vector<8x64xf32>, vector<8x64xf32>, vector<8x64xf32> -> vector<8x256xf32>
    %c0_26 = arith.constant 0 : index
    %c0_27 = arith.constant 0 : index
    %c0_28 = arith.constant 0 : index
    %76 = vector.load %arg4[%c0_26, %c0_27, %c0_28] : memref<1x8x256xf32, #tpu.memory_space<vmem>>, vector<1x8x256xf32>
    %77 = vector.shape_cast %76 : vector<1x8x256xf32> to vector<8x256xf32>
    %78 = arith.addf %75, %77 : vector<8x256xf32>
    %c0_29 = arith.constant 0 : index
    %c0_30 = arith.constant 0 : index
    %c0_31 = arith.constant 0 : index
    %79 = vector.load %arg5[%c0_29, %c0_30, %c0_31] : memref<1x8x256xf32, #tpu.memory_space<vmem>>, vector<1x8x256xf32>
    %80 = vector.shape_cast %79 : vector<1x8x256xf32> to vector<8x256xf32>
    %81 = vector.shape_cast %78 : vector<8x256xf32> to vector<1x8x256xf32>
    tpu.vector_store %arg5[%c0_29, %c0_30, %c0_31], %81 {strides = array<i32>} : memref<1x8x256xf32, #tpu.memory_space<vmem>>, vector<1x8x256xf32>,
    return
  }
  func.func @transform_0(%arg0: i32) -> (i32, i32, i32) {
    %c0_i32 = arith.constant 0 : i32
    %c0_i32_0 = arith.constant 0 : i32
    %c0_i32_1 = arith.constant 0 : i32
    return %arg0, %c0_i32, %c0_i32_0 : i32, i32, i32
  }
  func.func @transform_1(%arg0: i32) -> (i32, i32) {
    %c0_i32 = arith.constant 0 : i32
    %c0_i32_0 = arith.constant 0 : i32
    %c0_i32_1 = arith.constant 0 : i32
    return %c0_i32, %c0_i32_0 : i32, i32
  }
  func.func @transform_2(%arg0: i32) -> (i32, i32) {
    %c0_i32 = arith.constant 0 : i32
    %c0_i32_0 = arith.constant 0 : i32
    %c0_i32_1 = arith.constant 0 : i32
    return %c0_i32, %c0_i32_0 : i32, i32
  }
  func.func @transform_3(%arg0: i32) -> (i32, i32, i32) {
    %c0_i32 = arith.constant 0 : i32
    %c0_i32_0 = arith.constant 0 : i32
    %c0_i32_1 = arith.constant 0 : i32
    return %arg0, %c0_i32, %c0_i32_0 : i32, i32, i32
  }
  func.func @transform_4(%arg0: i32) -> (i32, i32, i32) {
    %c0_i32 = arith.constant 0 : i32
    %c0_i32_0 = arith.constant 0 : i32
    %c0_i32_1 = arith.constant 0 : i32
    return %arg0, %c0_i32, %c0_i32_0 : i32, i32, i32
  }
}

module attributes {stable_mosaic.version = 11 : i64} {
  func.func @conv_kernel(%arg0: i32, %arg1: memref<1x4x1024xf32, #tpu.memory_space<vmem>>, %arg2: memref<27x4x4xf32, #tpu.memory_space<vmem>>, %arg3: memref<4x1xf32, #tpu.memory_space<vmem>>, %arg4: memref<4x4xf32, #tpu.memory_space<vmem>>, %arg5: memref<4x1xf32, #tpu.memory_space<vmem>>, %arg6: memref<4x4xf32, #tpu.memory_space<vmem>>, %arg7: memref<4x1xf32, #tpu.memory_space<vmem>>, %arg8: memref<1x4x800xf32, #tpu.memory_space<vmem>>, %arg9: memref<1x4x800xf32, #tpu.memory_space<vmem>>) attributes {dimension_semantics = [#tpu.dimension_semantics<parallel>], iteration_bounds = array<i64: 2>, scalar_prefetch = 0 : i64, scratch_operands = 0 : i64, tpu.core_type = #tpu.core_type<tc>, window_params = [{transform_indices = @transform_0, window_bounds = array<i64: 1, 4, 1024>}, {pipeline_mode = #tpu.pipeline_mode<synchronous>, transform_indices = @transform_1, window_bounds = array<i64: 27, 4, 4>}, {pipeline_mode = #tpu.pipeline_mode<synchronous>, transform_indices = @transform_2, window_bounds = array<i64: 4, 1>}, {pipeline_mode = #tpu.pipeline_mode<synchronous>, transform_indices = @transform_3, window_bounds = array<i64: 4, 4>}, {pipeline_mode = #tpu.pipeline_mode<synchronous>, transform_indices = @transform_4, window_bounds = array<i64: 4, 1>}, {pipeline_mode = #tpu.pipeline_mode<synchronous>, transform_indices = @transform_5, window_bounds = array<i64: 4, 4>}, {pipeline_mode = #tpu.pipeline_mode<synchronous>, transform_indices = @transform_6, window_bounds = array<i64: 4, 1>}, {transform_indices = @transform_7, window_bounds = array<i64: 1, 4, 800>}, {transform_indices = @transform_8, window_bounds = array<i64: 1, 4, 800>}]} {
    %c0 = arith.constant 0 : index
    %c0_0 = arith.constant 0 : index
    %c0_1 = arith.constant 0 : index
    %0 = vector.load %arg1[%c0, %c0_0, %c0_1] : memref<1x4x1024xf32, #tpu.memory_space<vmem>>, vector<1x4x1024xf32>
    %1 = vector.shape_cast %0 : vector<1x4x1024xf32> to vector<4x1024xf32>
    %cst = arith.constant 0.000000e+00 : f32
    %2 = vector.broadcast %cst : f32 to vector<4x800xf32>
    %c0_2 = arith.constant 0 : index
    %c0_3 = arith.constant 0 : index
    %c0_4 = arith.constant 0 : index
    %3 = vector.load %arg2[%c0_2, %c0_3, %c0_4] : memref<27x4x4xf32, #tpu.memory_space<vmem>>, vector<1x4x4xf32>
    %4 = vector.shape_cast %3 : vector<1x4x4xf32> to vector<4x4xf32>
    %5 = vector.extract_strided_slice %1 {offsets = [0, 0], sizes = [4, 800], strides = [1, 1]} : vector<4x1024xf32> to vector<4x800xf32>
    %cst_5 = arith.constant dense<0.000000e+00> : vector<4x800xf32>
    %6 = tpu.matmul %4, %5, %cst_5 {dimension_numbers = #tpu.dot_dimension_numbers<[1], [0], [0], [1], [0, 0, 1, 1], [], []>} : vector<4x4xf32>, vector<4x800xf32>, vector<4x800xf32> -> vector<4x800xf32>
    %7 = arith.addf %2, %6 : vector<4x800xf32>
    %c1 = arith.constant 1 : index
    %c0_6 = arith.constant 0 : index
    %c0_7 = arith.constant 0 : index
    %8 = vector.load %arg2[%c1, %c0_6, %c0_7] : memref<27x4x4xf32, #tpu.memory_space<vmem>>, vector<1x4x4xf32>
    %9 = vector.shape_cast %8 : vector<1x4x4xf32> to vector<4x4xf32>
    %10 = vector.extract_strided_slice %1 {offsets = [0, 1], sizes = [4, 800], strides = [1, 1]} : vector<4x1024xf32> to vector<4x800xf32>
    %cst_8 = arith.constant dense<0.000000e+00> : vector<4x800xf32>
    %11 = tpu.matmul %9, %10, %cst_8 {dimension_numbers = #tpu.dot_dimension_numbers<[1], [0], [0], [1], [0, 0, 1, 1], [], []>} : vector<4x4xf32>, vector<4x800xf32>, vector<4x800xf32> -> vector<4x800xf32>
    %12 = arith.addf %7, %11 : vector<4x800xf32>
    %c2 = arith.constant 2 : index
    %c0_9 = arith.constant 0 : index
    %c0_10 = arith.constant 0 : index
    %13 = vector.load %arg2[%c2, %c0_9, %c0_10] : memref<27x4x4xf32, #tpu.memory_space<vmem>>, vector<1x4x4xf32>
    %14 = vector.shape_cast %13 : vector<1x4x4xf32> to vector<4x4xf32>
    %15 = vector.extract_strided_slice %1 {offsets = [0, 2], sizes = [4, 800], strides = [1, 1]} : vector<4x1024xf32> to vector<4x800xf32>
    %cst_11 = arith.constant dense<0.000000e+00> : vector<4x800xf32>
    %16 = tpu.matmul %14, %15, %cst_11 {dimension_numbers = #tpu.dot_dimension_numbers<[1], [0], [0], [1], [0, 0, 1, 1], [], []>} : vector<4x4xf32>, vector<4x800xf32>, vector<4x800xf32> -> vector<4x800xf32>
    %17 = arith.addf %12, %16 : vector<4x800xf32>
    %c3 = arith.constant 3 : index
    %c0_12 = arith.constant 0 : index
    %c0_13 = arith.constant 0 : index
    %18 = vector.load %arg2[%c3, %c0_12, %c0_13] : memref<27x4x4xf32, #tpu.memory_space<vmem>>, vector<1x4x4xf32>
    %19 = vector.shape_cast %18 : vector<1x4x4xf32> to vector<4x4xf32>
    %20 = vector.extract_strided_slice %1 {offsets = [0, 10], sizes = [4, 800], strides = [1, 1]} : vector<4x1024xf32> to vector<4x800xf32>
    %cst_14 = arith.constant dense<0.000000e+00> : vector<4x800xf32>
    %21 = tpu.matmul %19, %20, %cst_14 {dimension_numbers = #tpu.dot_dimension_numbers<[1], [0], [0], [1], [0, 0, 1, 1], [], []>} : vector<4x4xf32>, vector<4x800xf32>, vector<4x800xf32> -> vector<4x800xf32>
    %22 = arith.addf %17, %21 : vector<4x800xf32>
    %c4 = arith.constant 4 : index
    %c0_15 = arith.constant 0 : index
    %c0_16 = arith.constant 0 : index
    %23 = vector.load %arg2[%c4, %c0_15, %c0_16] : memref<27x4x4xf32, #tpu.memory_space<vmem>>, vector<1x4x4xf32>
    %24 = vector.shape_cast %23 : vector<1x4x4xf32> to vector<4x4xf32>
    %25 = vector.extract_strided_slice %1 {offsets = [0, 11], sizes = [4, 800], strides = [1, 1]} : vector<4x1024xf32> to vector<4x800xf32>
    %cst_17 = arith.constant dense<0.000000e+00> : vector<4x800xf32>
    %26 = tpu.matmul %24, %25, %cst_17 {dimension_numbers = #tpu.dot_dimension_numbers<[1], [0], [0], [1], [0, 0, 1, 1], [], []>} : vector<4x4xf32>, vector<4x800xf32>, vector<4x800xf32> -> vector<4x800xf32>
    %27 = arith.addf %22, %26 : vector<4x800xf32>
    %c5 = arith.constant 5 : index
    %c0_18 = arith.constant 0 : index
    %c0_19 = arith.constant 0 : index
    %28 = vector.load %arg2[%c5, %c0_18, %c0_19] : memref<27x4x4xf32, #tpu.memory_space<vmem>>, vector<1x4x4xf32>
    %29 = vector.shape_cast %28 : vector<1x4x4xf32> to vector<4x4xf32>
    %30 = vector.extract_strided_slice %1 {offsets = [0, 12], sizes = [4, 800], strides = [1, 1]} : vector<4x1024xf32> to vector<4x800xf32>
    %cst_20 = arith.constant dense<0.000000e+00> : vector<4x800xf32>
    %31 = tpu.matmul %29, %30, %cst_20 {dimension_numbers = #tpu.dot_dimension_numbers<[1], [0], [0], [1], [0, 0, 1, 1], [], []>} : vector<4x4xf32>, vector<4x800xf32>, vector<4x800xf32> -> vector<4x800xf32>
    %32 = arith.addf %27, %31 : vector<4x800xf32>
    %c6 = arith.constant 6 : index
    %c0_21 = arith.constant 0 : index
    %c0_22 = arith.constant 0 : index
    %33 = vector.load %arg2[%c6, %c0_21, %c0_22] : memref<27x4x4xf32, #tpu.memory_space<vmem>>, vector<1x4x4xf32>
    %34 = vector.shape_cast %33 : vector<1x4x4xf32> to vector<4x4xf32>
    %35 = vector.extract_strided_slice %1 {offsets = [0, 20], sizes = [4, 800], strides = [1, 1]} : vector<4x1024xf32> to vector<4x800xf32>
    %cst_23 = arith.constant dense<0.000000e+00> : vector<4x800xf32>
    %36 = tpu.matmul %34, %35, %cst_23 {dimension_numbers = #tpu.dot_dimension_numbers<[1], [0], [0], [1], [0, 0, 1, 1], [], []>} : vector<4x4xf32>, vector<4x800xf32>, vector<4x800xf32> -> vector<4x800xf32>
    %37 = arith.addf %32, %36 : vector<4x800xf32>
    %c7 = arith.constant 7 : index
    %c0_24 = arith.constant 0 : index
    %c0_25 = arith.constant 0 : index
    %38 = vector.load %arg2[%c7, %c0_24, %c0_25] : memref<27x4x4xf32, #tpu.memory_space<vmem>>, vector<1x4x4xf32>
    %39 = vector.shape_cast %38 : vector<1x4x4xf32> to vector<4x4xf32>
    %40 = vector.extract_strided_slice %1 {offsets = [0, 21], sizes = [4, 800], strides = [1, 1]} : vector<4x1024xf32> to vector<4x800xf32>
    %cst_26 = arith.constant dense<0.000000e+00> : vector<4x800xf32>
    %41 = tpu.matmul %39, %40, %cst_26 {dimension_numbers = #tpu.dot_dimension_numbers<[1], [0], [0], [1], [0, 0, 1, 1], [], []>} : vector<4x4xf32>, vector<4x800xf32>, vector<4x800xf32> -> vector<4x800xf32>
    %42 = arith.addf %37, %41 : vector<4x800xf32>
    %c8 = arith.constant 8 : index
    %c0_27 = arith.constant 0 : index
    %c0_28 = arith.constant 0 : index
    %43 = vector.load %arg2[%c8, %c0_27, %c0_28] : memref<27x4x4xf32, #tpu.memory_space<vmem>>, vector<1x4x4xf32>
    %44 = vector.shape_cast %43 : vector<1x4x4xf32> to vector<4x4xf32>
    %45 = vector.extract_strided_slice %1 {offsets = [0, 22], sizes = [4, 800], strides = [1, 1]} : vector<4x1024xf32> to vector<4x800xf32>
    %cst_29 = arith.constant dense<0.000000e+00> : vector<4x800xf32>
    %46 = tpu.matmul %44, %45, %cst_29 {dimension_numbers = #tpu.dot_dimension_numbers<[1], [0], [0], [1], [0, 0, 1, 1], [], []>} : vector<4x4xf32>, vector<4x800xf32>, vector<4x800xf32> -> vector<4x800xf32>
    %47 = arith.addf %42, %46 : vector<4x800xf32>
    %c9 = arith.constant 9 : index
    %c0_30 = arith.constant 0 : index
    %c0_31 = arith.constant 0 : index
    %48 = vector.load %arg2[%c9, %c0_30, %c0_31] : memref<27x4x4xf32, #tpu.memory_space<vmem>>, vector<1x4x4xf32>
    %49 = vector.shape_cast %48 : vector<1x4x4xf32> to vector<4x4xf32>
    %50 = vector.extract_strided_slice %1 {offsets = [0, 100], sizes = [4, 800], strides = [1, 1]} : vector<4x1024xf32> to vector<4x800xf32>
    %cst_32 = arith.constant dense<0.000000e+00> : vector<4x800xf32>
    %51 = tpu.matmul %49, %50, %cst_32 {dimension_numbers = #tpu.dot_dimension_numbers<[1], [0], [0], [1], [0, 0, 1, 1], [], []>} : vector<4x4xf32>, vector<4x800xf32>, vector<4x800xf32> -> vector<4x800xf32>
    %52 = arith.addf %47, %51 : vector<4x800xf32>
    %c10 = arith.constant 10 : index
    %c0_33 = arith.constant 0 : index
    %c0_34 = arith.constant 0 : index
    %53 = vector.load %arg2[%c10, %c0_33, %c0_34] : memref<27x4x4xf32, #tpu.memory_space<vmem>>, vector<1x4x4xf32>
    %54 = vector.shape_cast %53 : vector<1x4x4xf32> to vector<4x4xf32>
    %55 = vector.extract_strided_slice %1 {offsets = [0, 101], sizes = [4, 800], strides = [1, 1]} : vector<4x1024xf32> to vector<4x800xf32>
    %cst_35 = arith.constant dense<0.000000e+00> : vector<4x800xf32>
    %56 = tpu.matmul %54, %55, %cst_35 {dimension_numbers = #tpu.dot_dimension_numbers<[1], [0], [0], [1], [0, 0, 1, 1], [], []>} : vector<4x4xf32>, vector<4x800xf32>, vector<4x800xf32> -> vector<4x800xf32>
    %57 = arith.addf %52, %56 : vector<4x800xf32>
    %c11 = arith.constant 11 : index
    %c0_36 = arith.constant 0 : index
    %c0_37 = arith.constant 0 : index
    %58 = vector.load %arg2[%c11, %c0_36, %c0_37] : memref<27x4x4xf32, #tpu.memory_space<vmem>>, vector<1x4x4xf32>
    %59 = vector.shape_cast %58 : vector<1x4x4xf32> to vector<4x4xf32>
    %60 = vector.extract_strided_slice %1 {offsets = [0, 102], sizes = [4, 800], strides = [1, 1]} : vector<4x1024xf32> to vector<4x800xf32>
    %cst_38 = arith.constant dense<0.000000e+00> : vector<4x800xf32>
    %61 = tpu.matmul %59, %60, %cst_38 {dimension_numbers = #tpu.dot_dimension_numbers<[1], [0], [0], [1], [0, 0, 1, 1], [], []>} : vector<4x4xf32>, vector<4x800xf32>, vector<4x800xf32> -> vector<4x800xf32>
    %62 = arith.addf %57, %61 : vector<4x800xf32>
    %c12 = arith.constant 12 : index
    %c0_39 = arith.constant 0 : index
    %c0_40 = arith.constant 0 : index
    %63 = vector.load %arg2[%c12, %c0_39, %c0_40] : memref<27x4x4xf32, #tpu.memory_space<vmem>>, vector<1x4x4xf32>
    %64 = vector.shape_cast %63 : vector<1x4x4xf32> to vector<4x4xf32>
    %65 = vector.extract_strided_slice %1 {offsets = [0, 110], sizes = [4, 800], strides = [1, 1]} : vector<4x1024xf32> to vector<4x800xf32>
    %cst_41 = arith.constant dense<0.000000e+00> : vector<4x800xf32>
    %66 = tpu.matmul %64, %65, %cst_41 {dimension_numbers = #tpu.dot_dimension_numbers<[1], [0], [0], [1], [0, 0, 1, 1], [], []>} : vector<4x4xf32>, vector<4x800xf32>, vector<4x800xf32> -> vector<4x800xf32>
    %67 = arith.addf %62, %66 : vector<4x800xf32>
    %c13 = arith.constant 13 : index
    %c0_42 = arith.constant 0 : index
    %c0_43 = arith.constant 0 : index
    %68 = vector.load %arg2[%c13, %c0_42, %c0_43] : memref<27x4x4xf32, #tpu.memory_space<vmem>>, vector<1x4x4xf32>
    %69 = vector.shape_cast %68 : vector<1x4x4xf32> to vector<4x4xf32>
    %70 = vector.extract_strided_slice %1 {offsets = [0, 111], sizes = [4, 800], strides = [1, 1]} : vector<4x1024xf32> to vector<4x800xf32>
    %cst_44 = arith.constant dense<0.000000e+00> : vector<4x800xf32>
    %71 = tpu.matmul %69, %70, %cst_44 {dimension_numbers = #tpu.dot_dimension_numbers<[1], [0], [0], [1], [0, 0, 1, 1], [], []>} : vector<4x4xf32>, vector<4x800xf32>, vector<4x800xf32> -> vector<4x800xf32>
    %72 = arith.addf %67, %71 : vector<4x800xf32>
    %c14 = arith.constant 14 : index
    %c0_45 = arith.constant 0 : index
    %c0_46 = arith.constant 0 : index
    %73 = vector.load %arg2[%c14, %c0_45, %c0_46] : memref<27x4x4xf32, #tpu.memory_space<vmem>>, vector<1x4x4xf32>
    %74 = vector.shape_cast %73 : vector<1x4x4xf32> to vector<4x4xf32>
    %75 = vector.extract_strided_slice %1 {offsets = [0, 112], sizes = [4, 800], strides = [1, 1]} : vector<4x1024xf32> to vector<4x800xf32>
    %cst_47 = arith.constant dense<0.000000e+00> : vector<4x800xf32>
    %76 = tpu.matmul %74, %75, %cst_47 {dimension_numbers = #tpu.dot_dimension_numbers<[1], [0], [0], [1], [0, 0, 1, 1], [], []>} : vector<4x4xf32>, vector<4x800xf32>, vector<4x800xf32> -> vector<4x800xf32>
    %77 = arith.addf %72, %76 : vector<4x800xf32>
    %c15 = arith.constant 15 : index
    %c0_48 = arith.constant 0 : index
    %c0_49 = arith.constant 0 : index
    %78 = vector.load %arg2[%c15, %c0_48, %c0_49] : memref<27x4x4xf32, #tpu.memory_space<vmem>>, vector<1x4x4xf32>
    %79 = vector.shape_cast %78 : vector<1x4x4xf32> to vector<4x4xf32>
    %80 = vector.extract_strided_slice %1 {offsets = [0, 120], sizes = [4, 800], strides = [1, 1]} : vector<4x1024xf32> to vector<4x800xf32>
    %cst_50 = arith.constant dense<0.000000e+00> : vector<4x800xf32>
    %81 = tpu.matmul %79, %80, %cst_50 {dimension_numbers = #tpu.dot_dimension_numbers<[1], [0], [0], [1], [0, 0, 1, 1], [], []>} : vector<4x4xf32>, vector<4x800xf32>, vector<4x800xf32> -> vector<4x800xf32>
    %82 = arith.addf %77, %81 : vector<4x800xf32>
    %c16 = arith.constant 16 : index
    %c0_51 = arith.constant 0 : index
    %c0_52 = arith.constant 0 : index
    %83 = vector.load %arg2[%c16, %c0_51, %c0_52] : memref<27x4x4xf32, #tpu.memory_space<vmem>>, vector<1x4x4xf32>
    %84 = vector.shape_cast %83 : vector<1x4x4xf32> to vector<4x4xf32>
    %85 = vector.extract_strided_slice %1 {offsets = [0, 121], sizes = [4, 800], strides = [1, 1]} : vector<4x1024xf32> to vector<4x800xf32>
    %cst_53 = arith.constant dense<0.000000e+00> : vector<4x800xf32>
    %86 = tpu.matmul %84, %85, %cst_53 {dimension_numbers = #tpu.dot_dimension_numbers<[1], [0], [0], [1], [0, 0, 1, 1], [], []>} : vector<4x4xf32>, vector<4x800xf32>, vector<4x800xf32> -> vector<4x800xf32>
    %87 = arith.addf %82, %86 : vector<4x800xf32>
    %c17 = arith.constant 17 : index
    %c0_54 = arith.constant 0 : index
    %c0_55 = arith.constant 0 : index
    %88 = vector.load %arg2[%c17, %c0_54, %c0_55] : memref<27x4x4xf32, #tpu.memory_space<vmem>>, vector<1x4x4xf32>
    %89 = vector.shape_cast %88 : vector<1x4x4xf32> to vector<4x4xf32>
    %90 = vector.extract_strided_slice %1 {offsets = [0, 122], sizes = [4, 800], strides = [1, 1]} : vector<4x1024xf32> to vector<4x800xf32>
    %cst_56 = arith.constant dense<0.000000e+00> : vector<4x800xf32>
    %91 = tpu.matmul %89, %90, %cst_56 {dimension_numbers = #tpu.dot_dimension_numbers<[1], [0], [0], [1], [0, 0, 1, 1], [], []>} : vector<4x4xf32>, vector<4x800xf32>, vector<4x800xf32> -> vector<4x800xf32>
    %92 = arith.addf %87, %91 : vector<4x800xf32>
    %c18 = arith.constant 18 : index
    %c0_57 = arith.constant 0 : index
    %c0_58 = arith.constant 0 : index
    %93 = vector.load %arg2[%c18, %c0_57, %c0_58] : memref<27x4x4xf32, #tpu.memory_space<vmem>>, vector<1x4x4xf32>
    %94 = vector.shape_cast %93 : vector<1x4x4xf32> to vector<4x4xf32>
    %95 = vector.extract_strided_slice %1 {offsets = [0, 200], sizes = [4, 800], strides = [1, 1]} : vector<4x1024xf32> to vector<4x800xf32>
    %cst_59 = arith.constant dense<0.000000e+00> : vector<4x800xf32>
    %96 = tpu.matmul %94, %95, %cst_59 {dimension_numbers = #tpu.dot_dimension_numbers<[1], [0], [0], [1], [0, 0, 1, 1], [], []>} : vector<4x4xf32>, vector<4x800xf32>, vector<4x800xf32> -> vector<4x800xf32>
    %97 = arith.addf %92, %96 : vector<4x800xf32>
    %c19 = arith.constant 19 : index
    %c0_60 = arith.constant 0 : index
    %c0_61 = arith.constant 0 : index
    %98 = vector.load %arg2[%c19, %c0_60, %c0_61] : memref<27x4x4xf32, #tpu.memory_space<vmem>>, vector<1x4x4xf32>
    %99 = vector.shape_cast %98 : vector<1x4x4xf32> to vector<4x4xf32>
    %100 = vector.extract_strided_slice %1 {offsets = [0, 201], sizes = [4, 800], strides = [1, 1]} : vector<4x1024xf32> to vector<4x800xf32>
    %cst_62 = arith.constant dense<0.000000e+00> : vector<4x800xf32>
    %101 = tpu.matmul %99, %100, %cst_62 {dimension_numbers = #tpu.dot_dimension_numbers<[1], [0], [0], [1], [0, 0, 1, 1], [], []>} : vector<4x4xf32>, vector<4x800xf32>, vector<4x800xf32> -> vector<4x800xf32>
    %102 = arith.addf %97, %101 : vector<4x800xf32>
    %c20 = arith.constant 20 : index
    %c0_63 = arith.constant 0 : index
    %c0_64 = arith.constant 0 : index
    %103 = vector.load %arg2[%c20, %c0_63, %c0_64] : memref<27x4x4xf32, #tpu.memory_space<vmem>>, vector<1x4x4xf32>
    %104 = vector.shape_cast %103 : vector<1x4x4xf32> to vector<4x4xf32>
    %105 = vector.extract_strided_slice %1 {offsets = [0, 202], sizes = [4, 800], strides = [1, 1]} : vector<4x1024xf32> to vector<4x800xf32>
    %cst_65 = arith.constant dense<0.000000e+00> : vector<4x800xf32>
    %106 = tpu.matmul %104, %105, %cst_65 {dimension_numbers = #tpu.dot_dimension_numbers<[1], [0], [0], [1], [0, 0, 1, 1], [], []>} : vector<4x4xf32>, vector<4x800xf32>, vector<4x800xf32> -> vector<4x800xf32>
    %107 = arith.addf %102, %106 : vector<4x800xf32>
    %c21 = arith.constant 21 : index
    %c0_66 = arith.constant 0 : index
    %c0_67 = arith.constant 0 : index
    %108 = vector.load %arg2[%c21, %c0_66, %c0_67] : memref<27x4x4xf32, #tpu.memory_space<vmem>>, vector<1x4x4xf32>
    %109 = vector.shape_cast %108 : vector<1x4x4xf32> to vector<4x4xf32>
    %110 = vector.extract_strided_slice %1 {offsets = [0, 210], sizes = [4, 800], strides = [1, 1]} : vector<4x1024xf32> to vector<4x800xf32>
    %cst_68 = arith.constant dense<0.000000e+00> : vector<4x800xf32>
    %111 = tpu.matmul %109, %110, %cst_68 {dimension_numbers = #tpu.dot_dimension_numbers<[1], [0], [0], [1], [0, 0, 1, 1], [], []>} : vector<4x4xf32>, vector<4x800xf32>, vector<4x800xf32> -> vector<4x800xf32>
    %112 = arith.addf %107, %111 : vector<4x800xf32>
    %c22 = arith.constant 22 : index
    %c0_69 = arith.constant 0 : index
    %c0_70 = arith.constant 0 : index
    %113 = vector.load %arg2[%c22, %c0_69, %c0_70] : memref<27x4x4xf32, #tpu.memory_space<vmem>>, vector<1x4x4xf32>
    %114 = vector.shape_cast %113 : vector<1x4x4xf32> to vector<4x4xf32>
    %115 = vector.extract_strided_slice %1 {offsets = [0, 211], sizes = [4, 800], strides = [1, 1]} : vector<4x1024xf32> to vector<4x800xf32>
    %cst_71 = arith.constant dense<0.000000e+00> : vector<4x800xf32>
    %116 = tpu.matmul %114, %115, %cst_71 {dimension_numbers = #tpu.dot_dimension_numbers<[1], [0], [0], [1], [0, 0, 1, 1], [], []>} : vector<4x4xf32>, vector<4x800xf32>, vector<4x800xf32> -> vector<4x800xf32>
    %117 = arith.addf %112, %116 : vector<4x800xf32>
    %c23 = arith.constant 23 : index
    %c0_72 = arith.constant 0 : index
    %c0_73 = arith.constant 0 : index
    %118 = vector.load %arg2[%c23, %c0_72, %c0_73] : memref<27x4x4xf32, #tpu.memory_space<vmem>>, vector<1x4x4xf32>
    %119 = vector.shape_cast %118 : vector<1x4x4xf32> to vector<4x4xf32>
    %120 = vector.extract_strided_slice %1 {offsets = [0, 212], sizes = [4, 800], strides = [1, 1]} : vector<4x1024xf32> to vector<4x800xf32>
    %cst_74 = arith.constant dense<0.000000e+00> : vector<4x800xf32>
    %121 = tpu.matmul %119, %120, %cst_74 {dimension_numbers = #tpu.dot_dimension_numbers<[1], [0], [0], [1], [0, 0, 1, 1], [], []>} : vector<4x4xf32>, vector<4x800xf32>, vector<4x800xf32> -> vector<4x800xf32>
    %122 = arith.addf %117, %121 : vector<4x800xf32>
    %c24 = arith.constant 24 : index
    %c0_75 = arith.constant 0 : index
    %c0_76 = arith.constant 0 : index
    %123 = vector.load %arg2[%c24, %c0_75, %c0_76] : memref<27x4x4xf32, #tpu.memory_space<vmem>>, vector<1x4x4xf32>
    %124 = vector.shape_cast %123 : vector<1x4x4xf32> to vector<4x4xf32>
    %125 = vector.extract_strided_slice %1 {offsets = [0, 220], sizes = [4, 800], strides = [1, 1]} : vector<4x1024xf32> to vector<4x800xf32>
    %cst_77 = arith.constant dense<0.000000e+00> : vector<4x800xf32>
    %126 = tpu.matmul %124, %125, %cst_77 {dimension_numbers = #tpu.dot_dimension_numbers<[1], [0], [0], [1], [0, 0, 1, 1], [], []>} : vector<4x4xf32>, vector<4x800xf32>, vector<4x800xf32> -> vector<4x800xf32>
    %127 = arith.addf %122, %126 : vector<4x800xf32>
    %c25 = arith.constant 25 : index
    %c0_78 = arith.constant 0 : index
    %c0_79 = arith.constant 0 : index
    %128 = vector.load %arg2[%c25, %c0_78, %c0_79] : memref<27x4x4xf32, #tpu.memory_space<vmem>>, vector<1x4x4xf32>
    %129 = vector.shape_cast %128 : vector<1x4x4xf32> to vector<4x4xf32>
    %130 = vector.extract_strided_slice %1 {offsets = [0, 221], sizes = [4, 800], strides = [1, 1]} : vector<4x1024xf32> to vector<4x800xf32>
    %cst_80 = arith.constant dense<0.000000e+00> : vector<4x800xf32>
    %131 = tpu.matmul %129, %130, %cst_80 {dimension_numbers = #tpu.dot_dimension_numbers<[1], [0], [0], [1], [0, 0, 1, 1], [], []>} : vector<4x4xf32>, vector<4x800xf32>, vector<4x800xf32> -> vector<4x800xf32>
    %132 = arith.addf %127, %131 : vector<4x800xf32>
    %c26 = arith.constant 26 : index
    %c0_81 = arith.constant 0 : index
    %c0_82 = arith.constant 0 : index
    %133 = vector.load %arg2[%c26, %c0_81, %c0_82] : memref<27x4x4xf32, #tpu.memory_space<vmem>>, vector<1x4x4xf32>
    %134 = vector.shape_cast %133 : vector<1x4x4xf32> to vector<4x4xf32>
    %135 = vector.extract_strided_slice %1 {offsets = [0, 222], sizes = [4, 800], strides = [1, 1]} : vector<4x1024xf32> to vector<4x800xf32>
    %cst_83 = arith.constant dense<0.000000e+00> : vector<4x800xf32>
    %136 = tpu.matmul %134, %135, %cst_83 {dimension_numbers = #tpu.dot_dimension_numbers<[1], [0], [0], [1], [0, 0, 1, 1], [], []>} : vector<4x4xf32>, vector<4x800xf32>, vector<4x800xf32> -> vector<4x800xf32>
    %137 = arith.addf %132, %136 : vector<4x800xf32>
    %c0_84 = arith.constant 0 : index
    %c0_85 = arith.constant 0 : index
    %138 = vector.load %arg3[%c0_84, %c0_85] : memref<4x1xf32, #tpu.memory_space<vmem>>, vector<4x1xf32>
    %139 = vector.broadcast %138 : vector<4x1xf32> to vector<4x800xf32>
    %140 = arith.addf %137, %139 : vector<4x800xf32>
    %c0_86 = arith.constant 0 : index
    %c0_87 = arith.constant 0 : index
    %141 = vector.load %arg4[%c0_86, %c0_87] : memref<4x4xf32, #tpu.memory_space<vmem>>, vector<4x4xf32>
    %cst_88 = arith.constant dense<0.000000e+00> : vector<4x800xf32>
    %142 = tpu.matmul %141, %140, %cst_88 {dimension_numbers = #tpu.dot_dimension_numbers<[1], [0], [0], [1], [0, 0, 1, 1], [], []>} : vector<4x4xf32>, vector<4x800xf32>, vector<4x800xf32> -> vector<4x800xf32>
    %c0_89 = arith.constant 0 : index
    %c0_90 = arith.constant 0 : index
    %143 = vector.load %arg5[%c0_89, %c0_90] : memref<4x1xf32, #tpu.memory_space<vmem>>, vector<4x1xf32>
    %144 = vector.broadcast %143 : vector<4x1xf32> to vector<4x800xf32>
    %145 = arith.addf %142, %144 : vector<4x800xf32>
    %c0_91 = arith.constant 0 : index
    %c0_92 = arith.constant 0 : index
    %c0_93 = arith.constant 0 : index
    %146 = vector.load %arg8[%c0_91, %c0_92, %c0_93] : memref<1x4x800xf32, #tpu.memory_space<vmem>>, vector<1x4x800xf32>
    %147 = vector.shape_cast %146 : vector<1x4x800xf32> to vector<4x800xf32>
    %148 = vector.shape_cast %145 : vector<4x800xf32> to vector<1x4x800xf32>
    tpu.vector_store %arg8[%c0_91, %c0_92, %c0_93], %148 {strides = array<i32>} : memref<1x4x800xf32, #tpu.memory_space<vmem>>, vector<1x4x800xf32>,
    %c0_94 = arith.constant 0 : index
    %c0_95 = arith.constant 0 : index
    %149 = vector.load %arg6[%c0_94, %c0_95] : memref<4x4xf32, #tpu.memory_space<vmem>>, vector<4x4xf32>
    %cst_96 = arith.constant dense<0.000000e+00> : vector<4x800xf32>
    %150 = tpu.matmul %149, %140, %cst_96 {dimension_numbers = #tpu.dot_dimension_numbers<[1], [0], [0], [1], [0, 0, 1, 1], [], []>} : vector<4x4xf32>, vector<4x800xf32>, vector<4x800xf32> -> vector<4x800xf32>
    %c0_97 = arith.constant 0 : index
    %c0_98 = arith.constant 0 : index
    %151 = vector.load %arg7[%c0_97, %c0_98] : memref<4x1xf32, #tpu.memory_space<vmem>>, vector<4x1xf32>
    %152 = vector.broadcast %151 : vector<4x1xf32> to vector<4x800xf32>
    %153 = arith.addf %150, %152 : vector<4x800xf32>
    %c0_99 = arith.constant 0 : index
    %c0_100 = arith.constant 0 : index
    %c0_101 = arith.constant 0 : index
    %154 = vector.load %arg9[%c0_99, %c0_100, %c0_101] : memref<1x4x800xf32, #tpu.memory_space<vmem>>, vector<1x4x800xf32>
    %155 = vector.shape_cast %154 : vector<1x4x800xf32> to vector<4x800xf32>
    %156 = vector.shape_cast %153 : vector<4x800xf32> to vector<1x4x800xf32>
    tpu.vector_store %arg9[%c0_99, %c0_100, %c0_101], %156 {strides = array<i32>} : memref<1x4x800xf32, #tpu.memory_space<vmem>>, vector<1x4x800xf32>,
    return
  }
  func.func @transform_0(%arg0: i32) -> (i32, i32, i32) {
    %c0_i32 = arith.constant 0 : i32
    %c0_i32_0 = arith.constant 0 : i32
    %c0_i32_1 = arith.constant 0 : i32
    return %arg0, %c0_i32, %c0_i32_0 : i32, i32, i32
  }
  func.func @transform_1(%arg0: i32) -> (i32, i32, i32) {
    %c0_i32 = arith.constant 0 : i32
    %c0_i32_0 = arith.constant 0 : i32
    %c0_i32_1 = arith.constant 0 : i32
    %c0_i32_2 = arith.constant 0 : i32
    return %c0_i32, %c0_i32_0, %c0_i32_1 : i32, i32, i32
  }
  func.func @transform_2(%arg0: i32) -> (i32, i32) {
    %c0_i32 = arith.constant 0 : i32
    %c0_i32_0 = arith.constant 0 : i32
    %c0_i32_1 = arith.constant 0 : i32
    return %c0_i32, %c0_i32_0 : i32, i32
  }
  func.func @transform_3(%arg0: i32) -> (i32, i32) {
    %c0_i32 = arith.constant 0 : i32
    %c0_i32_0 = arith.constant 0 : i32
    %c0_i32_1 = arith.constant 0 : i32
    return %c0_i32, %c0_i32_0 : i32, i32
  }
  func.func @transform_4(%arg0: i32) -> (i32, i32) {
    %c0_i32 = arith.constant 0 : i32
    %c0_i32_0 = arith.constant 0 : i32
    %c0_i32_1 = arith.constant 0 : i32
    return %c0_i32, %c0_i32_0 : i32, i32
  }
  func.func @transform_5(%arg0: i32) -> (i32, i32) {
    %c0_i32 = arith.constant 0 : i32
    %c0_i32_0 = arith.constant 0 : i32
    %c0_i32_1 = arith.constant 0 : i32
    return %c0_i32, %c0_i32_0 : i32, i32
  }
  func.func @transform_6(%arg0: i32) -> (i32, i32) {
    %c0_i32 = arith.constant 0 : i32
    %c0_i32_0 = arith.constant 0 : i32
    %c0_i32_1 = arith.constant 0 : i32
    return %c0_i32, %c0_i32_0 : i32, i32
  }
  func.func @transform_7(%arg0: i32) -> (i32, i32, i32) {
    %c0_i32 = arith.constant 0 : i32
    %c0_i32_0 = arith.constant 0 : i32
    %c0_i32_1 = arith.constant 0 : i32
    return %arg0, %c0_i32, %c0_i32_0 : i32, i32, i32
  }
  func.func @transform_8(%arg0: i32) -> (i32, i32, i32) {
    %c0_i32 = arith.constant 0 : i32
    %c0_i32_0 = arith.constant 0 : i32
    %c0_i32_1 = arith.constant 0 : i32
    return %arg0, %c0_i32, %c0_i32_0 : i32, i32, i32
  }
}

</mosaic_0001>

<bundles_post_ra>
// kernel: transformer_block.2
= control target key start
LH: loop header
LB: loop body
LE: loop exit
PB: predicated region body
PF: predicated region fallthrough
CT: control target
= control target key end

     0   :  { %s1737_s15 = smov 0   ;;  %s2438_s0 = inlined_call_operand.vmem [shape: f32[2,8,256], index: 0, kind: input, shape index: {}]   ;;  %s2439_s1 = inlined_call_operand.vmem [shape: f32[768,256], index: 1, kind: input, shape index: {}]   ;;  %s2440_s2 = inlined_call_operand.vmem [shape: f32[1,768], index: 2, kind: input, shape index: {}]   ;;  %s2441_s3 = inlined_call_operand.vmem [shape: f32[2,8,256], index: 3, kind: input, shape index: {}]   ;;  %s2442_s4 = inlined_call_operand.vmem [shape: f32[2,8,256], index: 4, kind: output, shape index: {}]  }
   0x1 LB: > { %s1398_s16 = sadd.s32 4294967295, %s1707_s15   ;;  %p1402_p0 = scmp.ge.s32.totalorder %s1707_s15, 1  ;;  %s1707_s15 = sphi %s1737_s15, %s14_s15  }
   0x2   : > { %p172_p1 = scmp.lt.s32.totalorder %s1707_s15, 3 }
   0x4   : > { %p173_p2 = pnand %p1402_p0, %p172_p1 }
   0x5   : > { %v285_v0 = vld [vmem:[%s2439_s1 + $0x208] sm:$0xff] (!%p173_p2)  ;;  %v287_v1 = vld [vmem:[%s2439_s1 + $0x218] sm:$0xff] (!%p173_p2)  ;;  %v284_v2 = vld [vmem:[%s2439_s1 + $0x200] sm:$0xff] (!%p173_p2)  ;;  %p203_p3 = scmp.lt.s32.totalorder (!%p173_p2), %s1398_s16, 1  ;;  %vm1710_vm0 = vmmov (!%p173_p2), 0   ;;  %vm657_vm1 = vcmask (!%p173_p2), 523264  }
   0x6   : > { %176 = sbr.rel (%p173_p2) target bundleno = 2808 (0xaf8), region = 36  ;;  %v1546_v3 = vpack.c.bf16 (!%p173_p2), %v287_v1, %v285_v0  ;;  %v286_v4 = vld [vmem:[%s2439_s1 + $0x210] sm:$0xff] (!%p173_p2)  ;;  %v221_v5 = vld [vmem:[%s2439_s1 + $0x8] sm:$0xff] (!%p173_p2)  ;;  %v223_v6 = vld [vmem:[%s2439_s1 + $0x18] sm:$0xff] (!%p173_p2)  ;;  %s1711_s17 = smov (!%p173_p2), 64   ;;  %vm735_vm2 = vcmask (!%p173_p2), 64512  }
   0x7   : > { %v1548_v7 = vpack.c.bf16 (!%p173_p2), %v286_v4, %v284_v2  ;;  %v1482_v8 = vpack.c.bf16 (!%p173_p2), %v223_v6, %v221_v5  ;;  %v220_v9 = vld [vmem:[%s2439_s1] sm:$0xff] (!%p173_p2)  ;;  %v222_v10 = vld [vmem:[%s2439_s1 + $0x10] sm:$0xff] (!%p173_p2)  ;;  %v289_v11 = vld [vmem:[%s2439_s1 + $0x228] sm:$0xff] (!%p173_p2) }
   0x8   : > { %1547 = vmatprep.subr.bf16.mxu1 (!%p173_p2), %v1546_v3  ;;  %v1484_v12 = vpack.c.bf16 (!%p173_p2), %v222_v10, %v220_v9  ;;  %v291_v13 = vld [vmem:[%s2439_s1 + $0x238] sm:$0xff] (!%p173_p2)  ;;  %v225_v15 = vld [vmem:[%s2439_s1 + $0x28] sm:$0xff] (!%p173_p2)  ;;  %v288_v17 = vld [vmem:[%s2439_s1 + $0x220] sm:$0xff] (!%p173_p2) }
   0x9   : > { %1549 = vmatpush1.bf16.xpose.msra.mxu1 (!%p173_p2), %v1548_v7  ;;  %1483 = vmatprep.subr.bf16.mxu0 (!%p173_p2), %v1482_v8  ;;  %v1550_v14 = vpack.c.bf16 (!%p173_p2), %v291_v13, %v289_v11  ;;  %v227_v16 = vld [vmem:[%s2439_s1 + $0x38] sm:$0xff] (!%p173_p2)  ;;  %v290_v18 = vld [vmem:[%s2439_s1 + $0x230] sm:$0xff] (!%p173_p2)  ;;  %v224_v20 = vld [vmem:[%s2439_s1 + $0x20] sm:$0xff] (!%p173_p2) }
   0xa   : > { %1485 = vmatpush1.bf16.xpose.msra.mxu0 (!%p173_p2), %v1484_v12  ;;  %v1486_v19 = vpack.c.bf16 (!%p173_p2), %v227_v16, %v225_v15  ;;  %v226_v21 = vld [vmem:[%s2439_s1 + $0x30] sm:$0xff] (!%p173_p2)  ;;  %v293_v22 = vld [vmem:[%s2439_s1 + $0x248] sm:$0xff] (!%p173_p2)  ;;  %v295_v23 = vld [vmem:[%s2439_s1 + $0x258] sm:$0xff] (!%p173_p2)  ;;  %v1552_v26 = vpack.c.bf16 (!%p173_p2), %v290_v18, %v288_v17 }
   0xb   : > { %1551 = vmatprep.subr.bf16.mxu1 (!%p173_p2), %v1550_v14  ;;  %v229_v24 = vld [vmem:[%s2439_s1 + $0x48] sm:$0xff] (!%p173_p2)  ;;  %v231_v25 = vld [vmem:[%s2439_s1 + $0x58] sm:$0xff] (!%p173_p2)  ;;  %v1488_v27 = vpack.c.bf16 (!%p173_p2), %v226_v21, %v224_v20  ;;  %v1554_v28 = vpack.c.bf16 (!%p173_p2), %v295_v23, %v293_v22  ;;  %v292_v30 = vld [vmem:[%s2439_s1 + $0x240] sm:$0xff] (!%p173_p2) }
   0xc   : > { %1487 = vmatprep.subr.bf16.mxu0 (!%p173_p2), %v1486_v19  ;;  %v1490_v29 = vpack.c.bf16 (!%p173_p2), %v231_v25, %v229_v24  ;;  %v294_v31 = vld [vmem:[%s2439_s1 + $0x250] sm:$0xff] (!%p173_p2)  ;;  %v228_v32 = vld [vmem:[%s2439_s1 + $0x40] sm:$0xff] (!%p173_p2)  ;;  %v297_v34 = vld [vmem:[%s2439_s1 + $0x268] sm:$0xff] (!%p173_p2) }
   0xd   : > { %v230_v33 = vld [vmem:[%s2439_s1 + $0x50] sm:$0xff]  ;;  %v299_v35 = vld [vmem:[%s2439_s1 + $0x278] sm:$0xff]  ;;  %v233_v36 = vld [vmem:[%s2439_s1 + $0x68] sm:$0xff]  ;;  %v1556_v38 = vpack.c.bf16 %v294_v31, %v292_v30  ;;  %s2444_s16 = smov (!%p203_p3, %s1398_s16), 1 }
   0xe   : > { %v235_v37 = vld [vmem:[%s2439_s1 + $0x78] sm:$0xff]  ;;  %v1492_v39 = vpack.c.bf16 %v230_v33, %v228_v32  ;;  %v1558_v40 = vpack.c.bf16 %v299_v35, %v297_v34  ;;  %v296_v42 = vld [vmem:[%s2439_s1 + $0x260] sm:$0xff]  ;;  %v298_v43 = vld [vmem:[%s2439_s1 + $0x270] sm:$0xff]  ;;  %s1881_s7 = sshll.u32 %s2444_s16, 4 }
   0xf   : > { %v1494_v41 = vpack.c.bf16 %v235_v37, %v233_v36  ;;  %v232_v44 = vld [vmem:[%s2439_s1 + $0x60] sm:$0xff]  ;;  %v234_v45 = vld [vmem:[%s2439_s1 + $0x70] sm:$0xff]  ;;  %v301_v46 = vld [vmem:[%s2439_s1 + $0x288] sm:$0xff]  ;;  %v1560_v50 = vpack.c.bf16 %v298_v43, %v296_v42  ;;  %s1911_s27 = scalar_lea.vmem %s2438_s0, %s1881_s7  ;;  %s212_s10 = scalar_lea.vmem %s2441_s3, %s1881_s7 }
  0x10   : > { %v303_v47 = vld [vmem:[%s2439_s1 + $0x298] sm:$0xff]  ;;  %v237_v48 = vld [vmem:[%s2439_s1 + $0x88] sm:$0xff]  ;;  %v1496_v51 = vpack.c.bf16 %v234_v45, %v232_v44  ;;  %v300_v54 = vld [vmem:[%s2439_s1 + $0x280] sm:$0xff]  ;;  %s217_s13 = scalar_lea.vmem %s2442_s4, %s1881_s7 }
  0x11   : > { %1553 = vmatpush1.bf16.xpose.msra.mxu1 %v1552_v26  ;;  %v239_v49 = vld [vmem:[%s2439_s1 + $0x98] sm:$0xff]  ;;  %v1562_v52 = vpack.c.bf16 %v303_v47, %v301_v46  ;;  %v302_v55 = vld [vmem:[%s2439_s1 + $0x290] sm:$0xff]  ;;  %v236_v56 = vld [vmem:[%s2439_s1 + $0x80] sm:$0xff] }
  0x12   : > { %1489 = vmatpush1.bf16.xpose.msra.mxu0 %v1488_v27  ;;  %1555 = vmatprep.subr.bf16.mxu1 %v1554_v28  ;;  %v1498_v53 = vpack.c.bf16 %v239_v49, %v237_v48  ;;  %v238_v57 = vld [vmem:[%s2439_s1 + $0x90] sm:$0xff]  ;;  %v305_v58 = vld [vmem:[%s2439_s1 + $0x2a8] sm:$0xff]  ;;  %v307_v59 = vld [vmem:[%s2439_s1 + $0x2b8] sm:$0xff]  ;;  %v1564_v62 = vpack.c.bf16 %v302_v55, %v300_v54 }
  0x13   : > { %1491 = vmatprep.subr.bf16.mxu0 %v1490_v29  ;;  %v241_v60 = vld [vmem:[%s2439_s1 + $0xa8] sm:$0xff]  ;;  %v243_v61 = vld [vmem:[%s2439_s1 + $0xb8] sm:$0xff]  ;;  %v1500_v63 = vpack.c.bf16 %v238_v57, %v236_v56  ;;  %v1566_v0 = vpack.c.bf16 %v307_v59, %v305_v58  ;;  %v304_v2 = vld [vmem:[%s2439_s1 + $0x2a0] sm:$0xff] }
  0x14   : > { %v1502_v1 = vpack.c.bf16 %v243_v61, %v241_v60  ;;  %v306_v3 = vld [vmem:[%s2439_s1 + $0x2b0] sm:$0xff]  ;;  %v240_v4 = vld [vmem:[%s2439_s1 + $0xa0] sm:$0xff]  ;;  %v309_v6 = vld [vmem:[%s2439_s1 + $0x2c8] sm:$0xff] }
  0x15   : > { %v242_v5 = vld [vmem:[%s2439_s1 + $0xb0] sm:$0xff]  ;;  %v311_v7 = vld [vmem:[%s2439_s1 + $0x2d8] sm:$0xff]  ;;  %v245_v8 = vld [vmem:[%s2439_s1 + $0xc8] sm:$0xff]  ;;  %v1568_v10 = vpack.c.bf16 %v306_v3, %v304_v2 }
  0x16   : > { %v247_v9 = vld [vmem:[%s2439_s1 + $0xd8] sm:$0xff]  ;;  %v1504_v11 = vpack.c.bf16 %v242_v5, %v240_v4  ;;  %v1570_v12 = vpack.c.bf16 %v311_v7, %v309_v6  ;;  %v1914_v14 = vld [vmem:[%s1911_s27 + $0x8] sm:$0xff]  ;;  %v308_v15 = vld [vmem:[%s2439_s1 + $0x2c0] sm:$0xff] }
  0x17   : > { %v1506_v13 = vpack.c.bf16 %v247_v9, %v245_v8  ;;  %579 = vmatprep.mubr.f32.mxu1 %v1914_v14  ;;  %508 = vmatprep.mubr.f32.mxu0 %v1914_v14  ;;  %v310_v16 = vld [vmem:[%s2439_s1 + $0x2d0] sm:$0xff]  ;;  %v244_v17 = vld [vmem:[%s2439_s1 + $0xc0] sm:$0xff]  ;;  %v313_v19 = vld [vmem:[%s2439_s1 + $0x2e8] sm:$0xff] }
  0x18   : > { %v246_v18 = vld [vmem:[%s2439_s1 + $0xd0] sm:$0xff]  ;;  %v315_v20 = vld [vmem:[%s2439_s1 + $0x2f8] sm:$0xff]  ;;  %v249_v21 = vld [vmem:[%s2439_s1 + $0xe8] sm:$0xff]  ;;  %v1572_v23 = vpack.c.bf16 %v310_v16, %v308_v15 }
  0x19   : > { %1557 = vmatpush1.bf16.xpose.msra.mxu1 %v1556_v38  ;;  %v251_v22 = vld [vmem:[%s2439_s1 + $0xf8] sm:$0xff]  ;;  %v1508_v24 = vpack.c.bf16 %v246_v18, %v244_v17  ;;  %v1574_v25 = vpack.c.bf16 %v315_v20, %v313_v19  ;;  %v312_v27 = vld [vmem:[%s2439_s1 + $0x2e0] sm:$0xff]  ;;  %v314_v28 = vld [vmem:[%s2439_s1 + $0x2f0] sm:$0xff] }
  0x1a   : > { %1493 = vmatpush1.bf16.xpose.msra.mxu0 %v1492_v39  ;;  %1559 = vmatprep.subr.bf16.mxu1 %v1558_v40  ;;  %v1510_v26 = vpack.c.bf16 %v251_v22, %v249_v21  ;;  %v248_v29 = vld [vmem:[%s2439_s1 + $0xe0] sm:$0xff]  ;;  %v250_v30 = vld [vmem:[%s2439_s1 + $0xf0] sm:$0xff]  ;;  %v317_v31 = vld [vmem:[%s2439_s1 + $0x308] sm:$0xff]  ;;  %v1576_v35 = vpack.c.bf16 %v314_v28, %v312_v27 }
  0x1b   : > { %1495 = vmatprep.subr.bf16.mxu0 %v1494_v41  ;;  %v319_v32 = vld [vmem:[%s2439_s1 + $0x318] sm:$0xff]  ;;  %v253_v33 = vld [vmem:[%s2439_s1 + $0x108] sm:$0xff]  ;;  %v1512_v36 = vpack.c.bf16 %v250_v30, %v248_v29  ;;  %v316_v39 = vld [vmem:[%s2439_s1 + $0x300] sm:$0xff] }
  0x1c   : > { %v255_v34 = vld [vmem:[%s2439_s1 + $0x118] sm:$0xff]  ;;  %v1578_v37 = vpack.c.bf16 %v319_v32, %v317_v31  ;;  %v318_v40 = vld [vmem:[%s2439_s1 + $0x310] sm:$0xff]  ;;  %v252_v41 = vld [vmem:[%s2439_s1 + $0x100] sm:$0xff] }
  0x1d   : > { %v1514_v38 = vpack.c.bf16 %v255_v34, %v253_v33  ;;  %v254_v42 = vld [vmem:[%s2439_s1 + $0x110] sm:$0xff]  ;;  %v321_v43 = vld [vmem:[%s2439_s1 + $0x328] sm:$0xff]  ;;  %v323_v44 = vld [vmem:[%s2439_s1 + $0x338] sm:$0xff]  ;;  %v1580_v47 = vpack.c.bf16 %v318_v40, %v316_v39 }
  0x1e   : > { %v257_v45 = vld [vmem:[%s2439_s1 + $0x128] sm:$0xff]  ;;  %v259_v46 = vld [vmem:[%s2439_s1 + $0x138] sm:$0xff]  ;;  %v1516_v48 = vpack.c.bf16 %v254_v42, %v252_v41  ;;  %v1582_v49 = vpack.c.bf16 %v323_v44, %v321_v43  ;;  %v258_v54 = vld [vmem:[%s2439_s1 + $0x130] sm:$0xff] }
  0x1f   : > { %v325_v55 = vld [vmem:[%s2439_s1 + $0x348] sm:$0xff]  ;;  %v327_v56 = vld [vmem:[%s2439_s1 + $0x358] sm:$0xff]  ;;  %v262_v2 = vld [vmem:[%s2439_s1 + $0x150] sm:$0xff] }
  0x20   : > { %v261_v57 = vld [vmem:[%s2439_s1 + $0x148] sm:$0xff]  ;;  %v263_v58 = vld [vmem:[%s2439_s1 + $0x158] sm:$0xff]  ;;  %v1586_v61 = vpack.c.bf16 %v327_v56, %v325_v55  ;;  %v266_v15 = vld [vmem:[%s2439_s1 + $0x170] sm:$0xff] }
  0x21   : > { %1561 = vmatpush1.bf16.xpose.msra.mxu1 %v1560_v50  ;;  %v1518_v50 = vpack.c.bf16 %v259_v46, %v257_v45  ;;  %v329_v3 = vld [vmem:[%s2439_s1 + $0x368] sm:$0xff]  ;;  %v331_v4 = vld [vmem:[%s2439_s1 + $0x378] sm:$0xff]  ;;  %v270_v27 = vld [vmem:[%s2439_s1 + $0x190] sm:$0xff] }
  0x22   : > { %1497 = vmatpush1.bf16.xpose.msra.mxu0 %v1496_v51  ;;  %1563 = vmatprep.subr.bf16.mxu1 %v1562_v52  ;;  %v320_v51 = vld [vmem:[%s2439_s1 + $0x320] sm:$0xff]  ;;  %v322_v52 = vld [vmem:[%s2439_s1 + $0x330] sm:$0xff]  ;;  %v265_v5 = vld [vmem:[%s2439_s1 + $0x168] sm:$0xff]  ;;  %v1590_v9 = vpack.c.bf16 %v331_v4, %v329_v3  ;;  %v1709_v3 = vmov 0.0   ;;  %v414_v4 = vlaneseq }
  0x23   : > { %1499 = vmatprep.subr.bf16.mxu0 %v1498_v53  ;;  %v256_v53 = vld [vmem:[%s2439_s1 + $0x120] sm:$0xff]  ;;  %v1584_v59 = vpack.c.bf16 %v322_v52, %v320_v51  ;;  %v267_v6 = vld [vmem:[%s2439_s1 + $0x178] sm:$0xff]  ;;  %v333_v16 = vld [vmem:[%s2439_s1 + $0x388] sm:$0xff] }
  0x24   : > { %v1520_v60 = vpack.c.bf16 %v258_v54, %v256_v53  ;;  %v335_v17 = vld [vmem:[%s2439_s1 + $0x398] sm:$0xff]  ;;  %v269_v18 = vld [vmem:[%s2439_s1 + $0x188] sm:$0xff]  ;;  %v274_v39 = vld [vmem:[%s2439_s1 + $0x1b0] sm:$0xff] }
  0x25   : > { %v271_v19 = vld [vmem:[%s2439_s1 + $0x198] sm:$0xff]  ;;  %v1594_v22 = vpack.c.bf16 %v335_v17, %v333_v16  ;;  %v337_v28 = vld [vmem:[%s2439_s1 + $0x3a8] sm:$0xff]  ;;  %v278_v51 = vld [vmem:[%s2439_s1 + $0x1d0] sm:$0xff] }
  0x26   : > { %v339_v29 = vld [vmem:[%s2439_s1 + $0x3b8] sm:$0xff]  ;;  %v273_v30 = vld [vmem:[%s2439_s1 + $0x1a8] sm:$0xff] }
  0x27   : > { %v275_v31 = vld [vmem:[%s2439_s1 + $0x1b8] sm:$0xff]  ;;  %v1598_v34 = vpack.c.bf16 %v339_v29, %v337_v28  ;;  %v341_v40 = vld [vmem:[%s2439_s1 + $0x3c8] sm:$0xff] }
  0x28   : > { %v343_v41 = vld [vmem:[%s2439_s1 + $0x3d8] sm:$0xff]  ;;  %v277_v42 = vld [vmem:[%s2439_s1 + $0x1c8] sm:$0xff] }
  0x29   : > { %1565 = vmatpush1.bf16.xpose.msra.mxu1 %v1564_v62  ;;  %v1522_v62 = vpack.c.bf16 %v263_v58, %v261_v57  ;;  %v279_v43 = vld [vmem:[%s2439_s1 + $0x1d8] sm:$0xff]  ;;  %v1602_v46 = vpack.c.bf16 %v343_v41, %v341_v40  ;;  %v345_v52 = vld [vmem:[%s2439_s1 + $0x3e8] sm:$0xff] }
  0x2a   : > { %1501 = vmatpush1.bf16.xpose.msra.mxu0 %v1500_v63  ;;  %1567 = vmatprep.subr.bf16.mxu1 %v1566_v0  ;;  %v324_v63 = vld [vmem:[%s2439_s1 + $0x340] sm:$0xff]  ;;  %v326_v0 = vld [vmem:[%s2439_s1 + $0x350] sm:$0xff]  ;;  %v347_v53 = vld [vmem:[%s2439_s1 + $0x3f8] sm:$0xff] }
  0x2b   : > { %1503 = vmatprep.subr.bf16.mxu0 %v1502_v1  ;;  %v260_v1 = vld [vmem:[%s2439_s1 + $0x140] sm:$0xff]  ;;  %v1588_v7 = vpack.c.bf16 %v326_v0, %v324_v63  ;;  %v281_v54 = vld [vmem:[%s2439_s1 + $0x1e8] sm:$0xff]  ;;  %v283_v55 = vld [vmem:[%s2439_s1 + $0x1f8] sm:$0xff]  ;;  %v1606_v58 = vpack.c.bf16 %v347_v53, %v345_v52 }
  0x2c   : > { %v1524_v8 = vpack.c.bf16 %v262_v2, %v260_v1  ;;  %v282_v63 = vld [vmem:[%s2439_s1 + $0x1f0] sm:$0xff]  ;;  %v2147_v2 = vld [vmem:[%s1911_s27] sm:$0xff]  ;;  %v365_v40 = vld [vmem:[%s2439_s1 + $0x488] sm:$0xff] }
  0x2d   : > { %v367_v41 = vld [vmem:[%s2439_s1 + $0x498] sm:$0xff]  ;;  %v373_v52 = vld [vmem:[%s2439_s1 + $0x4c8] sm:$0xff] }
  0x2e   : > { %v375_v53 = vld [vmem:[%s2439_s1 + $0x4d8] sm:$0xff] }
  0x31   : > { %1569 = vmatpush1.bf16.xpose.msra.mxu1 %v1568_v10  ;;  %v1526_v10 = vpack.c.bf16 %v267_v6, %v265_v5  ;;  %v2155_v5 = vshrl.u32 %v414_v4, 7  ;;  %v2160_v6 = vld [vmem:[%s2440_s2] sm:$0x3f] }
  0x32   : > { %1505 = vmatpush1.bf16.xpose.msra.mxu0 %v1504_v11  ;;  %1571 = vmatprep.subr.bf16.mxu1 %v1570_v12  ;;  %v328_v11 = vld [vmem:[%s2439_s1 + $0x360] sm:$0xff]  ;;  %v330_v12 = vld [vmem:[%s2439_s1 + $0x370] sm:$0xff] }
  0x33   : > { %1507 = vmatprep.subr.bf16.mxu0 %v1506_v13  ;;  %v264_v13 = vld [vmem:[%s2439_s1 + $0x160] sm:$0xff]  ;;  %v1592_v20 = vpack.c.bf16 %v330_v12, %v328_v11  ;;  %v350_v12 = vld [vmem:[%s2439_s1 + $0x410] sm:$0xff] }
  0x34   : > { %v1528_v21 = vpack.c.bf16 %v266_v15, %v264_v13  ;;  %v353_v13 = vld [vmem:[%s2439_s1 + $0x428] sm:$0xff]  ;;  %v355_v15 = vld [vmem:[%s2439_s1 + $0x438] sm:$0xff] }
  0x35   : > { %v1614_v17 = vpack.c.bf16 %v355_v15, %v353_v13  ;;  %v384_v13 = vld [vmem:[%s2439_s1 + $0x520] sm:$0xff]  ;;  %v386_v15 = vld [vmem:[%s2439_s1 + $0x530] sm:$0xff] }
  0x39   : > { %1573 = vmatpush1.bf16.xpose.msra.mxu1 %v1572_v23  ;;  %v1530_v23 = vpack.c.bf16 %v271_v19, %v269_v18 }
  0x3a   : > { %1509 = vmatpush1.bf16.xpose.msra.mxu0 %v1508_v24  ;;  %1575 = vmatprep.subr.bf16.mxu1 %v1574_v25  ;;  %v332_v24 = vld [vmem:[%s2439_s1 + $0x380] sm:$0xff]  ;;  %v334_v25 = vld [vmem:[%s2439_s1 + $0x390] sm:$0xff] }
  0x3b   : > { %1511 = vmatprep.subr.bf16.mxu0 %v1510_v26  ;;  %v268_v26 = vld [vmem:[%s2439_s1 + $0x180] sm:$0xff]  ;;  %v1596_v32 = vpack.c.bf16 %v334_v25, %v332_v24 }
  0x3c   : > { %v1532_v33 = vpack.c.bf16 %v270_v27, %v268_v26 }
  0x41   : > { %1577 = vmatpush1.bf16.xpose.msra.mxu1 %v1576_v35  ;;  %v1534_v35 = vpack.c.bf16 %v275_v31, %v273_v30 }
  0x42   : > { %1513 = vmatpush1.bf16.xpose.msra.mxu0 %v1512_v36  ;;  %1579 = vmatprep.subr.bf16.mxu1 %v1578_v37  ;;  %v336_v36 = vld [vmem:[%s2439_s1 + $0x3a0] sm:$0xff]  ;;  %v338_v37 = vld [vmem:[%s2439_s1 + $0x3b0] sm:$0xff] }
  0x43   : > { %1515 = vmatprep.subr.bf16.mxu0 %v1514_v38  ;;  %v272_v38 = vld [vmem:[%s2439_s1 + $0x1a0] sm:$0xff]  ;;  %v1600_v44 = vpack.c.bf16 %v338_v37, %v336_v36 }
  0x44   : > { %v1536_v45 = vpack.c.bf16 %v274_v39, %v272_v38  ;;  %v360_v38 = vld [vmem:[%s2439_s1 + $0x460] sm:$0xff]  ;;  %v362_v39 = vld [vmem:[%s2439_s1 + $0x470] sm:$0xff] }
  0x49   : > { %1581 = vmatpush1.bf16.xpose.msra.mxu1 %v1580_v47  ;;  %v1538_v47 = vpack.c.bf16 %v279_v43, %v277_v42  ;;  %v1624_v42 = vpack.c.bf16 %v362_v39, %v360_v38  ;;  %v1626_v43 = vpack.c.bf16 %v367_v41, %v365_v40  ;;  %v400_v40 = vld [vmem:[%s2439_s1 + $0x5a0] sm:$0xff]  ;;  %v402_v41 = vld [vmem:[%s2439_s1 + $0x5b0] sm:$0xff] }
  0x4a   : > { %1517 = vmatpush1.bf16.xpose.msra.mxu0 %v1516_v48  ;;  %1583 = vmatprep.subr.bf16.mxu1 %v1582_v49  ;;  %v340_v48 = vld [vmem:[%s2439_s1 + $0x3c0] sm:$0xff]  ;;  %v342_v49 = vld [vmem:[%s2439_s1 + $0x3d0] sm:$0xff] }
  0x4b   : > { %1519 = vmatprep.subr.bf16.mxu0 %v1518_v50  ;;  %v276_v50 = vld [vmem:[%s2439_s1 + $0x1c0] sm:$0xff]  ;;  %v1604_v56 = vpack.c.bf16 %v342_v49, %v340_v48  ;;  %v371_v48 = vld [vmem:[%s2439_s1 + $0x4b8] sm:$0xff] }
  0x4c   : > { %v1540_v57 = vpack.c.bf16 %v278_v51, %v276_v50  ;;  %v368_v49 = vld [vmem:[%s2439_s1 + $0x4a0] sm:$0xff]  ;;  %v370_v51 = vld [vmem:[%s2439_s1 + $0x4b0] sm:$0xff] }
  0x51   : > { %1585 = vmatpush1.bf16.xpose.msra.mxu1 %v1584_v59  ;;  %v1542_v59 = vpack.c.bf16 %v283_v55, %v281_v54  ;;  %v1632_v54 = vpack.c.bf16 %v370_v51, %v368_v49  ;;  %v1634_v55 = vpack.c.bf16 %v375_v53, %v373_v52  ;;  %v411_v49 = vld [vmem:[%s2439_s1 + $0x5f8] sm:$0xff]  ;;  %v408_v52 = vld [vmem:[%s2439_s1 + $0x5e0] sm:$0xff]  ;;  %v410_v53 = vld [vmem:[%s2439_s1 + $0x5f0] sm:$0xff] }
  0x52   : > { %1521 = vmatpush1.bf16.xpose.msra.mxu0 %v1520_v60  ;;  %1587 = vmatprep.subr.bf16.mxu1 %v1586_v61  ;;  %v344_v60 = vld [vmem:[%s2439_s1 + $0x3e0] sm:$0xff]  ;;  %v346_v61 = vld [vmem:[%s2439_s1 + $0x3f0] sm:$0xff] }
  0x53   : > { %1523 = vmatprep.subr.bf16.mxu0 %v1522_v62  ;;  %v280_v62 = vld [vmem:[%s2439_s1 + $0x1e0] sm:$0xff]  ;;  %v1608_v0 = vpack.c.bf16 %v346_v61, %v344_v60 }
  0x54   : > { %v1544_v1 = vpack.c.bf16 %v282_v63, %v280_v62  ;;  %v376_v62 = vld [vmem:[%s2439_s1 + $0x4e0] sm:$0xff]  ;;  %v378_v63 = vld [vmem:[%s2439_s1 + $0x4f0] sm:$0xff] }
  0x55   : > { %v1640_v4 = vpack.c.bf16 %v378_v63, %v376_v62 }
  0x59   : > { %1589 = vmatpush1.bf16.xpose.msra.mxu1 %v1588_v7  ;;  %v424_v7 = vsub.s32 2, %v2155_v5 }
  0x5a   : > { %1525 = vmatpush1.bf16.xpose.msra.mxu0 %v1524_v8  ;;  %1591 = vmatprep.subr.bf16.mxu1 %v1590_v9  ;;  %v351_v8 = vld [vmem:[%s2439_s1 + $0x418] sm:$0xff]  ;;  %v348_v9 = vld [vmem:[%s2439_s1 + $0x400] sm:$0xff] }
  0x5b   : > { %1527 = vmatprep.subr.bf16.mxu0 %v1526_v10  ;;  %v416_v10 = vsub.s32 0, %v2155_v5  ;;  %v1612_v16 = vpack.c.bf16 %v350_v12, %v348_v9  ;;  %v425_v18 = vrot.slane %v2160_v6, %v424_v7  ;;  %v385_v9 = vld [vmem:[%s2439_s1 + $0x528] sm:$0xff] }
  0x5d   : > { %v417_v19 = vrot.slane %v2160_v6, %v416_v10  ;;  %v387_v10 = vld [vmem:[%s2439_s1 + $0x538] sm:$0xff] }
  0x5e   : > { %v1646_v12 = vpack.c.bf16 %v387_v10, %v385_v9 }
  0x61   : > { %1593 = vmatpush1.bf16.xpose.msra.mxu1 %v1592_v20  ;;  %v352_v20 = vld [vmem:[%s2439_s1 + $0x420] sm:$0xff] }
  0x62   : > { %1529 = vmatpush1.bf16.xpose.msra.mxu0 %v1528_v21  ;;  %1595 = vmatprep.subr.bf16.mxu1 %v1594_v22  ;;  %v354_v21 = vld [vmem:[%s2439_s1 + $0x430] sm:$0xff]  ;;  %v357_v22 = vld [vmem:[%s2439_s1 + $0x448] sm:$0xff] }
  0x63   : > { %1531 = vmatprep.subr.bf16.mxu0 %v1530_v23  ;;  %v359_v23 = vld [vmem:[%s2439_s1 + $0x458] sm:$0xff]  ;;  %v1616_v28 = vpack.c.bf16 %v354_v21, %v352_v20  ;;  %v388_v20 = vld [vmem:[%s2439_s1 + $0x540] sm:$0xff]  ;;  %v390_v21 = vld [vmem:[%s2439_s1 + $0x550] sm:$0xff] }
  0x64   : > { %v1618_v31 = vpack.c.bf16 %v359_v23, %v357_v22  ;;  %v393_v22 = vld [vmem:[%s2439_s1 + $0x568] sm:$0xff]  ;;  %v395_v23 = vld [vmem:[%s2439_s1 + $0x578] sm:$0xff] }
  0x69   : > { %1597 = vmatpush1.bf16.xpose.msra.mxu1 %v1596_v32  ;;  %v356_v32 = vld [vmem:[%s2439_s1 + $0x440] sm:$0xff] }
  0x6a   : > { %1533 = vmatpush1.bf16.xpose.msra.mxu0 %v1532_v33  ;;  %1599 = vmatprep.subr.bf16.mxu1 %v1598_v34  ;;  %v358_v33 = vld [vmem:[%s2439_s1 + $0x450] sm:$0xff]  ;;  %v361_v34 = vld [vmem:[%s2439_s1 + $0x468] sm:$0xff] }
  0x6b   : > { %1535 = vmatprep.subr.bf16.mxu0 %v1534_v35  ;;  %v363_v35 = vld [vmem:[%s2439_s1 + $0x478] sm:$0xff]  ;;  %v1620_v36 = vpack.c.bf16 %v358_v33, %v356_v32 }
  0x6c   : > { %v1622_v37 = vpack.c.bf16 %v363_v35, %v361_v34  ;;  %v396_v34 = vld [vmem:[%s2439_s1 + $0x580] sm:$0xff]  ;;  %v398_v35 = vld [vmem:[%s2439_s1 + $0x590] sm:$0xff] }
  0x6d   : > { %v1660_v38 = vpack.c.bf16 %v398_v35, %v396_v34 }
  0x71   : > { %1601 = vmatpush1.bf16.xpose.msra.mxu1 %v1600_v44  ;;  %v364_v44 = vld [vmem:[%s2439_s1 + $0x480] sm:$0xff] }
  0x72   : > { %1537 = vmatpush1.bf16.xpose.msra.mxu0 %v1536_v45  ;;  %1603 = vmatprep.subr.bf16.mxu1 %v1602_v46  ;;  %v366_v45 = vld [vmem:[%s2439_s1 + $0x490] sm:$0xff] }
  0x73   : > { %1539 = vmatprep.subr.bf16.mxu0 %v1538_v47  ;;  %v1628_v46 = vpack.c.bf16 %v366_v45, %v364_v44  ;;  %v369_v47 = vld [vmem:[%s2439_s1 + $0x4a8] sm:$0xff]  ;;  %v1664_v44 = vpack.c.bf16 %v402_v41, %v400_v40 }
  0x74   : > { %v1630_v50 = vpack.c.bf16 %v371_v48, %v369_v47  ;;  %v406_v47 = vld [vmem:[%s2439_s1 + $0x5d0] sm:$0xff]  ;;  %v409_v48 = vld [vmem:[%s2439_s1 + $0x5e8] sm:$0xff] }
  0x75   : > { %v1670_v51 = vpack.c.bf16 %v411_v49, %v409_v48 }
  0x79   : > { %1605 = vmatpush1.bf16.xpose.msra.mxu1 %v1604_v56  ;;  %v372_v56 = vld [vmem:[%s2439_s1 + $0x4c0] sm:$0xff] }
  0x7a   : > { %1541 = vmatpush1.bf16.xpose.msra.mxu0 %v1540_v57  ;;  %1607 = vmatprep.subr.bf16.mxu1 %v1606_v58  ;;  %v374_v57 = vld [vmem:[%s2439_s1 + $0x4d0] sm:$0xff]  ;;  %v377_v58 = vld [vmem:[%s2439_s1 + $0x4e8] sm:$0xff] }
  0x7b   : > { %1543 = vmatprep.subr.bf16.mxu0 %v1542_v59  ;;  %v379_v59 = vld [vmem:[%s2439_s1 + $0x4f8] sm:$0xff]  ;;  %v1636_v60 = vpack.c.bf16 %v374_v57, %v372_v56 }
  0x7c   : > { %v1638_v61 = vpack.c.bf16 %v379_v59, %v377_v58 }
  0x81   : > { %1609 = vmatpush1.bf16.xpose.msra.mxu1 %v1608_v0  ;;  %v381_v0 = vld [vmem:[%s2439_s1 + $0x508] sm:$0xff] }
  0x82   : > { %1545 = vmatpush1.bf16.xpose.msra.mxu0 %v1544_v1  ;;  %1442 = vmatprep.subr.mxu1 %v1709_v3  ;;  %v383_v1 = vld [vmem:[%s2439_s1 + $0x518] sm:$0xff] }
  0x83   : > { %v1642_v7 = vpack.c.bf16 %v383_v1, %v381_v0  ;;  %v432_v0 = vsub.s32 4, %v2155_v5 }
  0x85   : > { %v433_v1 = vrot.slane %v2160_v6, %v432_v0 }
  0x88   : > { %580 = vmatmul.mubr.f32.vlgmr.msra.gmra.mrb[0].mxu1 %v2147_v2 }
  0x89   : > { %509 = vmatmul.mubr.f32.vlgmr.msra.gmra.mrb[0].mxu0 %v2147_v2  ;;  %1444 = vmatprep.mubr.msk.f32.mxu1 %vm1710_vm0, %v1709_v3 }
  0x8a   : > { %650 = vmatprep.mubr.f32.mxu0 %v1914_v14  ;;  %v349_v14 = vld [vmem:[%s2439_s1 + $0x408] sm:$0xff] }
  0x8b   : > { %v1610_v11 = vpack.c.bf16 %v351_v8, %v349_v14  ;;  %v380_v14 = vld [vmem:[%s2439_s1 + $0x500] sm:$0xff]  ;;  %v382_v8 = vld [vmem:[%s2439_s1 + $0x510] sm:$0xff] }
  0x8d   : > { %1611 = vmatprep.subr.bf16.mxu0 %v1610_v11  ;;  %v1644_v11 = vpack.c.bf16 %v382_v8, %v380_v14 }
  0x8e   : > { %1613 = vmatpush1.bf16.xpose.msra.mxu0 %v1612_v16  ;;  %v389_v16 = vld [vmem:[%s2439_s1 + $0x548] sm:$0xff] }
  0x8f   : > { %1615 = vmatprep.subr.bf16.mxu0 %v1614_v17  ;;  %v391_v17 = vld [vmem:[%s2439_s1 + $0x558] sm:$0xff] }
  0x96   : > { %1617 = vmatpush1.bf16.xpose.msra.mxu0 %v1616_v28  ;;  %v394_v28 = vld [vmem:[%s2439_s1 + $0x570] sm:$0xff] }
  0x97   : > { %1619 = vmatprep.subr.bf16.mxu0 %v1618_v31  ;;  %v399_v31 = vld [vmem:[%s2439_s1 + $0x598] sm:$0xff] }
  0x9e   : > { %1621 = vmatpush1.bf16.xpose.msra.mxu0 %v1620_v36  ;;  %v401_v36 = vld [vmem:[%s2439_s1 + $0x5a8] sm:$0xff] }
  0x9f   : > { %1623 = vmatprep.subr.bf16.mxu0 %v1622_v37  ;;  %v403_v37 = vld [vmem:[%s2439_s1 + $0x5b8] sm:$0xff] }
  0xa0   : > { %v1662_v39 = vpack.c.bf16 %v403_v37, %v401_v36 }
  0xa6   : > { %1625 = vmatpush1.bf16.xpose.msra.mxu0 %v1624_v42  ;;  %v405_v42 = vld [vmem:[%s2439_s1 + $0x5c8] sm:$0xff] }
  0xa7   : > { %1627 = vmatprep.subr.bf16.mxu0 %v1626_v43  ;;  %v407_v43 = vld [vmem:[%s2439_s1 + $0x5d8] sm:$0xff] }
  0xa8   : > { %v1666_v45 = vpack.c.bf16 %v407_v43, %v405_v42 }
  0xae   : > { %1629 = vmatpush1.bf16.xpose.msra.mxu0 %v1628_v46  ;;  %v404_v46 = vld [vmem:[%s2439_s1 + $0x5c0] sm:$0xff] }
  0xaf   : > { %1631 = vmatprep.subr.bf16.mxu0 %v1630_v50  ;;  %v1668_v50 = vpack.c.bf16 %v406_v47, %v404_v46 }
  0xb6   : > { %1633 = vmatpush1.bf16.xpose.msra.mxu0 %v1632_v54  ;;  %v1672_v54 = vpack.c.bf16 %v410_v53, %v408_v52 }
  0xb7   : > { %1635 = vmatprep.subr.bf16.mxu0 %v1634_v55 }
  0xbe   : > { %1637 = vmatpush1.bf16.xpose.msra.mxu0 %v1636_v60 }
  0xbf   : > { %1639 = vmatprep.subr.bf16.mxu0 %v1638_v61 }
  0xc6   : > { %1641 = vmatpush1.bf16.xpose.msra.mxu0 %v1640_v4 }
  0xc7   : > { %1643 = vmatprep.subr.bf16.mxu0 %v1642_v7 }
  0xce   : > { %1645 = vmatpush1.bf16.xpose.msra.mxu0 %v1644_v11 }
  0xcf   : > { %1647 = vmatprep.subr.bf16.mxu0 %v1646_v12 }
 0x15b   : > { %v581_v24 = vpop.f32.mrb[0].mxu1 }
 0x15c   : > { %v582_v25 = vadd.f32 %v581_v24, %v425_v18  ;;  %v2196_v26 = vpop.f32.mrb[1].mxu1  ;;  %v510_v27 = vpop.f32.mrb[0].mxu0  ;;  %v1648_v18 = vpack.c.bf16 %v386_v15, %v384_v13  ;;  %v1652_v24 = vpack.c.bf16 %v390_v21, %v388_v20 }
 0x15d   : > { %v511_v29 = vadd.f32 %v510_v27, %v417_v19  ;;  %v2198_v30 = vpop.f32.mrb[1].mxu0  ;;  %v1650_v19 = vpack.c.bf16 %v391_v17, %v389_v16  ;;  %v392_v27 = vld [vmem:[%s2439_s1 + $0x560] sm:$0xff] }
 0x15e   : > { %822 = vrot.lane.b32.xlu1 %v582_v25, %s1711_s17  ;;  %1443 = vmatpush3.xpose.msk.msra.mxu1 %vm657_vm1, %v582_v25  ;;  %v1654_v25 = vpack.c.bf16 %v395_v23, %v393_v22  ;;  %v1656_v32 = vpack.c.bf16 %v394_v28, %v392_v27  ;;  %v428_v27 = vsub.s32 3, %v2155_v5  ;;  %v420_v28 = vsub.s32 1, %v2155_v5 }
 0x15f   : > { %1447 = vmatprep.subr.mxu1 %v1709_v3  ;;  %1649 = vmatpush1.bf16.xpose.msra.mxu0 %v1648_v18 }
 0x160   : > { %1651 = vmatprep.subr.bf16.mxu0 %v1650_v19 }
 0x161   : > { %1445 = vmatmul.mubr.msk.f32.vlgmr.msra.gmra.mrb[2].mxu1 %vm657_vm1, %v511_v29 }
 0x162   : > { %820 = vrot.lane.b32.xlu1 %v511_v29, %s1711_s17  ;;  %1449 = vmatprep.mubr.msk.f32.mxu1 %vm1710_vm0, %v1709_v3  ;;  %v397_v29 = vld [vmem:[%s2439_s1 + $0x588] sm:$0xff] }
 0x163   : > { %v1658_v33 = vpack.c.bf16 %v399_v31, %v397_v29  ;;  %v429_v29 = vrot.slane %v2160_v6, %v428_v27  ;;  %v436_v31 = vsub.s32 5, %v2155_v5 }
 0x165   : > { %v584_v35 = vadd.f32 %v2196_v26, %v429_v29  ;;  %v437_v36 = vrot.slane %v2160_v6, %v436_v31 }
 0x167   : > { %1653 = vmatpush1.bf16.xpose.msra.mxu0 %v1652_v24 }
 0x168   : > { %1655 = vmatprep.subr.bf16.mxu0 %v1654_v25 }
 0x16f   : > { %1657 = vmatpush1.bf16.xpose.msra.mxu0 %v1656_v32 }
 0x170   : > { %1659 = vmatprep.subr.bf16.mxu0 %v1658_v33  ;;  %v421_v33 = vrot.slane %v2160_v6, %v420_v28 }
 0x172   : > { %v513_v37 = vadd.f32 %v2198_v30, %v421_v33 }
 0x177   : > { %1661 = vmatpush1.bf16.xpose.msra.mxu0 %v1660_v38 }
 0x178   : > { %1663 = vmatprep.subr.bf16.mxu0 %v1662_v39 }
 0x17f   : > { %1665 = vmatpush1.bf16.xpose.msra.mxu0 %v1664_v44 }
 0x180   : > { %1667 = vmatprep.subr.bf16.mxu0 %v1666_v45 }
 0x187   : > { %1669 = vmatpush1.bf16.xpose.msra.mxu0 %v1668_v50 }
 0x188   : > { %1671 = vmatprep.subr.bf16.mxu0 %v1670_v51 }
 0x18f   : > { %1673 = vmatpush1.bf16.xpose.msra.mxu0 %v1672_v54 }
 0x196   : > { %651 = vmatmul.mubr.f32.vlgmr.msra.gmra.mrb[2].mxu0 %v2147_v2 }
 0x1d0   : > { %v823_v9 = vpop.permute.xlu1 %822 }
 0x1d4   : > { %v821_v11 = vpop.permute.xlu1 %820 }
 0x234   : > { %v730_v55 = vpop.f32.mrb[2].mxu1 }
 0x235   : > { %v734_v56 = vmul.f32 0.125, %v730_v55  ;;  %v1446_v57 = vpop.f32.mrb[3].mxu1 }
 0x237   : > { %v736_v58 = vsel %vm735_vm2, %v734_v56, -inf }
 0x238   : > { %737 = vmax.xlane.f32.xlu0 %v736_v58 }
 0x269   : > { %v652_v2 = vpop.f32.mrb[2].mxu0 }
 0x26a   : > { %v653_v4 = vadd.f32 %v652_v2, %v433_v1  ;;  %v654_v7 = vpop.f32.mrb[3].mxu0 }
 0x26b   : > { %v655_v5 = vadd.f32 %v654_v7, %v437_v36 }
 0x26c   : > { %1448 = vmatpush3.msra.mxu1 %v653_v4 }
 0x26d   : > { %1452 = vmatprep.subr.mxu1 %v1709_v3 }
 0x2c5   : > { %v738_v59 = vpop.xlane.xlu0 %737 }
 0x2c6   : > { %v739_v60 = vsub.f32 %v734_v56, %v738_v59 }
 0x2c8   : > { %v740_v61 = vmul.f32 1.442695, %v739_v60 }
 0x2ca   : > { %1685 = vpow2.f32 %v740_v61 }
 0x2d4   : > { %v1686_v62 = vpop.eup %1685 }
 0x2d5   : > { %v742_v63 = vsel %vm735_vm2, %v1686_v62, 0.0 }
 0x2d6   : > { %743 = vadd.xlane.f32.xlu0 %v742_v63  ;;  %v1325_v63 = vld [vmem:[%s212_s10] sm:$0xff] }
 0x363   : > { %v744_v14 = vpop.xlane.xlu0 %743 }
 0x364   : > { %1687 = vrcp.f32 %v744_v14 }
 0x36e   : > { %v1688_v8 = vpop.eup %1687 }
 0x36f   : > { %v746_v10 = vmul.f32 %v1688_v8, %v1686_v62 }
 0x371   : > { %1450 = vmatmul.mubr.msk.f32.vlgmr.msra.gmra.mrb[4].mxu1 %vm735_vm2, %v746_v10 }
 0x372   : > { %1453 = vmatpush3.xpose.msk.msra.mxu1 %vm657_vm1, %v823_v9  ;;  %1454 = vmatprep.mubr.msk.f32.mxu1 %vm1710_vm0, %v1709_v3  ;;  %v1326_v9 = vld [vmem:[%s212_s10 + $0x8] sm:$0xff] }
 0x373   : > { %1457 = vmatprep.subr.mxu1 %v1709_v3 }
 0x375   : > { %1455 = vmatmul.mubr.msk.f32.vlgmr.msra.gmra.mrb[6].mxu1 %vm657_vm1, %v821_v11 }
 0x376   : > { %1459 = vmatprep.mubr.msk.f32.mxu1 %vm1710_vm0, %v1709_v3 }
 0x444   : > { %v2383_v12 = vpop.f32.mrb[4].mxu1 }
 0x445   : > { %v1451_v13 = vpop.f32.mrb[5].mxu1 }
 0x448   : > { %v894_v15 = vpop.f32.mrb[6].mxu1 }
 0x449   : > { %v898_v16 = vmul.f32 0.125, %v894_v15  ;;  %v1456_v17 = vpop.f32.mrb[7].mxu1 }
 0x44b   : > { %v899_v18 = vsel %vm735_vm2, %v898_v16, -inf }
 0x44c   : > { %900 = vmax.xlane.f32.xlu0 %v899_v18 }
 0x462   : > { %911 = vrot.lane.b32.xlu0 %v653_v4, %s1711_s17 }
 0x4d9   : > { %v901_v19 = vpop.xlane.xlu0 %900 }
 0x4da   : > { %v902_v20 = vsub.f32 %v898_v16, %v901_v19 }
 0x4dc   : > { %v903_v21 = vmul.f32 1.442695, %v902_v20 }
 0x4dd   : > { %v912_v22 = vpop.permute.xlu0 %911 }
 0x4de   : > { %1689 = vpow2.f32 %v903_v21  ;;  %1458 = vmatpush3.msra.mxu1 %v912_v22 }
 0x4df   : > { %1462 = vmatprep.subr.mxu1 %v1709_v3 }
 0x4e8   : > { %v1690_v23 = vpop.eup %1689 }
 0x4e9   : > { %v905_v24 = vsel %vm735_vm2, %v1690_v23, 0.0 }
 0x4ea   : > { %906 = vadd.xlane.f32.xlu1 %v905_v24 }
 0x577   : > { %v907_v25 = vpop.xlane.xlu1 %906 }
 0x578   : > { %1691 = vrcp.f32 %v907_v25 }
 0x582   : > { %v1692_v32 = vpop.eup %1691 }
 0x583   : > { %v909_v34 = vmul.f32 %v1692_v32, %v1690_v23 }
 0x585   : > { %1460 = vmatmul.mubr.msk.f32.vlgmr.msra.gmra.mrb[8].mxu1 %vm735_vm2, %v909_v34 }
 0x586   : > { %1463 = vmatpush3.xpose.msk.msra.mxu1 %vm657_vm1, %v584_v35  ;;  %1464 = vmatprep.mubr.msk.f32.mxu1 %vm1710_vm0, %v1709_v3 }
 0x587   : > { %1467 = vmatprep.subr.mxu1 %v1709_v3 }
 0x589   : > { %1465 = vmatmul.mubr.msk.f32.vlgmr.msra.gmra.mrb[10].mxu1 %vm657_vm1, %v513_v37 }
 0x58a   : > { %1468 = vmatpush3.msra.mxu1 %v655_v5  ;;  %1469 = vmatprep.mubr.msk.f32.mxu1 %vm1710_vm0, %v1709_v3 }
 0x58b   : > { %1472 = vmatprep.subr.mxu1 %v1709_v3 }
 0x658   : > { %v983_v6 = vpop.f32.mrb[8].mxu1 }
 0x659   : > { %v1461_v26 = vpop.f32.mrb[9].mxu1 }
 0x65c   : > { %v1059_v38 = vpop.f32.mrb[10].mxu1 }
 0x65d   : > { %v1063_v39 = vmul.f32 0.125, %v1059_v38  ;;  %v1466_v40 = vpop.f32.mrb[11].mxu1 }
 0x65f   : > { %v1064_v41 = vsel %vm735_vm2, %v1063_v39, -inf }
 0x660   : > { %1065 = vmax.xlane.f32.xlu0 %v1064_v41 }
 0x676   : > { %1148 = vrot.lane.b32.xlu0 %v513_v37, %s1711_s17 }
 0x6ed   : > { %v1066_v30 = vpop.xlane.xlu0 %1065 }
 0x6ee   : > { %v1067_v42 = vsub.f32 %v1063_v39, %v1066_v30 }
 0x6f0   : > { %v1068_v43 = vmul.f32 1.442695, %v1067_v42 }
 0x6f1   : > { %v1149_v50 = vpop.permute.xlu0 %1148 }
 0x6f2   : > { %1693 = vpow2.f32 %v1068_v43 }
 0x6fc   : > { %v1694_v44 = vpop.eup %1693 }
 0x6fd   : > { %v1070_v45 = vsel %vm735_vm2, %v1694_v44, 0.0 }
 0x6fe   : > { %1071 = vadd.xlane.f32.xlu1 %v1070_v45 }
 0x70f   : > { %1150 = vrot.lane.b32.xlu1 %v584_v35, %s1711_s17 }
 0x78b   : > { %v1072_v46 = vpop.xlane.xlu1 %1071 }
 0x78c   : > { %1695 = vrcp.f32 %v1072_v46 }
 0x78f   : > { %v1151_v49 = vpop.permute.xlu1 %1150 }
 0x796   : > { %v1696_v47 = vpop.eup %1695 }
 0x797   : > { %v1074_v48 = vmul.f32 %v1696_v47, %v1694_v44 }
 0x799   : > { %1470 = vmatmul.mubr.msk.f32.vlgmr.msra.gmra.mrb[12].mxu1 %vm735_vm2, %v1074_v48 }
 0x79a   : > { %1473 = vmatpush3.xpose.msk.msra.mxu1 %vm657_vm1, %v1151_v49  ;;  %1474 = vmatprep.mubr.msk.f32.mxu1 %vm1710_vm0, %v1709_v3 }
 0x79b   : > { %1477 = vmatprep.subr.mxu1 %v1709_v3 }
 0x79d   : > { %1475 = vmatmul.mubr.msk.f32.vlgmr.msra.gmra.mrb[14].mxu1 %vm657_vm1, %v1149_v50 }
 0x79e   : > { %1479 = vmatprep.mubr.msk.f32.mxu1 %vm1710_vm0, %v1709_v3 }
 0x86c   : > { %v1144_v51 = vpop.f32.mrb[12].mxu1 }
 0x86d   : > { %v1471_v52 = vpop.f32.mrb[13].mxu1 }
 0x870   : > { %v1222_v53 = vpop.f32.mrb[14].mxu1 }
 0x871   : > { %v1226_v54 = vmul.f32 0.125, %v1222_v53  ;;  %v1476_v55 = vpop.f32.mrb[15].mxu1 }
 0x873   : > { %v1227_v56 = vsel %vm735_vm2, %v1226_v54, -inf }
 0x874   : > { %1228 = vmax.xlane.f32.xlu1 %v1227_v56 }
 0x885   : > { %1239 = vrot.lane.b32.xlu1 %v655_v5, %s1711_s17 }
 0x901   : > { %v1229_v57 = vpop.xlane.xlu1 %1228 }
 0x902   : > { %v1230_v58 = vsub.f32 %v1226_v54, %v1229_v57 }
 0x904   : > { %v1231_v59 = vmul.f32 1.442695, %v1230_v58 }
 0x905   : > { %v1240_v60 = vpop.permute.xlu1 %1239 }
 0x906   : > { %1697 = vpow2.f32 %v1231_v59  ;;  %1478 = vmatpush3.msra.mxu1 %v1240_v60 }
 0x910   : > { %v1698_v61 = vpop.eup %1697 }
 0x911   : > { %v1233_v3 = vsel %vm735_vm2, %v1698_v61, 0.0 }
 0x912   : > { %1234 = vadd.xlane.f32.xlu0 %v1233_v3 }
 0x928   : > { %1316 = vrot.lane.b32.xlu0 %v983_v6, %s1711_s17 }
 0x99f   : > { %v1235_v62 = vpop.xlane.xlu0 %1234 }
 0x9a0   : > { %1699 = vrcp.f32 %v1235_v62 }
 0x9a3   : > { %v1317_v0 = vpop.permute.xlu0 %1316 }
 0x9a4   : > { %v1323_v1 = vsel %vm657_vm1, %v2383_v12, %v1317_v0 }
 0x9a5   : > { %v1327_v2 = vadd.f32 %v1325_v63, %v1323_v1 }
 0x9a7   : > { %1329 = vst [vmem:[%s217_s13] sm:$0xff] %v1327_v2 }
 0x9aa   : > { %v1700_v4 = vpop.eup %1699 }
 0x9ab   : > { %v1237_v7 = vmul.f32 %v1700_v4, %v1698_v61 }
 0x9ad   : > { %1480 = vmatmul.mubr.msk.f32.vlgmr.msra.gmra.mrb[16].mxu1 %vm735_vm2, %v1237_v7 }
 0xa80   : > { %v1311_v14 = vpop.f32.mrb[16].mxu1 }
 0xa81   : > { %1320 = vrot.lane.b32.xlu1 %v1311_v14, %s1711_s17  ;;  %v1481_v8 = vpop.f32.mrb[17].mxu1 }
 0xaf3   : > { %v1321_v10 = vpop.permute.xlu1 %1320 }
 0xaf4   : > { %v1324_v11 = vsel %vm657_vm1, %v1144_v51, %v1321_v10 }
 0xaf5   : > { %v1328_v13 = vadd.f32 %v1326_v9, %v1324_v11 }
 0xaf7   : > { %1330 = vst [vmem:[%s217_s13 + $0x8] sm:$0xff] %v1328_v13 }
 0xaf8 PF: > { %s14_s15 = sadd.s32 1, %s1707_s15  }
 0xaf9   : > { %p11_p4 = scmp.ge.s32.totalorder %s14_s15, 4  }
 0xafb   :  { %13 = sbr.rel (!%p11_p4) target bundleno = 1 (0x1), region = 69 }

// kernel: transformer_block.3
= control target key start
LH: loop header
LB: loop body
LE: loop exit
PB: predicated region body
PF: predicated region fallthrough
CT: control target
= control target key end

     0   :  { %s10820_s27 = smov 0   ;;  %s11952_s0 = inlined_call_operand.vmem [shape: f32[2,4,1024], index: 0, kind: input, shape index: {}]   ;;  %s11953_s1 = inlined_call_operand.vmem [shape: f32[27,4,4], index: 1, kind: input, shape index: {}]   ;;  %s11954_s2 = inlined_call_operand.vmem [shape: f32[4,1], index: 2, kind: input, shape index: {}]   ;;  %s11955_s3 = inlined_call_operand.vmem [shape: f32[4,4], index: 3, kind: input, shape index: {}]   ;;  %s11956_s4 = inlined_call_operand.vmem [shape: f32[4,1], index: 4, kind: input, shape index: {}]   ;;  %s11957_s5 = inlined_call_operand.vmem [shape: f32[4,4], index: 5, kind: input, shape index: {}]   ;;  %s11958_s6 = inlined_call_operand.vmem [shape: f32[4,1], index: 6, kind: input, shape index: {}]   ;;  %s11959_s7 = inlined_call_operand.vmem [shape: f32[2,4,800], index: 7, kind: output, shape index: {0}]   ;;  %s11960_s8 = inlined_call_operand.vmem [shape: f32[2,4,800], index: 8, kind: output, shape index: {1}]  }
   0x1 LB: > { %s9975_s28 = sadd.s32 4294967295, %s10744_s27   ;;  %p9979_p0 = scmp.ge.s32.totalorder %s10744_s27, 1  ;;  %s10744_s27 = sphi %s10820_s27, %s19_s27  }
   0x2   : > { %p265_p1 = scmp.lt.s32.totalorder %s10744_s27, 3 }
   0x4   : > { %p266_p2 = pnand %p9979_p0, %p265_p1 }
   0x5   : > { %p304_p3 = scmp.lt.s32.totalorder (!%p266_p2), %s9975_s28, 1  ;;  %v10746_v0 = vmov (!%p266_p2), 0.0   ;;  %s10747_s11 = smov (!%p266_p2), 127   ;;  %vm347_vm0 = vcmask (!%p266_p2), 1039360   ;;  %vm358_vm1 = vcmask (!%p266_p2), 1043456   ;;  %vm354_vm2 = vcmask (!%p266_p2), 31744  }
   0x6   : > { %269 = sbr.rel (%p266_p2) target bundleno = 963 (0x3c3), region = 48  ;;  %508 = vmatprep.mubr.f32.mxu1 (!%p266_p2), %v10746_v0  ;;  %437 = vmatprep.mubr.f32.mxu0 (!%p266_p2), %v10746_v0  ;;  %s10748_s12 = smov (!%p266_p2), 126   ;;  %v9984_v14 = vld [vmem:[%s11953_s1 + $0x4] sm:$0xf] (!%p266_p2)  ;;  %vm10756_vm3 = vmmov (!%p266_p2), 0   ;;  %vm972_vm4 = vcmask (!%p266_p2), 1031168  }
   0x7   : > { %s10749_s13 = smov (!%p266_p2), 118   ;;  %s10750_s14 = smov (!%p266_p2), 117   ;;  %v323_v26 = vld [vmem:[%s11953_s1] sm:$0xf] (!%p266_p2)  ;;  %v10007_v37 = vld [vmem:[%s11953_s1 + $0x8] sm:$0xf] (!%p266_p2) }
   0x8   : > { %s10751_s15 = smov (!%p266_p2), 116   ;;  %s10752_s16 = smov (!%p266_p2), 108   ;;  %vm1302_vm5 = vcmask (!%p266_p2), 965632   ;;  %v10019_v48 = vld [vmem:[%s11953_s1 + $0xc] sm:$0xf] (!%p266_p2)  ;;  %vm1632_vm6 = vcmask (!%p266_p2), 957440  }
   0x9   : > { %s10753_s17 = smov (!%p266_p2), 107   ;;  %s10754_s18 = smov (!%p266_p2), 106   ;;  %v10031_v61 = vld [vmem:[%s11953_s1 + $0x10] sm:$0xf] (!%p266_p2)  ;;  %vm1962_vm7 = vcmask (!%p266_p2), 949248   ;;  %vm2292_vm8 = vcmask (!%p266_p2), 883712  }
   0xa   : > { %s10755_s19 = smov (!%p266_p2), 28   ;;  %s10757_s22 = smov (!%p266_p2), 27   ;;  %vm2622_vm9 = vcmask (!%p266_p2), 875520   ;;  %vm2952_vm10 = vcmask (!%p266_p2), 867328   ;;  %vm3285_vm11 = vcmask (!%p266_p2), 228352   ;;  %vm3618_vm12 = vcmask (!%p266_p2), 220160  }
   0xb   : > { %s10763_s25 = smov (!%p266_p2), 7   ;;  %s10764_s30 = smov (!%p266_p2), 6   ;;  %vm3951_vm13 = vcmask (!%p266_p2), 211968   ;;  %vm4284_vm14 = vcmask (!%p266_p2), 146432   ;;  %vm4617_vm15 = vcmask (!%p266_p2), 138240  }
   0xc   : > { %s10768_s20 = smov (!%p266_p2), 46   ;;  %s10769_s21 = smov (!%p266_p2), 45  }
   0xd   : > { %s11962_s28 = smov (!%p304_p3, %s9975_s28), 1  ;;  %s10770_s24 = smov 44  }
   0xe   : > { %s10331_s29 = sshll.u32 %s11962_s28, 5 }
   0xf   : > { %s10836_s10 = scalar_lea.vmem %s11952_s0, %s10331_s29  ;;  %s10758_s29 = smov 26  }
  0x10   : > { %v10839_v1 = vld [vmem:[%s10836_s10 + $0x8] sm:$0xff]  ;;  %v10842_v2 = vld [vmem:[%s10836_s10] sm:$0xff]  ;;  %v10851_v4 = vld [vmem:[%s10836_s10 + $0x10] sm:$0xff] }
  0x11   : > { %337 = vrot.lane.b32.xlu0 %v10839_v1, %s10747_s11  ;;  %333 = vrot.lane.b32.xlu1 %v10842_v2, %s10747_s11  ;;  %v10848_v3 = vcombine.high %v10839_v1, %v10839_v1  ;;  %v10855_v5 = vcombine.high %v10842_v2, %v10842_v2  ;;  %v10861_v6 = vcombine.high %v10851_v4, %v10851_v4  ;;  %v10866_v7 = vld [vmem:[%s10836_s10 + $0x18] sm:$0xff] }
  0x12   : > { %v10931_v15 = vcombine.high %v10866_v7, %v10866_v7 }
  0x15   : > { %341 = vrot.lane.b32.xlu0 %v10851_v4, %s10747_s11  ;;  %339 = vrot.lane.b32.xlu1 %v10848_v3, %s10747_s11 }
  0x19   : > { %343 = vrot.lane.b32.xlu1 %v10861_v6, %s10747_s11  ;;  %335 = vrot.lane.b32.xlu0 %v10855_v5, %s10747_s11 }
  0x1d   : > { %960 = vrot.lane.b32.xlu1 %v10855_v5, %s10748_s12  ;;  %345 = vrot.lane.b32.xlu0 %v10866_v7, %s10747_s11  ;;  %s10759_s11 = smov 18  }
  0x21   : > { %958 = vrot.lane.b32.xlu1 %v10842_v2, %s10748_s12  ;;  %962 = vrot.lane.b32.xlu0 %v10839_v1, %s10748_s12 }
  0x25   : > { %966 = vrot.lane.b32.xlu1 %v10851_v4, %s10748_s12  ;;  %964 = vrot.lane.b32.xlu0 %v10848_v3, %s10748_s12 }
  0x29   : > { %970 = vrot.lane.b32.xlu1 %v10866_v7, %s10748_s12  ;;  %968 = vrot.lane.b32.xlu0 %v10861_v6, %s10748_s12  ;;  %s10765_s12 = smov 56  }
  0x2d   : > { %1292 = vrot.lane.b32.xlu1 %v10839_v1, %s10749_s13  ;;  %1290 = vrot.lane.b32.xlu0 %v10855_v5, %s10749_s13 }
  0x31   : > { %1294 = vrot.lane.b32.xlu1 %v10848_v3, %s10749_s13  ;;  %1288 = vrot.lane.b32.xlu0 %v10842_v2, %s10749_s13 }
  0x35   : > { %1298 = vrot.lane.b32.xlu1 %v10861_v6, %s10749_s13  ;;  %1296 = vrot.lane.b32.xlu0 %v10851_v4, %s10749_s13 }
  0x39   : > { %1620 = vrot.lane.b32.xlu1 %v10855_v5, %s10750_s14  ;;  %1300 = vrot.lane.b32.xlu0 %v10866_v7, %s10749_s13 }
  0x3d   : > { %1618 = vrot.lane.b32.xlu1 %v10842_v2, %s10750_s14  ;;  %1622 = vrot.lane.b32.xlu0 %v10839_v1, %s10750_s14 }
  0x41   : > { %1626 = vrot.lane.b32.xlu1 %v10851_v4, %s10750_s14  ;;  %1624 = vrot.lane.b32.xlu0 %v10848_v3, %s10750_s14 }
  0x45   : > { %1630 = vrot.lane.b32.xlu1 %v10866_v7, %s10750_s14  ;;  %1628 = vrot.lane.b32.xlu0 %v10861_v6, %s10750_s14  ;;  %s10773_s14 = smov 34  }
  0x49   : > { %1952 = vrot.lane.b32.xlu1 %v10839_v1, %s10751_s15  ;;  %1950 = vrot.lane.b32.xlu0 %v10855_v5, %s10751_s15 }
  0x4d   : > { %1954 = vrot.lane.b32.xlu1 %v10848_v3, %s10751_s15  ;;  %1948 = vrot.lane.b32.xlu0 %v10842_v2, %s10751_s15 }
  0x51   : > { %1958 = vrot.lane.b32.xlu1 %v10861_v6, %s10751_s15  ;;  %1956 = vrot.lane.b32.xlu0 %v10851_v4, %s10751_s15 }
  0x55   : > { %2280 = vrot.lane.b32.xlu1 %v10855_v5, %s10752_s16  ;;  %1960 = vrot.lane.b32.xlu0 %v10866_v7, %s10751_s15  ;;  %s10766_s15 = smov 55  }
  0x59   : > { %2278 = vrot.lane.b32.xlu1 %v10842_v2, %s10752_s16  ;;  %2282 = vrot.lane.b32.xlu0 %v10839_v1, %s10752_s16 }
  0x5d   : > { %2286 = vrot.lane.b32.xlu1 %v10851_v4, %s10752_s16  ;;  %2284 = vrot.lane.b32.xlu0 %v10848_v3, %s10752_s16 }
  0x61   : > { %2290 = vrot.lane.b32.xlu1 %v10866_v7, %s10752_s16  ;;  %2288 = vrot.lane.b32.xlu0 %v10861_v6, %s10752_s16  ;;  %s10760_s16 = smov 17  }
  0x65   : > { %2612 = vrot.lane.b32.xlu1 %v10839_v1, %s10753_s17  ;;  %2610 = vrot.lane.b32.xlu0 %v10855_v5, %s10753_s17 }
  0x69   : > { %2614 = vrot.lane.b32.xlu1 %v10848_v3, %s10753_s17  ;;  %2608 = vrot.lane.b32.xlu0 %v10842_v2, %s10753_s17 }
  0x6d   : > { %2618 = vrot.lane.b32.xlu1 %v10861_v6, %s10753_s17  ;;  %2616 = vrot.lane.b32.xlu0 %v10851_v4, %s10753_s17 }
  0x71   : > { %2940 = vrot.lane.b32.xlu1 %v10855_v5, %s10754_s18  ;;  %2620 = vrot.lane.b32.xlu0 %v10866_v7, %s10753_s17 }
  0x75   : > { %2938 = vrot.lane.b32.xlu1 %v10842_v2, %s10754_s18  ;;  %2942 = vrot.lane.b32.xlu0 %v10839_v1, %s10754_s18 }
  0x79   : > { %2946 = vrot.lane.b32.xlu1 %v10851_v4, %s10754_s18  ;;  %2944 = vrot.lane.b32.xlu0 %v10848_v3, %s10754_s18 }
  0x7d   : > { %2950 = vrot.lane.b32.xlu1 %v10866_v7, %s10754_s18  ;;  %2948 = vrot.lane.b32.xlu0 %v10861_v6, %s10754_s18  ;;  %s10767_s18 = smov 54  }
  0x81   : > { %3273 = vrot.lane.b32.xlu1 %v10839_v1, %s10755_s19  ;;  %3271 = vrot.lane.b32.xlu0 %v10855_v5, %s10755_s19 }
  0x83   : > { %v338_v8 = vpop.permute.xlu0 %337  ;;  %v334_v9 = vpop.permute.xlu1 %333 }
  0x85   : > { %3275 = vrot.lane.b32.xlu1 %v10848_v3, %s10755_s19  ;;  %3269 = vrot.lane.b32.xlu0 %v10842_v2, %s10755_s19 }
  0x87   : > { %v342_v10 = vpop.permute.xlu0 %341  ;;  %v340_v11 = vpop.permute.xlu1 %339 }
  0x88   : > { %v351_v12 = vsel %vm347_vm0, %v340_v11, %v342_v10  ;;  %v350_v13 = vsel %vm347_vm0, %v338_v8, %v340_v11 }
  0x89   : > { %9988 = vmatprep.subr.msk.mxu1 %vm358_vm1, %v351_v12  ;;  %3279 = vrot.lane.b32.xlu1 %v10861_v6, %s10755_s19 }
  0x8a   : > { %3277 = vrot.lane.b32.xlu0 %v10851_v4, %s10755_s19  ;;  %9989 = vmatpush1.msk.msra.mxu1 %vm358_vm1, %v350_v13 }
  0x8b   : > { %v344_v16 = vpop.permute.xlu1 %343  ;;  %v336_v17 = vpop.permute.xlu0 %335  ;;  %9990 = vmatmul.mubr.msk.f32.vlgmr.msra.gmra.mrb[0].mxu1 %vm354_vm2, %v9984_v14  ;;  %10390 = vmatprep.subr.mxu1 %v10746_v0 }
  0x8c   : > { %v349_v18 = vsel %vm347_vm0, %v336_v17, %v338_v8  ;;  %v348_v19 = vsel %vm347_vm0, %v334_v9, %v336_v17  ;;  %10392 = vmatprep.mubr.msk.f32.mxu1 %vm10756_vm3, %v10746_v0  ;;  %v352_v23 = vsel %vm347_vm0, %v342_v10, %v344_v16  ;;  %v10043_v17 = vld [vmem:[%s11953_s1 + $0x14] sm:$0xf] }
  0x8d   : > { %3283 = vrot.lane.b32.xlu1 %v10931_v15, %s10755_s19  ;;  %9985 = vmatprep.subr.msk.mxu0 %vm358_vm1, %v349_v18 }
  0x8e   : > { %3281 = vrot.lane.b32.xlu0 %v10866_v7, %s10755_s19  ;;  %9986 = vmatpush1.msk.msra.mxu0 %vm358_vm1, %v348_v19  ;;  %s10761_s19 = smov 16  }
  0x8f   : > { %v961_v20 = vpop.permute.xlu1 %960  ;;  %9987 = vmatmul.mubr.msk.f32.vlgmr.msra.gmra.mrb[0].mxu0 %vm354_vm2, %v9984_v14  ;;  %v346_v21 = vpop.permute.xlu0 %345 }
  0x90   : > { %10391 = vmatpush3.msk.msra.mxu1 %vm358_vm1, %v346_v21  ;;  %v353_v22 = vsel %vm347_vm0, %v344_v16, %v346_v21  ;;  %579 = vmatprep.mubr.f32.mxu0 %v10746_v0  ;;  %vm4950_vm0 = vcmask 130048  }
  0x91   : > { %3606 = vrot.lane.b32.xlu1 %v10839_v1, %s10757_s22  ;;  %9991 = vmatprep.subr.msk.mxu0 %vm358_vm1, %v353_v22 }
  0x92   : > { %3604 = vrot.lane.b32.xlu0 %v10855_v5, %s10757_s22  ;;  %9992 = vmatpush1.msk.msra.mxu0 %vm358_vm1, %v352_v23 }
  0x93   : > { %10393 = vmatmul.mubr.msk.f32.vlgmr.msra.gmra.mrb[2].mxu1 %vm354_vm2, %v9984_v14  ;;  %v959_v24 = vpop.permute.xlu1 %958  ;;  %9993 = vmatmul.mubr.msk.f32.vlgmr.msra.gmra.mrb[2].mxu0 %vm354_vm2, %v9984_v14  ;;  %v963_v25 = vpop.permute.xlu0 %962 }
  0x94   : > { %9996 = vmatprep.subr.msk.mxu0 %vm358_vm1, %v10855_v5  ;;  %9999 = vmatprep.subr.msk.mxu1 %vm358_vm1, %v10848_v3  ;;  %v974_v29 = vsel %vm972_vm4, %v961_v20, %v963_v25  ;;  %v973_v34 = vsel %vm972_vm4, %v959_v24, %v961_v20 }
  0x95   : > { %3608 = vrot.lane.b32.xlu1 %v10848_v3, %s10757_s22  ;;  %9997 = vmatpush1.msk.msra.mxu0 %vm358_vm1, %v10842_v2 }
  0x96   : > { %3602 = vrot.lane.b32.xlu0 %v10842_v2, %s10757_s22  ;;  %10000 = vmatpush1.msk.msra.mxu1 %vm358_vm1, %v10839_v1 }
  0x97   : > { %808 = vmatprep.mubr.f32.mxu1 %v10746_v0  ;;  %737 = vmatprep.mubr.f32.mxu0 %v10746_v0  ;;  %v967_v27 = vpop.permute.xlu1 %966  ;;  %v965_v28 = vpop.permute.xlu0 %964 }
  0x98   : > { %10001 = vmatmul.mubr.msk.f32.vlgmr.msra.gmra.mrb[0].mxu1 %vm354_vm2, %v323_v26  ;;  %10002 = vmatprep.subr.msk.mxu0 %vm358_vm1, %v10861_v6  ;;  %v976_v30 = vsel %vm972_vm4, %v965_v28, %v967_v27  ;;  %v975_v33 = vsel %vm972_vm4, %v963_v25, %v965_v28 }
  0x99   : > { %9998 = vmatmul.mubr.msk.f32.vlgmr.msra.gmra.mrb[0].mxu0 %vm354_vm2, %v323_v26  ;;  %10395 = vmatprep.subr.mxu1 %v10746_v0 }
  0x9a   : > { %10003 = vmatpush1.msk.msra.mxu0 %vm358_vm1, %v10851_v4  ;;  %10396 = vmatpush3.msk.msra.mxu1 %vm358_vm1, %v10866_v7 }
  0x9b   : > { %10008 = vmatprep.subr.msk.mxu0 %vm358_vm1, %v974_v29  ;;  %3612 = vrot.lane.b32.xlu1 %v10861_v6, %s10757_s22  ;;  %v971_v31 = vpop.permute.xlu1 %970  ;;  %v969_v32 = vpop.permute.xlu0 %968 }
  0x9c   : > { %3610 = vrot.lane.b32.xlu0 %v10851_v4, %s10757_s22  ;;  %10397 = vmatprep.mubr.msk.f32.mxu1 %vm10756_vm3, %v10746_v0  ;;  %v978_v35 = vsel %vm972_vm4, %v969_v32, %v971_v31  ;;  %v977_v39 = vsel %vm972_vm4, %v967_v27, %v969_v32  ;;  %vm5283_vm4 = vcmask 64512  }
  0x9d   : > { %10011 = vmatprep.subr.msk.mxu1 %vm358_vm1, %v976_v30  ;;  %879 = vmatprep.mubr.f32.mxu0 %v10746_v0  ;;  %v10055_v30 = vld [vmem:[%s11953_s1 + $0x18] sm:$0xf] }
  0x9e   : > { %10398 = vmatmul.mubr.msk.f32.vlgmr.msra.gmra.mrb[4].mxu1 %vm354_vm2, %v323_v26  ;;  %10004 = vmatmul.mubr.msk.f32.vlgmr.msra.gmra.mrb[2].mxu0 %vm354_vm2, %v323_v26 }
  0x9f   : > { %10012 = vmatpush1.msk.msra.mxu1 %vm358_vm1, %v975_v33  ;;  %10009 = vmatpush1.msk.msra.mxu0 %vm358_vm1, %v973_v34  ;;  %v1293_v36 = vpop.permute.xlu1 %1292  ;;  %v1291_v38 = vpop.permute.xlu0 %1290 }
  0xa0   : > { %3616 = vrot.lane.b32.xlu1 %v10931_v15, %s10757_s22  ;;  %3614 = vrot.lane.b32.xlu0 %v10866_v7, %s10757_s22  ;;  %v1304_v40 = vsel %vm1302_vm5, %v1291_v38, %v1293_v36  ;;  %s10762_s22 = smov 8  }
  0xa1   : > { %10014 = vmatprep.subr.msk.mxu0 %vm358_vm1, %v978_v35  ;;  %1060 = vmatprep.mubr.f32.mxu0 %v10746_v0 }
  0xa2   : > { %10010 = vmatmul.mubr.msk.f32.vlgmr.msra.gmra.mrb[0].mxu0 %vm354_vm2, %v10007_v37  ;;  %1131 = vmatprep.mubr.f32.mxu1 %v10746_v0 }
  0xa3   : > { %10015 = vmatpush1.msk.msra.mxu0 %vm358_vm1, %v977_v39  ;;  %10400 = vmatprep.subr.mxu1 %v10746_v0  ;;  %v1295_v41 = vpop.permute.xlu1 %1294  ;;  %v1289_v42 = vpop.permute.xlu0 %1288 }
  0xa4   : > { %10013 = vmatmul.mubr.msk.f32.vlgmr.msra.gmra.mrb[0].mxu1 %vm354_vm2, %v10007_v37  ;;  %3939 = vrot.lane.b32.xlu1 %v10839_v1, %s10758_s29  ;;  %v1303_v43 = vsel %vm1302_vm5, %v1289_v42, %v1291_v38  ;;  %v1305_v47 = vsel %vm1302_vm5, %v1293_v36, %v1295_v41 }
  0xa5   : > { %10401 = vmatpush3.msk.msra.mxu1 %vm358_vm1, %v971_v31  ;;  %3937 = vrot.lane.b32.xlu0 %v10855_v5, %s10758_s29 }
  0xa6   : > { %10020 = vmatprep.subr.msk.mxu0 %vm358_vm1, %v1304_v40  ;;  %1202 = vmatprep.mubr.f32.mxu0 %v10746_v0 }
  0xa7   : > { %10016 = vmatmul.mubr.msk.f32.vlgmr.msra.gmra.mrb[2].mxu0 %vm354_vm2, %v10007_v37  ;;  %v1299_v44 = vpop.permute.xlu1 %1298  ;;  %10402 = vmatprep.mubr.msk.f32.mxu1 %vm10756_vm3, %v10746_v0  ;;  %v1297_v45 = vpop.permute.xlu0 %1296 }
  0xa8   : > { %3941 = vrot.lane.b32.xlu1 %v10848_v3, %s10758_s29  ;;  %10021 = vmatpush1.msk.msra.mxu0 %vm358_vm1, %v1303_v43  ;;  %v1306_v46 = vsel %vm1302_vm5, %v1295_v41, %v1297_v45  ;;  %v1307_v52 = vsel %vm1302_vm5, %v1297_v45, %v1299_v44  ;;  %v10067_v45 = vld [vmem:[%s11953_s1 + $0x1c] sm:$0xf] }
  0xa9   : > { %3935 = vrot.lane.b32.xlu0 %v10842_v2, %s10758_s29  ;;  %10403 = vmatmul.mubr.msk.f32.vlgmr.msra.gmra.mrb[6].mxu1 %vm354_vm2, %v10007_v37 }
  0xaa   : > { %10023 = vmatprep.subr.msk.mxu1 %vm358_vm1, %v1306_v46  ;;  %1461 = vmatprep.mubr.f32.mxu1 %v10746_v0 }
  0xab   : > { %10024 = vmatpush1.msk.msra.mxu1 %vm358_vm1, %v1305_v47  ;;  %v1621_v49 = vpop.permute.xlu1 %1620  ;;  %v1301_v50 = vpop.permute.xlu0 %1300  ;;  %1390 = vmatprep.mubr.f32.mxu0 %v10746_v0 }
  0xac   : > { %3945 = vrot.lane.b32.xlu1 %v10861_v6, %s10758_s29  ;;  %10405 = vmatprep.subr.mxu1 %v10746_v0  ;;  %v1308_v51 = vsel %vm1302_vm5, %v1299_v44, %v1301_v50  ;;  %vm5616_vm5 = vcmask 56320  }
  0xad   : > { %3943 = vrot.lane.b32.xlu0 %v10851_v4, %s10758_s29  ;;  %10025 = vmatmul.mubr.msk.f32.vlgmr.msra.gmra.mrb[0].mxu1 %vm354_vm2, %v10019_v48 }
  0xae   : > { %10406 = vmatpush3.msk.msra.mxu1 %vm358_vm1, %v1301_v50  ;;  %10026 = vmatprep.subr.msk.mxu0 %vm358_vm1, %v1308_v51 }
  0xaf   : > { %10022 = vmatmul.mubr.msk.f32.vlgmr.msra.gmra.mrb[0].mxu0 %vm354_vm2, %v10019_v48  ;;  %v1619_v53 = vpop.permute.xlu1 %1618  ;;  %v1623_v54 = vpop.permute.xlu0 %1622  ;;  %10407 = vmatprep.mubr.msk.f32.mxu1 %vm10756_vm3, %v10746_v0 }
  0xb0   : > { %3949 = vrot.lane.b32.xlu1 %v10931_v15, %s10758_s29  ;;  %10027 = vmatpush1.msk.msra.mxu0 %vm358_vm1, %v1307_v52  ;;  %v1634_v55 = vsel %vm1632_vm6, %v1621_v49, %v1623_v54  ;;  %v1633_v56 = vsel %vm1632_vm6, %v1619_v53, %v1621_v49 }
  0xb1   : > { %3947 = vrot.lane.b32.xlu0 %v10866_v7, %s10758_s29  ;;  %1532 = vmatprep.mubr.f32.mxu0 %v10746_v0  ;;  %s10771_s29 = smov 36  }
  0xb2   : > { %10032 = vmatprep.subr.msk.mxu0 %vm358_vm1, %v1634_v55  ;;  %10408 = vmatmul.mubr.msk.f32.vlgmr.msra.gmra.mrb[8].mxu1 %vm354_vm2, %v10019_v48 }
  0xb3   : > { %10028 = vmatmul.mubr.msk.f32.vlgmr.msra.gmra.mrb[2].mxu0 %vm354_vm2, %v10019_v48  ;;  %v1627_v57 = vpop.permute.xlu1 %1626  ;;  %v1625_v58 = vpop.permute.xlu0 %1624  ;;  %1791 = vmatprep.mubr.f32.mxu1 %v10746_v0 }
  0xb4   : > { %4272 = vrot.lane.b32.xlu1 %v10839_v1, %s10759_s11  ;;  %10033 = vmatpush1.msk.msra.mxu0 %vm358_vm1, %v1633_v56  ;;  %v1635_v59 = vsel %vm1632_vm6, %v1623_v54, %v1625_v58  ;;  %v1636_v60 = vsel %vm1632_vm6, %v1625_v58, %v1627_v57  ;;  %v10079_v58 = vld [vmem:[%s11953_s1 + $0x20] sm:$0xf] }
  0xb5   : > { %4270 = vrot.lane.b32.xlu0 %v10855_v5, %s10759_s11  ;;  %10035 = vmatprep.subr.msk.mxu1 %vm358_vm1, %v1636_v60 }
  0xb6   : > { %10036 = vmatpush1.msk.msra.mxu1 %vm358_vm1, %v1635_v59  ;;  %1720 = vmatprep.mubr.f32.mxu0 %v10746_v0 }
  0xb7   : > { %v1631_v62 = vpop.permute.xlu1 %1630  ;;  %v1629_v63 = vpop.permute.xlu0 %1628  ;;  %10034 = vmatmul.mubr.msk.f32.vlgmr.msra.gmra.mrb[0].mxu0 %vm354_vm2, %v10031_v61  ;;  %10410 = vmatprep.subr.mxu1 %v10746_v0 }
  0xb8   : > { %4274 = vrot.lane.b32.xlu1 %v10848_v3, %s10759_s11  ;;  %v1637_v8 = vsel %vm1632_vm6, %v1627_v57, %v1629_v63  ;;  %v1638_v9 = vsel %vm1632_vm6, %v1629_v63, %v1631_v62  ;;  %10037 = vmatmul.mubr.msk.f32.vlgmr.msra.gmra.mrb[0].mxu1 %vm354_vm2, %v10031_v61  ;;  %vm5949_vm6 = vcmask 48128  }
  0xb9   : > { %4268 = vrot.lane.b32.xlu0 %v10842_v2, %s10759_s11  ;;  %10038 = vmatprep.subr.msk.mxu0 %vm358_vm1, %v1638_v9 }
  0xba   : > { %10039 = vmatpush1.msk.msra.mxu0 %vm358_vm1, %v1637_v8  ;;  %10411 = vmatpush3.msk.msra.mxu1 %vm358_vm1, %v1631_v62 }
  0xbb   : > { %v1953_v10 = vpop.permute.xlu1 %1952  ;;  %v1951_v11 = vpop.permute.xlu0 %1950  ;;  %1862 = vmatprep.mubr.f32.mxu0 %v10746_v0  ;;  %10412 = vmatprep.mubr.msk.f32.mxu1 %vm10756_vm3, %v10746_v0 }
  0xbc   : > { %4278 = vrot.lane.b32.xlu1 %v10861_v6, %s10759_s11  ;;  %v1964_v12 = vsel %vm1962_vm7, %v1951_v11, %v1953_v10  ;;  %10040 = vmatmul.mubr.msk.f32.vlgmr.msra.gmra.mrb[2].mxu0 %vm354_vm2, %v10031_v61 }
  0xbd   : > { %4276 = vrot.lane.b32.xlu0 %v10851_v4, %s10759_s11  ;;  %10044 = vmatprep.subr.msk.mxu0 %vm358_vm1, %v1964_v12 }
  0xbe   : > { %10413 = vmatmul.mubr.msk.f32.vlgmr.msra.gmra.mrb[10].mxu1 %vm354_vm2, %v10031_v61  ;;  %2050 = vmatprep.mubr.f32.mxu0 %v10746_v0 }
  0xbf   : > { %v1955_v13 = vpop.permute.xlu1 %1954  ;;  %v1949_v14 = vpop.permute.xlu0 %1948  ;;  %2121 = vmatprep.mubr.f32.mxu1 %v10746_v0 }
  0xc0   : > { %4282 = vrot.lane.b32.xlu1 %v10931_v15, %s10759_s11  ;;  %v1963_v16 = vsel %vm1962_vm7, %v1949_v14, %v1951_v11  ;;  %v1965_v21 = vsel %vm1962_vm7, %v1953_v10, %v1955_v13 }
  0xc1   : > { %4280 = vrot.lane.b32.xlu0 %v10866_v7, %s10759_s11  ;;  %10045 = vmatpush1.msk.msra.mxu0 %vm358_vm1, %v1963_v16  ;;  %s10772_s11 = smov 35  }
  0xc2   : > { %10046 = vmatmul.mubr.msk.f32.vlgmr.msra.gmra.mrb[0].mxu0 %vm354_vm2, %v10043_v17 }
  0xc3   : > { %v1959_v18 = vpop.permute.xlu1 %1958  ;;  %v1957_v19 = vpop.permute.xlu0 %1956  ;;  %2192 = vmatprep.mubr.f32.mxu0 %v10746_v0 }
  0xc4   : > { %4605 = vrot.lane.b32.xlu1 %v10839_v1, %s10760_s16  ;;  %v1966_v20 = vsel %vm1962_vm7, %v1955_v13, %v1957_v19  ;;  %v1967_v25 = vsel %vm1962_vm7, %v1957_v19, %v1959_v18 }
  0xc5   : > { %4603 = vrot.lane.b32.xlu0 %v10855_v5, %s10760_s16  ;;  %10047 = vmatprep.subr.msk.mxu1 %vm358_vm1, %v1966_v20 }
  0xc6   : > { %10048 = vmatpush1.msk.msra.mxu1 %vm358_vm1, %v1965_v21 }
  0xc7   : > { %v2281_v22 = vpop.permute.xlu1 %2280  ;;  %10415 = vmatprep.subr.mxu1 %v10746_v0  ;;  %v1961_v23 = vpop.permute.xlu0 %1960  ;;  %10049 = vmatmul.mubr.msk.f32.vlgmr.msra.gmra.mrb[0].mxu1 %vm354_vm2, %v10043_v17 }
  0xc8   : > { %4607 = vrot.lane.b32.xlu1 %v10848_v3, %s10760_s16  ;;  %10416 = vmatpush3.msk.msra.mxu1 %vm358_vm1, %v1961_v23  ;;  %v1968_v24 = vsel %vm1962_vm7, %v1959_v18, %v1961_v23  ;;  %vm6280_vm7 = vcmask 457728  }
  0xc9   : > { %4601 = vrot.lane.b32.xlu0 %v10842_v2, %s10760_s16  ;;  %10050 = vmatprep.subr.msk.mxu0 %vm358_vm1, %v1968_v24 }
  0xca   : > { %10051 = vmatpush1.msk.msra.mxu0 %vm358_vm1, %v1967_v25  ;;  %10417 = vmatprep.mubr.msk.f32.mxu1 %vm10756_vm3, %v10746_v0 }
  0xcb   : > { %v2279_v26 = vpop.permute.xlu1 %2278  ;;  %v2283_v27 = vpop.permute.xlu0 %2282  ;;  %10052 = vmatmul.mubr.msk.f32.vlgmr.msra.gmra.mrb[2].mxu0 %vm354_vm2, %v10043_v17  ;;  %10418 = vmatmul.mubr.msk.f32.vlgmr.msra.gmra.mrb[12].mxu1 %vm354_vm2, %v10043_v17  ;;  %v10091_v17 = vld [vmem:[%s11953_s1 + $0x24] sm:$0xf] }
  0xcc   : > { %4611 = vrot.lane.b32.xlu1 %v10861_v6, %s10760_s16  ;;  %v2293_v28 = vsel %vm2292_vm8, %v2279_v26, %v2281_v22  ;;  %v2294_v29 = vsel %vm2292_vm8, %v2281_v22, %v2283_v27  ;;  %2380 = vmatprep.mubr.f32.mxu0 %v10746_v0 }
  0xcd   : > { %4609 = vrot.lane.b32.xlu0 %v10851_v4, %s10760_s16  ;;  %10056 = vmatprep.subr.msk.mxu0 %vm358_vm1, %v2294_v29 }
  0xce   : > { %10057 = vmatpush1.msk.msra.mxu0 %vm358_vm1, %v2293_v28  ;;  %2451 = vmatprep.mubr.f32.mxu1 %v10746_v0 }
  0xcf   : > { %v2287_v31 = vpop.permute.xlu1 %2286  ;;  %v2285_v32 = vpop.permute.xlu0 %2284  ;;  %10058 = vmatmul.mubr.msk.f32.vlgmr.msra.gmra.mrb[0].mxu0 %vm354_vm2, %v10055_v30 }
  0xd0   : > { %4615 = vrot.lane.b32.xlu1 %v10931_v15, %s10760_s16  ;;  %v2295_v33 = vsel %vm2292_vm8, %v2283_v27, %v2285_v32  ;;  %v2296_v34 = vsel %vm2292_vm8, %v2285_v32, %v2287_v31  ;;  %2522 = vmatprep.mubr.f32.mxu0 %v10746_v0 }
  0xd1   : > { %4613 = vrot.lane.b32.xlu0 %v10866_v7, %s10760_s16  ;;  %10059 = vmatprep.subr.msk.mxu1 %vm358_vm1, %v2296_v34 }
  0xd2   : > { %10060 = vmatpush1.msk.msra.mxu1 %vm358_vm1, %v2295_v33  ;;  %v10103_v33 = vld [vmem:[%s11953_s1 + $0x28] sm:$0xf] }
  0xd3   : > { %v2291_v35 = vpop.permute.xlu1 %2290  ;;  %v2289_v36 = vpop.permute.xlu0 %2288  ;;  %10420 = vmatprep.subr.mxu1 %v10746_v0  ;;  %10061 = vmatmul.mubr.msk.f32.vlgmr.msra.gmra.mrb[0].mxu1 %vm354_vm2, %v10055_v30 }
  0xd4   : > { %4938 = vrot.lane.b32.xlu1 %v10839_v1, %s10761_s19  ;;  %v2297_v37 = vsel %vm2292_vm8, %v2287_v31, %v2289_v36  ;;  %v2298_v38 = vsel %vm2292_vm8, %v2289_v36, %v2291_v35  ;;  %10421 = vmatpush3.msk.msra.mxu1 %vm358_vm1, %v2291_v35  ;;  %vm6610_vm8 = vcmask 449536  }
  0xd5   : > { %4936 = vrot.lane.b32.xlu0 %v10855_v5, %s10761_s19  ;;  %10062 = vmatprep.subr.msk.mxu0 %vm358_vm1, %v2298_v38 }
  0xd6   : > { %10063 = vmatpush1.msk.msra.mxu0 %vm358_vm1, %v2297_v37  ;;  %10422 = vmatprep.mubr.msk.f32.mxu1 %vm10756_vm3, %v10746_v0 }
  0xd7   : > { %v2613_v39 = vpop.permute.xlu1 %2612  ;;  %v2611_v40 = vpop.permute.xlu0 %2610  ;;  %10064 = vmatmul.mubr.msk.f32.vlgmr.msra.gmra.mrb[2].mxu0 %vm354_vm2, %v10055_v30  ;;  %10423 = vmatmul.mubr.msk.f32.vlgmr.msra.gmra.mrb[14].mxu1 %vm354_vm2, %v10055_v30 }
  0xd8   : > { %4940 = vrot.lane.b32.xlu1 %v10848_v3, %s10761_s19  ;;  %v2624_v41 = vsel %vm2622_vm9, %v2611_v40, %v2613_v39  ;;  %2781 = vmatprep.mubr.f32.mxu1 %v10746_v0 }
  0xd9   : > { %4934 = vrot.lane.b32.xlu0 %v10842_v2, %s10761_s19  ;;  %10068 = vmatprep.subr.msk.mxu0 %vm358_vm1, %v2624_v41 }
  0xda   : > { %2710 = vmatprep.mubr.f32.mxu0 %v10746_v0 }
  0xdb   : > { %v2615_v42 = vpop.permute.xlu1 %2614  ;;  %v2609_v43 = vpop.permute.xlu0 %2608 }
  0xdc   : > { %4944 = vrot.lane.b32.xlu1 %v10861_v6, %s10761_s19  ;;  %v2623_v44 = vsel %vm2622_vm9, %v2609_v43, %v2611_v40  ;;  %v2625_v49 = vsel %vm2622_vm9, %v2613_v39, %v2615_v42 }
  0xdd   : > { %4942 = vrot.lane.b32.xlu0 %v10851_v4, %s10761_s19  ;;  %10069 = vmatpush1.msk.msra.mxu0 %vm358_vm1, %v2623_v44 }
  0xde   : > { %10070 = vmatmul.mubr.msk.f32.vlgmr.msra.gmra.mrb[0].mxu0 %vm354_vm2, %v10067_v45 }
  0xdf   : > { %v2619_v46 = vpop.permute.xlu1 %2618  ;;  %v2617_v47 = vpop.permute.xlu0 %2616  ;;  %2852 = vmatprep.mubr.f32.mxu0 %v10746_v0 }
  0xe0   : > { %4948 = vrot.lane.b32.xlu1 %v10931_v15, %s10761_s19  ;;  %v2626_v48 = vsel %vm2622_vm9, %v2615_v42, %v2617_v47  ;;  %v2627_v53 = vsel %vm2622_vm9, %v2617_v47, %v2619_v46 }
  0xe1   : > { %4946 = vrot.lane.b32.xlu0 %v10866_v7, %s10761_s19  ;;  %10071 = vmatprep.subr.msk.mxu1 %vm358_vm1, %v2626_v48  ;;  %v10115_v48 = vld [vmem:[%s11953_s1 + $0x2c] sm:$0xf] }
  0xe2   : > { %10072 = vmatpush1.msk.msra.mxu1 %vm358_vm1, %v2625_v49 }
  0xe3   : > { %v2941_v50 = vpop.permute.xlu1 %2940  ;;  %10425 = vmatprep.subr.mxu1 %v10746_v0  ;;  %v2621_v51 = vpop.permute.xlu0 %2620  ;;  %10073 = vmatmul.mubr.msk.f32.vlgmr.msra.gmra.mrb[0].mxu1 %vm354_vm2, %v10067_v45 }
  0xe4   : > { %5271 = vrot.lane.b32.xlu1 %v10839_v1, %s10762_s22  ;;  %10426 = vmatpush3.msk.msra.mxu1 %vm358_vm1, %v2621_v51  ;;  %v2628_v52 = vsel %vm2622_vm9, %v2619_v46, %v2621_v51  ;;  %vm6940_vm9 = vcmask 441344  }
  0xe5   : > { %5269 = vrot.lane.b32.xlu0 %v10855_v5, %s10762_s22  ;;  %10074 = vmatprep.subr.msk.mxu0 %vm358_vm1, %v2628_v52 }
  0xe6   : > { %10075 = vmatpush1.msk.msra.mxu0 %vm358_vm1, %v2627_v53  ;;  %10427 = vmatprep.mubr.msk.f32.mxu1 %vm10756_vm3, %v10746_v0 }
  0xe7   : > { %v2939_v54 = vpop.permute.xlu1 %2938  ;;  %v2943_v55 = vpop.permute.xlu0 %2942  ;;  %10076 = vmatmul.mubr.msk.f32.vlgmr.msra.gmra.mrb[2].mxu0 %vm354_vm2, %v10067_v45  ;;  %10428 = vmatmul.mubr.msk.f32.vlgmr.msra.gmra.mrb[16].mxu1 %vm354_vm2, %v10067_v45 }
  0xe8   : > { %5273 = vrot.lane.b32.xlu1 %v10848_v3, %s10762_s22  ;;  %v2953_v56 = vsel %vm2952_vm10, %v2939_v54, %v2941_v50  ;;  %v2954_v57 = vsel %vm2952_vm10, %v2941_v50, %v2943_v55  ;;  %3040 = vmatprep.mubr.f32.mxu0 %v10746_v0 }
  0xe9   : > { %5267 = vrot.lane.b32.xlu0 %v10842_v2, %s10762_s22  ;;  %10080 = vmatprep.subr.msk.mxu0 %vm358_vm1, %v2954_v57 }
  0xea   : > { %10081 = vmatpush1.msk.msra.mxu0 %vm358_vm1, %v2953_v56  ;;  %3111 = vmatprep.mubr.f32.mxu1 %v10746_v0 }
  0xeb   : > { %v2947_v59 = vpop.permute.xlu1 %2946  ;;  %v2945_v60 = vpop.permute.xlu0 %2944  ;;  %10082 = vmatmul.mubr.msk.f32.vlgmr.msra.gmra.mrb[0].mxu0 %vm354_vm2, %v10079_v58 }
  0xec   : > { %5277 = vrot.lane.b32.xlu1 %v10861_v6, %s10762_s22  ;;  %v2955_v61 = vsel %vm2952_vm10, %v2943_v55, %v2945_v60  ;;  %v2956_v62 = vsel %vm2952_vm10, %v2945_v60, %v2947_v59  ;;  %3182 = vmatprep.mubr.f32.mxu0 %v10746_v0 }
  0xed   : > { %5275 = vrot.lane.b32.xlu0 %v10851_v4, %s10762_s22  ;;  %10083 = vmatprep.subr.msk.mxu1 %vm358_vm1, %v2956_v62  ;;  %v10127_v62 = vld [vmem:[%s11953_s1 + $0x30] sm:$0xf] }
  0xee   : > { %10084 = vmatpush1.msk.msra.mxu1 %vm358_vm1, %v2955_v61 }
  0xef   : > { %v2951_v63 = vpop.permute.xlu1 %2950  ;;  %v2949_v8 = vpop.permute.xlu0 %2948  ;;  %10430 = vmatprep.subr.mxu1 %v10746_v0  ;;  %10085 = vmatmul.mubr.msk.f32.vlgmr.msra.gmra.mrb[0].mxu1 %vm354_vm2, %v10079_v58 }
  0xf0   : > { %5281 = vrot.lane.b32.xlu1 %v10931_v15, %s10762_s22  ;;  %v2957_v9 = vsel %vm2952_vm10, %v2947_v59, %v2949_v8  ;;  %v2958_v10 = vsel %vm2952_vm10, %v2949_v8, %v2951_v63  ;;  %10431 = vmatpush3.msk.msra.mxu1 %vm358_vm1, %v2951_v63  ;;  %v11381_v59 = vld [vmem:[%s10836_s10 + $0x10] sm:$0xff]  ;;  %v11394_v8 = vld [vmem:[%s10836_s10 + $0x18] sm:$0xff]  ;;  %vm7270_vm10 = vcmask 375808  }
  0xf1   : > { %5279 = vrot.lane.b32.xlu0 %v10866_v7, %s10762_s22  ;;  %10086 = vmatprep.subr.msk.mxu0 %vm358_vm1, %v2958_v10  ;;  %s10691_s22 = smul.u32 28, %s11962_s28 }
  0xf2   : > { %10087 = vmatpush1.msk.msra.mxu0 %vm358_vm1, %v2957_v9  ;;  %10432 = vmatprep.mubr.msk.f32.mxu1 %vm10756_vm3, %v10746_v0 }
  0xf3   : > { %v3274_v11 = vpop.permute.xlu1 %3273  ;;  %v3272_v12 = vpop.permute.xlu0 %3271  ;;  %10088 = vmatmul.mubr.msk.f32.vlgmr.msra.gmra.mrb[2].mxu0 %vm354_vm2, %v10079_v58  ;;  %10433 = vmatmul.mubr.msk.f32.vlgmr.msra.gmra.mrb[18].mxu1 %vm354_vm2, %v10079_v58 }
  0xf4   : > { %5604 = vrot.lane.b32.xlu1 %v10839_v1, %s10763_s25  ;;  %v3287_v13 = vsel %vm3285_vm11, %v3272_v12, %v3274_v11  ;;  %3445 = vmatprep.mubr.f32.mxu1 %v10746_v0 }
  0xf5   : > { %5602 = vrot.lane.b32.xlu0 %v10855_v5, %s10763_s25  ;;  %10092 = vmatprep.subr.msk.mxu0 %vm358_vm1, %v3287_v13  ;;  %v11406_v13 = vld [vmem:[%s10836_s10 + $0x8] sm:$0xff] }
  0xf6   : > { %3374 = vmatprep.mubr.f32.mxu0 %v10746_v0 }
  0xf7   : > { %v3276_v14 = vpop.permute.xlu1 %3275  ;;  %v3270_v16 = vpop.permute.xlu0 %3269 }
  0xf8   : > { %5606 = vrot.lane.b32.xlu1 %v10848_v3, %s10763_s25  ;;  %v3286_v18 = vsel %vm3285_vm11, %v3270_v16, %v3272_v12  ;;  %v3288_v22 = vsel %vm3285_vm11, %v3274_v11, %v3276_v14 }
  0xf9   : > { %5600 = vrot.lane.b32.xlu0 %v10842_v2, %s10763_s25  ;;  %10093 = vmatpush1.msk.msra.mxu0 %vm358_vm1, %v3286_v18 }
  0xfa   : > { %10094 = vmatmul.mubr.msk.f32.vlgmr.msra.gmra.mrb[0].mxu0 %vm354_vm2, %v10091_v17 }
  0xfb   : > { %v3280_v19 = vpop.permute.xlu1 %3279  ;;  %3516 = vmatprep.mubr.f32.mxu0 %v10746_v0 }
  0xfc   : > { %5610 = vrot.lane.b32.xlu1 %v10861_v6, %s10763_s25  ;;  %v3278_v20 = vpop.permute.xlu0 %3277 }
  0xfd   : > { %5608 = vrot.lane.b32.xlu0 %v10851_v4, %s10763_s25  ;;  %v3289_v21 = vsel %vm3285_vm11, %v3276_v14, %v3278_v20  ;;  %v3290_v27 = vsel %vm3285_vm11, %v3278_v20, %v3280_v19 }
  0xfe   : > { %10095 = vmatprep.subr.msk.mxu1 %vm358_vm1, %v3289_v21 }
  0xff   : > { %10096 = vmatpush1.msk.msra.mxu1 %vm358_vm1, %v3288_v22  ;;  %v3284_v23 = vpop.permute.xlu1 %3283 }
 0x100   : > { %5614 = vrot.lane.b32.xlu1 %v10931_v15, %s10763_s25  ;;  %v3282_v24 = vpop.permute.xlu0 %3281  ;;  %10435 = vmatprep.subr.mxu1 %v10746_v0 }
 0x101   : > { %5612 = vrot.lane.b32.xlu0 %v10866_v7, %s10763_s25  ;;  %v3292_v25 = vsel %vm3285_vm11, %v3282_v24, %v3284_v23  ;;  %10097 = vmatmul.mubr.msk.f32.vlgmr.msra.gmra.mrb[0].mxu1 %vm354_vm2, %v10091_v17  ;;  %v3291_v26 = vsel %vm3285_vm11, %v3280_v19, %v3282_v24  ;;  %vm7600_vm11 = vcmask 367616   ;;  %s313_s25 = scalar_lea.vmem %s11959_s7, %s10691_s22 }
 0x102   : > { %10098 = vmatprep.subr.msk.mxu0 %vm358_vm1, %v3291_v26  ;;  %10436 = vmatpush3.msk.msra.mxu1 %vm358_vm1, %v3292_v25  ;;  %v10139_v25 = vld [vmem:[%s11953_s1 + $0x34] sm:$0xf] }
 0x103   : > { %10099 = vmatpush1.msk.msra.mxu0 %vm358_vm1, %v3290_v27  ;;  %v3607_v28 = vpop.permute.xlu1 %3606  ;;  %10437 = vmatprep.mubr.msk.f32.mxu1 %vm10756_vm3, %v10746_v0 }
 0x104   : > { %5937 = vrot.lane.b32.xlu1 %v10839_v1, %s10764_s30  ;;  %v3605_v29 = vpop.permute.xlu0 %3604  ;;  %10100 = vmatmul.mubr.msk.f32.vlgmr.msra.gmra.mrb[2].mxu0 %vm354_vm2, %v10091_v17 }
 0x105   : > { %5935 = vrot.lane.b32.xlu0 %v10855_v5, %s10764_s30  ;;  %v3620_v30 = vsel %vm3618_vm12, %v3605_v29, %v3607_v28  ;;  %10438 = vmatmul.mubr.msk.f32.vlgmr.msra.gmra.mrb[20].mxu1 %vm354_vm2, %v10091_v17 }
 0x106   : > { %10104 = vmatprep.subr.msk.mxu0 %vm358_vm1, %v3620_v30  ;;  %3778 = vmatprep.mubr.f32.mxu1 %v10746_v0 }
 0x107   : > { %v3609_v31 = vpop.permute.xlu1 %3608  ;;  %3707 = vmatprep.mubr.f32.mxu0 %v10746_v0 }
 0x108   : > { %5939 = vrot.lane.b32.xlu1 %v10848_v3, %s10764_s30  ;;  %v3603_v32 = vpop.permute.xlu0 %3602  ;;  %v3621_v38 = vsel %vm3618_vm12, %v3607_v28, %v3609_v31 }
 0x109   : > { %5933 = vrot.lane.b32.xlu0 %v10842_v2, %s10764_s30  ;;  %v3619_v34 = vsel %vm3618_vm12, %v3603_v32, %v3605_v29 }
 0x10a   : > { %10105 = vmatpush1.msk.msra.mxu0 %vm358_vm1, %v3619_v34 }
 0x10b   : > { %10106 = vmatmul.mubr.msk.f32.vlgmr.msra.gmra.mrb[0].mxu0 %vm354_vm2, %v10103_v33 }
 0x10c   : > { %5943 = vrot.lane.b32.xlu1 %v10861_v6, %s10764_s30  ;;  %3849 = vmatprep.mubr.f32.mxu0 %v10746_v0 }
 0x10d   : > { %5941 = vrot.lane.b32.xlu0 %v10851_v4, %s10764_s30  ;;  %v3613_v35 = vpop.permute.xlu1 %3612 }
 0x10e   : > { %v3611_v36 = vpop.permute.xlu0 %3610 }
 0x10f   : > { %v3622_v37 = vsel %vm3618_vm12, %v3609_v31, %v3611_v36  ;;  %v3623_v42 = vsel %vm3618_vm12, %v3611_v36, %v3613_v35 }
 0x110   : > { %5947 = vrot.lane.b32.xlu1 %v10931_v15, %s10764_s30  ;;  %10107 = vmatprep.subr.msk.mxu1 %vm358_vm1, %v3622_v37 }
 0x111   : > { %5945 = vrot.lane.b32.xlu0 %v10866_v7, %s10764_s30  ;;  %10108 = vmatpush1.msk.msra.mxu1 %vm358_vm1, %v3621_v38  ;;  %s318_s30 = scalar_lea.vmem %s11960_s8, %s10691_s22 }
 0x112   : > { %v3617_v2 = vpop.permute.xlu1 %3616  ;;  %v3615_v39 = vpop.permute.xlu0 %3614  ;;  %10440 = vmatprep.subr.mxu1 %v10746_v0  ;;  %10109 = vmatmul.mubr.msk.f32.vlgmr.msra.gmra.mrb[0].mxu1 %vm354_vm2, %v10103_v33 }
 0x113   : > { %v3625_v40 = vsel %vm3618_vm12, %v3615_v39, %v3617_v2  ;;  %v3624_v41 = vsel %vm3618_vm12, %v3613_v35, %v3615_v39  ;;  %10442 = vmatprep.mubr.msk.f32.mxu1 %vm10756_vm3, %v10746_v0  ;;  %vm7930_vm12 = vcmask 359424  }
 0x114   : > { %6270 = vrot.lane.b32.xlu1 %v10848_v3, %s10765_s12  ;;  %10110 = vmatprep.subr.msk.mxu0 %vm358_vm1, %v3624_v41  ;;  %v10151_v41 = vld [vmem:[%s11953_s1 + $0x38] sm:$0xf] }
 0x115   : > { %6268 = vrot.lane.b32.xlu0 %v10839_v1, %s10765_s12  ;;  %10441 = vmatpush3.msk.msra.mxu1 %vm358_vm1, %v3625_v40 }
 0x116   : > { %10111 = vmatpush1.msk.msra.mxu0 %vm358_vm1, %v3623_v42  ;;  %v3940_v43 = vpop.permute.xlu1 %3939  ;;  %10443 = vmatmul.mubr.msk.f32.vlgmr.msra.gmra.mrb[22].mxu1 %vm354_vm2, %v10103_v33 }
 0x117   : > { %v3938_v44 = vpop.permute.xlu0 %3937  ;;  %10112 = vmatmul.mubr.msk.f32.vlgmr.msra.gmra.mrb[2].mxu0 %vm354_vm2, %v10103_v33  ;;  %4111 = vmatprep.mubr.f32.mxu1 %v10746_v0 }
 0x118   : > { %6272 = vrot.lane.b32.xlu1 %v10851_v4, %s10765_s12  ;;  %v3953_v45 = vsel %vm3951_vm13, %v3938_v44, %v3940_v43  ;;  %4040 = vmatprep.mubr.f32.mxu0 %v10746_v0 }
 0x119   : > { %6266 = vrot.lane.b32.xlu0 %v10855_v5, %s10765_s12  ;;  %10116 = vmatprep.subr.msk.mxu0 %vm358_vm1, %v3953_v45 }
 0x11a   : > { %v3942_v46 = vpop.permute.xlu1 %3941 }
 0x11b   : > { %v3936_v47 = vpop.permute.xlu0 %3935  ;;  %v3954_v52 = vsel %vm3951_vm13, %v3940_v43, %v3942_v46 }
 0x11c   : > { %v3952_v49 = vsel %vm3951_vm13, %v3936_v47, %v3938_v44  ;;  %6276 = vrot.lane.b32.xlu1 %v10866_v7, %s10765_s12 }
 0x11d   : > { %6274 = vrot.lane.b32.xlu0 %v10861_v6, %s10765_s12  ;;  %10117 = vmatpush1.msk.msra.mxu0 %vm358_vm1, %v3952_v49 }
 0x11e   : > { %v3946_v4 = vpop.permute.xlu1 %3945  ;;  %10118 = vmatmul.mubr.msk.f32.vlgmr.msra.gmra.mrb[0].mxu0 %vm354_vm2, %v10115_v48 }
 0x11f   : > { %v3944_v50 = vpop.permute.xlu0 %3943  ;;  %4182 = vmatprep.mubr.f32.mxu0 %v10746_v0 }
 0x120   : > { %6598 = vrot.lane.b32.xlu1 %v10839_v1, %s10766_s15  ;;  %v3955_v51 = vsel %vm3951_vm13, %v3942_v46, %v3944_v50  ;;  %v3956_v55 = vsel %vm3951_vm13, %v3944_v50, %v3946_v4 }
 0x121   : > { %6278 = vrot.lane.b32.xlu0 %v10931_v15, %s10765_s12  ;;  %10119 = vmatprep.subr.msk.mxu1 %vm358_vm1, %v3955_v51 }
 0x122   : > { %10120 = vmatpush1.msk.msra.mxu1 %vm358_vm1, %v3954_v52  ;;  %v3950_v7 = vpop.permute.xlu1 %3949 }
 0x123   : > { %v3948_v53 = vpop.permute.xlu0 %3947  ;;  %10445 = vmatprep.subr.mxu1 %v10746_v0  ;;  %10121 = vmatmul.mubr.msk.f32.vlgmr.msra.gmra.mrb[0].mxu1 %vm354_vm2, %v10115_v48 }
 0x124   : > { %v3958_v54 = vsel %vm3951_vm13, %v3948_v53, %v3950_v7  ;;  %6596 = vrot.lane.b32.xlu1 %v10855_v5, %s10766_s15  ;;  %v3957_v1 = vsel %vm3951_vm13, %v3946_v4, %v3948_v53  ;;  %10447 = vmatprep.mubr.msk.f32.mxu1 %vm10756_vm3, %v10746_v0  ;;  %vm8260_vm13 = vcmask 293888  }
 0x125   : > { %6600 = vrot.lane.b32.xlu0 %v10848_v3, %s10766_s15  ;;  %10122 = vmatprep.subr.msk.mxu0 %vm358_vm1, %v3957_v1  ;;  %v10163_v1 = vld [vmem:[%s11953_s1 + $0x3c] sm:$0xf] }
 0x126   : > { %10446 = vmatpush3.msk.msra.mxu1 %vm358_vm1, %v3958_v54  ;;  %10123 = vmatpush1.msk.msra.mxu0 %vm358_vm1, %v3956_v55  ;;  %v4273_v56 = vpop.permute.xlu1 %4272 }
 0x127   : > { %v4271_v57 = vpop.permute.xlu0 %4270  ;;  %10124 = vmatmul.mubr.msk.f32.vlgmr.msra.gmra.mrb[2].mxu0 %vm354_vm2, %v10115_v48  ;;  %10448 = vmatmul.mubr.msk.f32.vlgmr.msra.gmra.mrb[24].mxu1 %vm354_vm2, %v10115_v48 }
 0x128   : > { %6604 = vrot.lane.b32.xlu1 %v10861_v6, %s10766_s15  ;;  %v4286_v58 = vsel %vm4284_vm14, %v4271_v57, %v4273_v56  ;;  %4444 = vmatprep.mubr.f32.mxu1 %v10746_v0 }
 0x129   : > { %6602 = vrot.lane.b32.xlu0 %v11381_v59, %s10766_s15  ;;  %10128 = vmatprep.subr.msk.mxu0 %vm358_vm1, %v4286_v58 }
 0x12a   : > { %v4275_v60 = vpop.permute.xlu1 %4274  ;;  %4373 = vmatprep.mubr.f32.mxu0 %v10746_v0 }
 0x12b   : > { %v4269_v61 = vpop.permute.xlu0 %4268  ;;  %v4287_v12 = vsel %vm4284_vm14, %v4273_v56, %v4275_v60 }
 0x12c   : > { %v4285_v63 = vsel %vm4284_vm14, %v4269_v61, %v4271_v57  ;;  %6608 = vrot.lane.b32.xlu1 %v10931_v15, %s10766_s15 }
 0x12d   : > { %6606 = vrot.lane.b32.xlu0 %v11394_v8, %s10766_s15  ;;  %10129 = vmatpush1.msk.msra.mxu0 %vm358_vm1, %v4285_v63 }
 0x12e   : > { %v4279_v9 = vpop.permute.xlu1 %4278  ;;  %10130 = vmatmul.mubr.msk.f32.vlgmr.msra.gmra.mrb[0].mxu0 %vm354_vm2, %v10127_v62 }
 0x12f   : > { %v4277_v10 = vpop.permute.xlu0 %4276  ;;  %4515 = vmatprep.mubr.f32.mxu0 %v10746_v0 }
 0x130   : > { %6930 = vrot.lane.b32.xlu1 %v10848_v3, %s10767_s18  ;;  %v4288_v11 = vsel %vm4284_vm14, %v4275_v60, %v4277_v10  ;;  %v4289_v19 = vsel %vm4284_vm14, %v4277_v10, %v4279_v9 }
 0x131   : > { %6928 = vrot.lane.b32.xlu0 %v11406_v13, %s10767_s18  ;;  %10131 = vmatprep.subr.msk.mxu1 %vm358_vm1, %v4288_v11 }
 0x132   : > { %10132 = vmatpush1.msk.msra.mxu1 %vm358_vm1, %v4287_v12  ;;  %v4283_v14 = vpop.permute.xlu1 %4282 }
 0x133   : > { %v4281_v16 = vpop.permute.xlu0 %4280  ;;  %10450 = vmatprep.subr.mxu1 %v10746_v0  ;;  %10133 = vmatmul.mubr.msk.f32.vlgmr.msra.gmra.mrb[0].mxu1 %vm354_vm2, %v10127_v62 }
 0x134   : > { %v4291_v17 = vsel %vm4284_vm14, %v4281_v16, %v4283_v14  ;;  %6932 = vrot.lane.b32.xlu1 %v11381_v59, %s10767_s18  ;;  %v4290_v18 = vsel %vm4284_vm14, %v4279_v9, %v4281_v16  ;;  %10452 = vmatprep.mubr.msk.f32.mxu1 %vm10756_vm3, %v10746_v0  ;;  %vm8590_vm14 = vcmask 285696  }
 0x135   : > { %6926 = vrot.lane.b32.xlu0 %v10855_v5, %s10767_s18  ;;  %10134 = vmatprep.subr.msk.mxu0 %vm358_vm1, %v4290_v18  ;;  %v10175_v18 = vld [vmem:[%s11953_s1 + $0x40] sm:$0xf] }
 0x136   : > { %10451 = vmatpush3.msk.msra.mxu1 %vm358_vm1, %v4291_v17  ;;  %10135 = vmatpush1.msk.msra.mxu0 %vm358_vm1, %v4289_v19  ;;  %v4606_v20 = vpop.permute.xlu1 %4605 }
 0x137   : > { %v4604_v21 = vpop.permute.xlu0 %4603  ;;  %10136 = vmatmul.mubr.msk.f32.vlgmr.msra.gmra.mrb[2].mxu0 %vm354_vm2, %v10127_v62  ;;  %10453 = vmatmul.mubr.msk.f32.vlgmr.msra.gmra.mrb[26].mxu1 %vm354_vm2, %v10127_v62 }
 0x138   : > { %6936 = vrot.lane.b32.xlu1 %v11394_v8, %s10767_s18  ;;  %v4619_v22 = vsel %vm4617_vm15, %v4604_v21, %v4606_v20  ;;  %4777 = vmatprep.mubr.f32.mxu1 %v10746_v0 }
 0x139   : > { %6934 = vrot.lane.b32.xlu0 %v10861_v6, %s10767_s18  ;;  %10140 = vmatprep.subr.msk.mxu0 %vm358_vm1, %v4619_v22 }
 0x13a   : > { %v4608_v23 = vpop.permute.xlu1 %4607  ;;  %4706 = vmatprep.mubr.f32.mxu0 %v10746_v0 }
 0x13b   : > { %v4602_v24 = vpop.permute.xlu0 %4601  ;;  %v4620_v30 = vsel %vm4617_vm15, %v4606_v20, %v4608_v23 }
 0x13c   : > { %v4618_v26 = vsel %vm4617_vm15, %v4602_v24, %v4604_v21  ;;  %7258 = vrot.lane.b32.xlu1 %v11406_v13, %s10768_s20 }
 0x13d   : > { %6938 = vrot.lane.b32.xlu0 %v10931_v15, %s10767_s18  ;;  %10141 = vmatpush1.msk.msra.mxu0 %vm358_vm1, %v4618_v26 }
 0x13e   : > { %v4612_v27 = vpop.permute.xlu1 %4611  ;;  %10142 = vmatmul.mubr.msk.f32.vlgmr.msra.gmra.mrb[0].mxu0 %vm354_vm2, %v10139_v25 }
 0x13f   : > { %v4610_v28 = vpop.permute.xlu0 %4609  ;;  %4848 = vmatprep.mubr.f32.mxu0 %v10746_v0 }
 0x140   : > { %7256 = vrot.lane.b32.xlu1 %v10855_v5, %s10768_s20  ;;  %v4621_v29 = vsel %vm4617_vm15, %v4608_v23, %v4610_v28  ;;  %v4622_v35 = vsel %vm4617_vm15, %v4610_v28, %v4612_v27 }
 0x141   : > { %7260 = vrot.lane.b32.xlu0 %v10848_v3, %s10768_s20  ;;  %10143 = vmatprep.subr.msk.mxu1 %vm358_vm1, %v4621_v29 }
 0x142   : > { %10144 = vmatpush1.msk.msra.mxu1 %vm358_vm1, %v4620_v30  ;;  %v4616_v31 = vpop.permute.xlu1 %4615 }
 0x143   : > { %v4614_v32 = vpop.permute.xlu0 %4613  ;;  %10455 = vmatprep.subr.mxu1 %v10746_v0  ;;  %10145 = vmatmul.mubr.msk.f32.vlgmr.msra.gmra.mrb[0].mxu1 %vm354_vm2, %v10139_v25 }
 0x144   : > { %v4624_v33 = vsel %vm4617_vm15, %v4614_v32, %v4616_v31  ;;  %7264 = vrot.lane.b32.xlu1 %v10861_v6, %s10768_s20  ;;  %v4623_v34 = vsel %vm4617_vm15, %v4612_v27, %v4614_v32  ;;  %10457 = vmatprep.mubr.msk.f32.mxu1 %vm10756_vm3, %v10746_v0  ;;  %vm8920_vm15 = vcmask 277504  }
 0x145   : > { %7262 = vrot.lane.b32.xlu0 %v11381_v59, %s10768_s20  ;;  %10146 = vmatprep.subr.msk.mxu0 %vm358_vm1, %v4623_v34  ;;  %v10187_v34 = vld [vmem:[%s11953_s1 + $0x44] sm:$0xf] }
 0x146   : > { %10456 = vmatpush3.msk.msra.mxu1 %vm358_vm1, %v4624_v33  ;;  %10147 = vmatpush1.msk.msra.mxu0 %vm358_vm1, %v4622_v35  ;;  %v4939_v36 = vpop.permute.xlu1 %4938 }
 0x147   : > { %v4937_v37 = vpop.permute.xlu0 %4936  ;;  %10148 = vmatmul.mubr.msk.f32.vlgmr.msra.gmra.mrb[2].mxu0 %vm354_vm2, %v10139_v25  ;;  %10458 = vmatmul.mubr.msk.f32.vlgmr.msra.gmra.mrb[28].mxu1 %vm354_vm2, %v10139_v25 }
 0x148   : > { %v4952_v38 = vsel %vm4950_vm0, %v4937_v37, %v4939_v36  ;;  %7268 = vrot.lane.b32.xlu1 %v10931_v15, %s10768_s20  ;;  %5110 = vmatprep.mubr.f32.mxu1 %v10746_v0 }
 0x149   : > { %7266 = vrot.lane.b32.xlu0 %v11394_v8, %s10768_s20  ;;  %10152 = vmatprep.subr.msk.mxu0 %vm358_vm1, %v4952_v38 }
 0x14a   : > { %v4941_v2 = vpop.permute.xlu1 %4940  ;;  %5039 = vmatprep.mubr.f32.mxu0 %v10746_v0 }
 0x14b   : > { %v4935_v39 = vpop.permute.xlu0 %4934  ;;  %v4953_v45 = vsel %vm4950_vm0, %v4939_v36, %v4941_v2 }
 0x14c   : > { %v4951_v40 = vsel %vm4950_vm0, %v4935_v39, %v4937_v37  ;;  %7590 = vrot.lane.b32.xlu1 %v10848_v3, %s10769_s21 }
 0x14d   : > { %7588 = vrot.lane.b32.xlu0 %v11406_v13, %s10769_s21  ;;  %10153 = vmatpush1.msk.msra.mxu0 %vm358_vm1, %v4951_v40 }
 0x14e   : > { %v4945_v42 = vpop.permute.xlu1 %4944  ;;  %10154 = vmatmul.mubr.msk.f32.vlgmr.msra.gmra.mrb[0].mxu0 %vm354_vm2, %v10151_v41 }
 0x14f   : > { %v4943_v43 = vpop.permute.xlu0 %4942  ;;  %5181 = vmatprep.mubr.f32.mxu0 %v10746_v0 }
 0x150   : > { %v4954_v44 = vsel %vm4950_vm0, %v4941_v2, %v4943_v43  ;;  %7592 = vrot.lane.b32.xlu1 %v11381_v59, %s10769_s21  ;;  %v4955_v4 = vsel %vm4950_vm0, %v4943_v43, %v4945_v42 }
 0x151   : > { %7586 = vrot.lane.b32.xlu0 %v10855_v5, %s10769_s21  ;;  %10155 = vmatprep.subr.msk.mxu1 %vm358_vm1, %v4954_v44 }
 0x152   : > { %10156 = vmatpush1.msk.msra.mxu1 %vm358_vm1, %v4953_v45  ;;  %v4949_v46 = vpop.permute.xlu1 %4948 }
 0x153   : > { %10157 = vmatmul.mubr.msk.f32.vlgmr.msra.gmra.mrb[0].mxu1 %vm354_vm2, %v10151_v41  ;;  %v4947_v47 = vpop.permute.xlu0 %4946  ;;  %10460 = vmatprep.subr.mxu1 %v10746_v0 }
 0x154   : > { %v4956_v48 = vsel %vm4950_vm0, %v4945_v42, %v4947_v47  ;;  %v4957_v49 = vsel %vm4950_vm0, %v4947_v47, %v4949_v46  ;;  %7596 = vrot.lane.b32.xlu1 %v11394_v8, %s10769_s21  ;;  %10462 = vmatprep.mubr.msk.f32.mxu1 %vm10756_vm3, %v10746_v0 }
 0x155   : > { %7594 = vrot.lane.b32.xlu0 %v10861_v6, %s10769_s21  ;;  %10158 = vmatprep.subr.msk.mxu0 %vm358_vm1, %v4956_v48 }
 0x156   : > { %10461 = vmatpush3.msk.msra.mxu1 %vm358_vm1, %v4957_v49  ;;  %10159 = vmatpush1.msk.msra.mxu0 %vm358_vm1, %v4955_v4  ;;  %v5272_v50 = vpop.permute.xlu1 %5271 }
 0x157   : > { %10463 = vmatmul.mubr.msk.f32.vlgmr.msra.gmra.mrb[30].mxu1 %vm354_vm2, %v10151_v41  ;;  %v5270_v51 = vpop.permute.xlu0 %5269  ;;  %10160 = vmatmul.mubr.msk.f32.vlgmr.msra.gmra.mrb[2].mxu0 %vm354_vm2, %v10151_v41 }
 0x158   : > { %v5285_v52 = vsel %vm5283_vm4, %v5270_v51, %v5272_v50  ;;  %7918 = vrot.lane.b32.xlu1 %v11406_v13, %s10770_s24  ;;  %5443 = vmatprep.mubr.f32.mxu1 %v10746_v0 }
 0x159   : > { %7598 = vrot.lane.b32.xlu0 %v10931_v15, %s10769_s21  ;;  %10164 = vmatprep.subr.msk.mxu0 %vm358_vm1, %v5285_v52 }
 0x15a   : > { %v5274_v7 = vpop.permute.xlu1 %5273  ;;  %5372 = vmatprep.mubr.f32.mxu0 %v10746_v0 }
 0x15b   : > { %v5268_v53 = vpop.permute.xlu0 %5267  ;;  %v5286_v58 = vsel %vm5283_vm4, %v5272_v50, %v5274_v7 }
 0x15c   : > { %v5284_v54 = vsel %vm5283_vm4, %v5268_v53, %v5270_v51  ;;  %7916 = vrot.lane.b32.xlu1 %v10855_v5, %s10770_s24 }
 0x15d   : > { %7920 = vrot.lane.b32.xlu0 %v10848_v3, %s10770_s24  ;;  %10165 = vmatpush1.msk.msra.mxu0 %vm358_vm1, %v5284_v54 }
 0x15e   : > { %v5278_v55 = vpop.permute.xlu1 %5277  ;;  %10166 = vmatmul.mubr.msk.f32.vlgmr.msra.gmra.mrb[0].mxu0 %vm354_vm2, %v10163_v1 }
 0x15f   : > { %v5276_v56 = vpop.permute.xlu0 %5275  ;;  %5514 = vmatprep.mubr.f32.mxu0 %v10746_v0 }
 0x160   : > { %v5287_v57 = vsel %vm5283_vm4, %v5274_v7, %v5276_v56  ;;  %7924 = vrot.lane.b32.xlu1 %v10861_v6, %s10770_s24  ;;  %v5288_v9 = vsel %vm5283_vm4, %v5276_v56, %v5278_v55 }
 0x161   : > { %7922 = vrot.lane.b32.xlu0 %v11381_v59, %s10770_s24  ;;  %10167 = vmatprep.subr.msk.mxu1 %vm358_vm1, %v5287_v57 }
 0x162   : > { %10168 = vmatpush1.msk.msra.mxu1 %vm358_vm1, %v5286_v58  ;;  %v5282_v60 = vpop.permute.xlu1 %5281 }
 0x163   : > { %10169 = vmatmul.mubr.msk.f32.vlgmr.msra.gmra.mrb[0].mxu1 %vm354_vm2, %v10163_v1  ;;  %v5280_v61 = vpop.permute.xlu0 %5279  ;;  %10465 = vmatprep.subr.mxu1 %v10746_v0 }
 0x164   : > { %v5289_v62 = vsel %vm5283_vm4, %v5278_v55, %v5280_v61  ;;  %v5290_v63 = vsel %vm5283_vm4, %v5280_v61, %v5282_v60  ;;  %7928 = vrot.lane.b32.xlu1 %v10931_v15, %s10770_s24  ;;  %10467 = vmatprep.mubr.msk.f32.mxu1 %vm10756_vm3, %v10746_v0 }
 0x165   : > { %7926 = vrot.lane.b32.xlu0 %v11394_v8, %s10770_s24  ;;  %10170 = vmatprep.subr.msk.mxu0 %vm358_vm1, %v5289_v62 }
 0x166   : > { %10466 = vmatpush3.msk.msra.mxu1 %vm358_vm1, %v5290_v63  ;;  %10171 = vmatpush1.msk.msra.mxu0 %vm358_vm1, %v5288_v9  ;;  %v5605_v10 = vpop.permute.xlu1 %5604 }
 0x167   : > { %10468 = vmatmul.mubr.msk.f32.vlgmr.msra.gmra.mrb[32].mxu1 %vm354_vm2, %v10163_v1  ;;  %v5603_v11 = vpop.permute.xlu0 %5602  ;;  %10172 = vmatmul.mubr.msk.f32.vlgmr.msra.gmra.mrb[2].mxu0 %vm354_vm2, %v10163_v1 }
 0x168   : > { %v5618_v12 = vsel %vm5616_vm5, %v5603_v11, %v5605_v10  ;;  %8250 = vrot.lane.b32.xlu1 %v10848_v3, %s10771_s29  ;;  %5776 = vmatprep.mubr.f32.mxu1 %v10746_v0 }
 0x169   : > { %8248 = vrot.lane.b32.xlu0 %v11406_v13, %s10771_s29  ;;  %10176 = vmatprep.subr.msk.mxu0 %vm358_vm1, %v5618_v12 }
 0x16a   : > { %v5607_v14 = vpop.permute.xlu1 %5606  ;;  %5705 = vmatprep.mubr.f32.mxu0 %v10746_v0 }
 0x16b   : > { %v5601_v16 = vpop.permute.xlu0 %5600  ;;  %v5619_v22 = vsel %vm5616_vm5, %v5605_v10, %v5607_v14 }
 0x16c   : > { %v5617_v17 = vsel %vm5616_vm5, %v5601_v16, %v5603_v11  ;;  %8252 = vrot.lane.b32.xlu1 %v11381_v59, %s10771_s29 }
 0x16d   : > { %8246 = vrot.lane.b32.xlu0 %v10855_v5, %s10771_s29  ;;  %10177 = vmatpush1.msk.msra.mxu0 %vm358_vm1, %v5617_v17 }
 0x16e   : > { %v5611_v19 = vpop.permute.xlu1 %5610  ;;  %10178 = vmatmul.mubr.msk.f32.vlgmr.msra.gmra.mrb[0].mxu0 %vm354_vm2, %v10175_v18 }
 0x16f   : > { %v5609_v20 = vpop.permute.xlu0 %5608  ;;  %5847 = vmatprep.mubr.f32.mxu0 %v10746_v0 }
 0x170   : > { %v5620_v21 = vsel %vm5616_vm5, %v5607_v14, %v5609_v20  ;;  %8256 = vrot.lane.b32.xlu1 %v11394_v8, %s10771_s29  ;;  %v5621_v27 = vsel %vm5616_vm5, %v5609_v20, %v5611_v19  ;;  %v10211_v14 = vld [vmem:[%s11953_s1 + $0x4c] sm:$0xf] }
 0x171   : > { %8254 = vrot.lane.b32.xlu0 %v10861_v6, %s10771_s29  ;;  %10179 = vmatprep.subr.msk.mxu1 %vm358_vm1, %v5620_v21 }
 0x172   : > { %10180 = vmatpush1.msk.msra.mxu1 %vm358_vm1, %v5619_v22  ;;  %v5615_v23 = vpop.permute.xlu1 %5614 }
 0x173   : > { %10181 = vmatmul.mubr.msk.f32.vlgmr.msra.gmra.mrb[0].mxu1 %vm354_vm2, %v10175_v18  ;;  %v5613_v24 = vpop.permute.xlu0 %5612  ;;  %10470 = vmatprep.subr.mxu1 %v10746_v0 }
 0x174   : > { %v5622_v25 = vsel %vm5616_vm5, %v5611_v19, %v5613_v24  ;;  %v5623_v26 = vsel %vm5616_vm5, %v5613_v24, %v5615_v23  ;;  %8578 = vrot.lane.b32.xlu1 %v11406_v13, %s10772_s11  ;;  %10472 = vmatprep.mubr.msk.f32.mxu1 %vm10756_vm3, %v10746_v0 }
 0x175   : > { %8258 = vrot.lane.b32.xlu0 %v10931_v15, %s10771_s29  ;;  %10182 = vmatprep.subr.msk.mxu0 %vm358_vm1, %v5622_v25 }
 0x176   : > { %10471 = vmatpush3.msk.msra.mxu1 %vm358_vm1, %v5623_v26  ;;  %10183 = vmatpush1.msk.msra.mxu0 %vm358_vm1, %v5621_v27  ;;  %v5938_v28 = vpop.permute.xlu1 %5937 }
 0x177   : > { %10473 = vmatmul.mubr.msk.f32.vlgmr.msra.gmra.mrb[34].mxu1 %vm354_vm2, %v10175_v18  ;;  %v5936_v29 = vpop.permute.xlu0 %5935  ;;  %10184 = vmatmul.mubr.msk.f32.vlgmr.msra.gmra.mrb[2].mxu0 %vm354_vm2, %v10175_v18 }
 0x178   : > { %v5951_v30 = vsel %vm5949_vm6, %v5936_v29, %v5938_v28  ;;  %8576 = vrot.lane.b32.xlu1 %v10855_v5, %s10772_s11  ;;  %6109 = vmatprep.mubr.f32.mxu1 %v10746_v0 }
 0x179   : > { %8580 = vrot.lane.b32.xlu0 %v10848_v3, %s10772_s11  ;;  %10188 = vmatprep.subr.msk.mxu0 %vm358_vm1, %v5951_v30 }
 0x17a   : > { %v5940_v31 = vpop.permute.xlu1 %5939  ;;  %6038 = vmatprep.mubr.f32.mxu0 %v10746_v0 }
 0x17b   : > { %v5934_v32 = vpop.permute.xlu0 %5933  ;;  %v5952_v38 = vsel %vm5949_vm6, %v5938_v28, %v5940_v31 }
 0x17c   : > { %v5950_v33 = vsel %vm5949_vm6, %v5934_v32, %v5936_v29  ;;  %8584 = vrot.lane.b32.xlu1 %v10861_v6, %s10772_s11  ;;  %v10223_v32 = vld [vmem:[%s11953_s1 + $0x50] sm:$0xf] }
 0x17d   : > { %8582 = vrot.lane.b32.xlu0 %v11381_v59, %s10772_s11  ;;  %10189 = vmatpush1.msk.msra.mxu0 %vm358_vm1, %v5950_v33 }
 0x17e   : > { %v5944_v35 = vpop.permute.xlu1 %5943  ;;  %10190 = vmatmul.mubr.msk.f32.vlgmr.msra.gmra.mrb[0].mxu0 %vm354_vm2, %v10187_v34 }
 0x17f   : > { %v5942_v36 = vpop.permute.xlu0 %5941  ;;  %6180 = vmatprep.mubr.f32.mxu0 %v10746_v0 }
 0x180   : > { %v5953_v37 = vsel %vm5949_vm6, %v5940_v31, %v5942_v36  ;;  %8588 = vrot.lane.b32.xlu1 %v10931_v15, %s10772_s11  ;;  %v5954_v42 = vsel %vm5949_vm6, %v5942_v36, %v5944_v35 }
 0x181   : > { %8586 = vrot.lane.b32.xlu0 %v11394_v8, %s10772_s11  ;;  %10191 = vmatprep.subr.msk.mxu1 %vm358_vm1, %v5953_v37 }
 0x182   : > { %10192 = vmatpush1.msk.msra.mxu1 %vm358_vm1, %v5952_v38  ;;  %v5948_v2 = vpop.permute.xlu1 %5947 }
 0x183   : > { %10193 = vmatmul.mubr.msk.f32.vlgmr.msra.gmra.mrb[0].mxu1 %vm354_vm2, %v10187_v34  ;;  %v5946_v39 = vpop.permute.xlu0 %5945  ;;  %10475 = vmatprep.subr.mxu1 %v10746_v0 }
 0x184   : > { %v5955_v40 = vsel %vm5949_vm6, %v5944_v35, %v5946_v39  ;;  %v5956_v41 = vsel %vm5949_vm6, %v5946_v39, %v5948_v2  ;;  %8910 = vrot.lane.b32.xlu1 %v10848_v3, %s10773_s14  ;;  %10477 = vmatprep.mubr.msk.f32.mxu1 %vm10756_vm3, %v10746_v0  ;;  %v652_v3 = vpop.f32.mrb[2].mxu1 }
 0x185   : > { %8908 = vrot.lane.b32.xlu0 %v11406_v13, %s10773_s14  ;;  %10194 = vmatprep.subr.msk.mxu0 %vm358_vm1, %v5955_v40  ;;  %v10394_v13 = vpop.f32.mrb[3].mxu1 }
 0x186   : > { %10476 = vmatpush3.msk.msra.mxu1 %vm358_vm1, %v5956_v41  ;;  %10195 = vmatpush1.msk.msra.mxu0 %vm358_vm1, %v5954_v42  ;;  %v6271_v43 = vpop.permute.xlu1 %6270  ;;  %v952_v46 = vpop.f32.mrb[4].mxu1 }
 0x187   : > { %10478 = vmatmul.mubr.msk.f32.vlgmr.msra.gmra.mrb[36].mxu1 %vm354_vm2, %v10187_v34  ;;  %v6269_v44 = vpop.permute.xlu0 %6268  ;;  %10196 = vmatmul.mubr.msk.f32.vlgmr.msra.gmra.mrb[2].mxu0 %vm354_vm2, %v10187_v34  ;;  %v953_v48 = vadd.f32 %v952_v46, %v652_v3  ;;  %v10399_v49 = vpop.f32.mrb[5].mxu1  ;;  %v10235_v46 = vld [vmem:[%s11953_s1 + $0x54] sm:$0xf] }
 0x188   : > { %v6282_v45 = vsel %vm6280_vm7, %v6269_v44, %v6271_v43  ;;  %8912 = vrot.lane.b32.xlu1 %v11381_v59, %s10773_s14  ;;  %6439 = vmatprep.mubr.f32.mxu1 %v10746_v0  ;;  %v1275_v50 = vpop.f32.mrb[6].mxu1 }
 0x189   : > { %8906 = vrot.lane.b32.xlu0 %v10855_v5, %s10773_s14  ;;  %10200 = vmatprep.subr.msk.mxu0 %vm358_vm1, %v6282_v45  ;;  %v1285_v59 = vadd.f32 %v1275_v50, %v953_v48  ;;  %v10404_v52 = vpop.f32.mrb[7].mxu1  ;;  %v10199_v5 = vld [vmem:[%s11953_s1 + $0x48] sm:$0xf] }
 0x18a   : > { %v6273_v47 = vpop.permute.xlu1 %6272  ;;  %6368 = vmatprep.mubr.f32.mxu0 %v10746_v0  ;;  %v1605_v7 = vpop.f32.mrb[8].mxu1 }
 0x18b   : > { %v6267_v4 = vpop.permute.xlu0 %6266  ;;  %v1615_v54 = vadd.f32 %v1605_v7, %v1285_v59  ;;  %v10409_v1 = vpop.f32.mrb[9].mxu1  ;;  %v6283_v56 = vsel %vm6280_vm7, %v6271_v43, %v6273_v47 }
 0x18c   : > { %v6281_v51 = vsel %vm6280_vm7, %v6267_v4, %v6269_v44  ;;  %8916 = vrot.lane.b32.xlu1 %v11394_v8, %s10773_s14 }
 0x18d   : > { %8914 = vrot.lane.b32.xlu0 %v10861_v6, %s10773_s14  ;;  %10201 = vmatpush1.msk.msra.mxu0 %vm358_vm1, %v6281_v51 }
 0x18e   : > { %v6277_v53 = vpop.permute.xlu1 %6276  ;;  %10202 = vmatmul.mubr.msk.f32.vlgmr.msra.gmra.mrb[0].mxu0 %vm354_vm2, %v10199_v5 }
 0x18f   : > { %v6275_v55 = vpop.permute.xlu0 %6274  ;;  %6510 = vmatprep.mubr.f32.mxu0 %v10746_v0 }
 0x190   : > { %v6284_v8 = vsel %vm6280_vm7, %v6273_v47, %v6275_v55 }
 0x191   : > { %8918 = vrot.lane.b32.xlu0 %v10931_v15, %s10773_s14  ;;  %10203 = vmatprep.subr.msk.mxu1 %vm358_vm1, %v6284_v8  ;;  %v1935_v6 = vpop.f32.mrb[10].mxu1  ;;  %v6285_v15 = vsel %vm6280_vm7, %v6275_v55, %v6277_v53 }
 0x192   : > { %10204 = vmatpush1.msk.msra.mxu1 %vm358_vm1, %v6283_v56  ;;  %v6599_v57 = vpop.permute.xlu1 %6598  ;;  %v1945_v58 = vadd.f32 %v1935_v6, %v1615_v54  ;;  %v10414_v60 = vpop.f32.mrb[11].mxu1  ;;  %v10247_v6 = vld [vmem:[%s11953_s1 + $0x58] sm:$0xf] }
 0x193   : > { %10205 = vmatmul.mubr.msk.f32.vlgmr.msra.gmra.mrb[0].mxu1 %vm354_vm2, %v10199_v5  ;;  %10480 = vmatprep.subr.mxu1 %v10746_v0  ;;  %v6279_v61 = vpop.permute.xlu0 %6278 }
 0x194   : > { %v6286_v62 = vsel %vm6280_vm7, %v6277_v53, %v6279_v61  ;;  %10481 = vmatpush3.msk.msra.mxu1 %vm358_vm1, %v6279_v61  ;;  %10482 = vmatprep.mubr.msk.f32.mxu1 %vm10756_vm3, %v10746_v0 }
 0x195   : > { %10206 = vmatprep.subr.msk.mxu0 %vm358_vm1, %v6286_v62 }
 0x196   : > { %10207 = vmatpush1.msk.msra.mxu0 %vm358_vm1, %v6285_v15  ;;  %v6597_v63 = vpop.permute.xlu1 %6596 }
 0x197   : > { %v6611_v9 = vsel %vm6610_vm8, %v6597_v63, %v6599_v57  ;;  %10483 = vmatmul.mubr.msk.f32.vlgmr.msra.gmra.mrb[38].mxu1 %vm354_vm2, %v10199_v5  ;;  %v6601_v10 = vpop.permute.xlu0 %6600  ;;  %10208 = vmatmul.mubr.msk.f32.vlgmr.msra.gmra.mrb[2].mxu0 %vm354_vm2, %v10199_v5 }
 0x198   : > { %v6612_v11 = vsel %vm6610_vm8, %v6599_v57, %v6601_v10  ;;  %6769 = vmatprep.mubr.f32.mxu1 %v10746_v0  ;;  %6698 = vmatprep.mubr.f32.mxu0 %v10746_v0 }
 0x199   : > { %10212 = vmatprep.subr.msk.mxu0 %vm358_vm1, %v6612_v11  ;;  %v9234_v11 = vld [vmem:[%s11954_s2] sm:$0xf] }
 0x19a   : > { %10213 = vmatpush1.msk.msra.mxu0 %vm358_vm1, %v6611_v9  ;;  %v6605_v12 = vpop.permute.xlu1 %6604 }
 0x19b   : > { %v6603_v16 = vpop.permute.xlu0 %6602  ;;  %10214 = vmatmul.mubr.msk.f32.vlgmr.msra.gmra.mrb[0].mxu0 %vm354_vm2, %v10211_v14 }
 0x19c   : > { %v6613_v17 = vsel %vm6610_vm8, %v6601_v10, %v6603_v16  ;;  %v6614_v18 = vsel %vm6610_vm8, %v6603_v16, %v6605_v12  ;;  %6840 = vmatprep.mubr.f32.mxu0 %v10746_v0  ;;  %v10774_v16 = vmov 0  }
 0x19d   : > { %10215 = vmatprep.subr.msk.mxu1 %vm358_vm1, %v6614_v18  ;;  %10729 = vset.pattern.permute.xlu1 %v10774_v16 }
 0x19e   : > { %10216 = vmatpush1.msk.msra.mxu1 %vm358_vm1, %v6613_v17  ;;  %v6609_v19 = vpop.permute.xlu1 %6608  ;;  %v2265_v20 = vpop.f32.mrb[12].mxu1  ;;  %9237 = vperm.xlu1 %10729, %v9234_v11  }
 0x19f   : > { %10217 = vmatmul.mubr.msk.f32.vlgmr.msra.gmra.mrb[0].mxu1 %vm354_vm2, %v10211_v14  ;;  %v6607_v21 = vpop.permute.xlu0 %6606  ;;  %10485 = vmatprep.subr.mxu1 %v10746_v0  ;;  %v2275_v22 = vadd.f32 %v2265_v20, %v1945_v58  ;;  %v10419_v23 = vpop.f32.mrb[13].mxu1  ;;  %v9579_v20 = vld [vmem:[%s11958_s6] sm:$0xf] }
 0x1a0   : > { %v6615_v24 = vsel %vm6610_vm8, %v6605_v12, %v6607_v21  ;;  %v6616_v25 = vsel %vm6610_vm8, %v6607_v21, %v6609_v19  ;;  %10486 = vmatpush3.msk.msra.mxu1 %vm358_vm1, %v6609_v19  ;;  %10487 = vmatprep.mubr.msk.f32.mxu1 %vm10756_vm3, %v10746_v0  ;;  %v10259_v23 = vld [vmem:[%s11953_s1 + $0x5c] sm:$0xf] }
 0x1a1   : > { %10218 = vmatprep.subr.msk.mxu0 %vm358_vm1, %v6616_v25  ;;  %10730 = vset.pattern.permute.xlu0 %v10774_v16 }
 0x1a2   : > { %10219 = vmatpush1.msk.msra.mxu0 %vm358_vm1, %v6615_v24  ;;  %v6931_v26 = vpop.permute.xlu1 %6930  ;;  %9582 = vperm.xlu1 %10729, %v9579_v20  }
 0x1a3   : > { %10488 = vmatmul.mubr.msk.f32.vlgmr.msra.gmra.mrb[40].mxu1 %vm354_vm2, %v10211_v14  ;;  %v6929_v27 = vpop.permute.xlu0 %6928  ;;  %10220 = vmatmul.mubr.msk.f32.vlgmr.msra.gmra.mrb[2].mxu0 %vm354_vm2, %v10211_v14 }
 0x1a4   : > { %v6942_v28 = vsel %vm6940_vm9, %v6929_v27, %v6931_v26  ;;  %7099 = vmatprep.mubr.f32.mxu1 %v10746_v0  ;;  %7028 = vmatprep.mubr.f32.mxu0 %v10746_v0 }
 0x1a5   : > { %10224 = vmatprep.subr.msk.mxu0 %vm358_vm1, %v6942_v28 }
 0x1a6   : > { %v6933_v29 = vpop.permute.xlu1 %6932 }
 0x1a7   : > { %v6927_v30 = vpop.permute.xlu0 %6926  ;;  %v6943_v2 = vsel %vm6940_vm9, %v6931_v26, %v6933_v29 }
 0x1a8   : > { %v6941_v31 = vsel %vm6940_vm9, %v6927_v30, %v6929_v27 }
 0x1a9   : > { %10225 = vmatpush1.msk.msra.mxu0 %vm358_vm1, %v6941_v31 }
 0x1aa   : > { %v6937_v33 = vpop.permute.xlu1 %6936  ;;  %10226 = vmatmul.mubr.msk.f32.vlgmr.msra.gmra.mrb[0].mxu0 %vm354_vm2, %v10223_v32  ;;  %v2595_v34 = vpop.f32.mrb[14].mxu1 }
 0x1ab   : > { %v6935_v35 = vpop.permute.xlu0 %6934  ;;  %7170 = vmatprep.mubr.f32.mxu0 %v10746_v0  ;;  %v2605_v36 = vadd.f32 %v2595_v34, %v2275_v22  ;;  %v10424_v37 = vpop.f32.mrb[15].mxu1 }
 0x1ac   : > { %v6944_v38 = vsel %vm6940_vm9, %v6933_v29, %v6935_v35  ;;  %v6945_v42 = vsel %vm6940_vm9, %v6935_v35, %v6937_v33 }
 0x1ad   : > { %10227 = vmatprep.subr.msk.mxu1 %vm358_vm1, %v6944_v38 }
 0x1ae   : > { %10228 = vmatpush1.msk.msra.mxu1 %vm358_vm1, %v6943_v2  ;;  %v7259_v39 = vpop.permute.xlu1 %7258 }
 0x1af   : > { %10229 = vmatmul.mubr.msk.f32.vlgmr.msra.gmra.mrb[0].mxu1 %vm354_vm2, %v10223_v32  ;;  %10490 = vmatprep.subr.mxu1 %v10746_v0  ;;  %v6939_v40 = vpop.permute.xlu0 %6938 }
 0x1b0   : > { %v6946_v41 = vsel %vm6940_vm9, %v6937_v33, %v6939_v40  ;;  %10491 = vmatpush3.msk.msra.mxu1 %vm358_vm1, %v6939_v40  ;;  %10492 = vmatprep.mubr.msk.f32.mxu1 %vm10756_vm3, %v10746_v0 }
 0x1b1   : > { %10230 = vmatprep.subr.msk.mxu0 %vm358_vm1, %v6946_v41 }
 0x1b2   : > { %10231 = vmatpush1.msk.msra.mxu0 %vm358_vm1, %v6945_v42  ;;  %v7257_v43 = vpop.permute.xlu1 %7256 }
 0x1b3   : > { %v7271_v44 = vsel %vm7270_vm10, %v7257_v43, %v7259_v39  ;;  %10493 = vmatmul.mubr.msk.f32.vlgmr.msra.gmra.mrb[42].mxu1 %vm354_vm2, %v10223_v32  ;;  %v7261_v3 = vpop.permute.xlu0 %7260  ;;  %10232 = vmatmul.mubr.msk.f32.vlgmr.msra.gmra.mrb[2].mxu0 %vm354_vm2, %v10223_v32 }
 0x1b4   : > { %v7272_v45 = vsel %vm7270_vm10, %v7259_v39, %v7261_v3  ;;  %7429 = vmatprep.mubr.f32.mxu1 %v10746_v0  ;;  %7358 = vmatprep.mubr.f32.mxu0 %v10746_v0  ;;  %v10271_v39 = vld [vmem:[%s11953_s1 + $0x60] sm:$0xf] }
 0x1b5   : > { %10236 = vmatprep.subr.msk.mxu0 %vm358_vm1, %v7272_v45 }
 0x1b6   : > { %10237 = vmatpush1.msk.msra.mxu0 %vm358_vm1, %v7271_v44  ;;  %v7265_v13 = vpop.permute.xlu1 %7264 }
 0x1b7   : > { %v7263_v47 = vpop.permute.xlu0 %7262  ;;  %10238 = vmatmul.mubr.msk.f32.vlgmr.msra.gmra.mrb[0].mxu0 %vm354_vm2, %v10235_v46 }
 0x1b8   : > { %v7273_v48 = vsel %vm7270_vm10, %v7261_v3, %v7263_v47  ;;  %v7274_v49 = vsel %vm7270_vm10, %v7263_v47, %v7265_v13  ;;  %7500 = vmatprep.mubr.f32.mxu0 %v10746_v0 }
 0x1b9   : > { %10239 = vmatprep.subr.msk.mxu1 %vm358_vm1, %v7274_v49 }
 0x1ba   : > { %10240 = vmatpush1.msk.msra.mxu1 %vm358_vm1, %v7273_v48  ;;  %v7269_v4 = vpop.permute.xlu1 %7268  ;;  %v2925_v50 = vpop.f32.mrb[16].mxu1 }
 0x1bb   : > { %10241 = vmatmul.mubr.msk.f32.vlgmr.msra.gmra.mrb[0].mxu1 %vm354_vm2, %v10235_v46  ;;  %v7267_v51 = vpop.permute.xlu0 %7266  ;;  %10495 = vmatprep.subr.mxu1 %v10746_v0  ;;  %v2935_v59 = vadd.f32 %v2925_v50, %v2605_v36  ;;  %v10429_v52 = vpop.f32.mrb[17].mxu1 }
 0x1bc   : > { %v7275_v5 = vsel %vm7270_vm10, %v7265_v13, %v7267_v51  ;;  %v7276_v7 = vsel %vm7270_vm10, %v7267_v51, %v7269_v4  ;;  %10496 = vmatpush3.msk.msra.mxu1 %vm358_vm1, %v7269_v4  ;;  %10497 = vmatprep.mubr.msk.f32.mxu1 %vm10756_vm3, %v10746_v0  ;;  %v10283_v52 = vld [vmem:[%s11953_s1 + $0x64] sm:$0xf] }
 0x1bd   : > { %10242 = vmatprep.subr.msk.mxu0 %vm358_vm1, %v7276_v7 }
 0x1be   : > { %10243 = vmatpush1.msk.msra.mxu0 %vm358_vm1, %v7275_v5  ;;  %v7591_v53 = vpop.permute.xlu1 %7590 }
 0x1bf   : > { %10498 = vmatmul.mubr.msk.f32.vlgmr.msra.gmra.mrb[44].mxu1 %vm354_vm2, %v10235_v46  ;;  %v7589_v54 = vpop.permute.xlu0 %7588  ;;  %10244 = vmatmul.mubr.msk.f32.vlgmr.msra.gmra.mrb[2].mxu0 %vm354_vm2, %v10235_v46 }
 0x1c0   : > { %v7602_v1 = vsel %vm7600_vm11, %v7589_v54, %v7591_v53  ;;  %7759 = vmatprep.mubr.f32.mxu1 %v10746_v0  ;;  %7688 = vmatprep.mubr.f32.mxu0 %v10746_v0 }
 0x1c1   : > { %10248 = vmatprep.subr.msk.mxu0 %vm358_vm1, %v7602_v1 }
 0x1c2   : > { %v7593_v55 = vpop.permute.xlu1 %7592 }
 0x1c3   : > { %v7587_v8 = vpop.permute.xlu0 %7586  ;;  %v7603_v63 = vsel %vm7600_vm11, %v7591_v53, %v7593_v55 }
 0x1c4   : > { %v7601_v56 = vsel %vm7600_vm11, %v7587_v8, %v7589_v54 }
 0x1c5   : > { %10249 = vmatpush1.msk.msra.mxu0 %vm358_vm1, %v7601_v56 }
 0x1c6   : > { %v7597_v57 = vpop.permute.xlu1 %7596  ;;  %10250 = vmatmul.mubr.msk.f32.vlgmr.msra.gmra.mrb[0].mxu0 %vm354_vm2, %v10247_v6  ;;  %v3255_v58 = vpop.f32.mrb[18].mxu1 }
 0x1c7   : > { %v7595_v60 = vpop.permute.xlu0 %7594  ;;  %7830 = vmatprep.mubr.f32.mxu0 %v10746_v0  ;;  %v3265_v61 = vadd.f32 %v3255_v58, %v2935_v59  ;;  %v10434_v62 = vpop.f32.mrb[19].mxu1 }
 0x1c8   : > { %v7604_v15 = vsel %vm7600_vm11, %v7593_v55, %v7595_v60  ;;  %v7605_v14 = vsel %vm7600_vm11, %v7595_v60, %v7597_v57 }
 0x1c9   : > { %10251 = vmatprep.subr.msk.mxu1 %vm358_vm1, %v7604_v15 }
 0x1ca   : > { %10252 = vmatpush1.msk.msra.mxu1 %vm358_vm1, %v7603_v63  ;;  %v7919_v9 = vpop.permute.xlu1 %7918 }
 0x1cb   : > { %10253 = vmatmul.mubr.msk.f32.vlgmr.msra.gmra.mrb[0].mxu1 %vm354_vm2, %v10247_v6  ;;  %10500 = vmatprep.subr.mxu1 %v10746_v0  ;;  %v7599_v10 = vpop.permute.xlu0 %7598 }
 0x1cc   : > { %v7606_v12 = vsel %vm7600_vm11, %v7597_v57, %v7599_v10  ;;  %10501 = vmatpush3.msk.msra.mxu1 %vm358_vm1, %v7599_v10  ;;  %10502 = vmatprep.mubr.msk.f32.mxu1 %vm10756_vm3, %v10746_v0 }
 0x1cd   : > { %10254 = vmatprep.subr.msk.mxu0 %vm358_vm1, %v7606_v12 }
 0x1ce   : > { %10255 = vmatpush1.msk.msra.mxu0 %vm358_vm1, %v7605_v14  ;;  %v7917_v17 = vpop.permute.xlu1 %7916 }
 0x1cf   : > { %v7931_v18 = vsel %vm7930_vm12, %v7917_v17, %v7919_v9  ;;  %10503 = vmatmul.mubr.msk.f32.vlgmr.msra.gmra.mrb[46].mxu1 %vm354_vm2, %v10247_v6  ;;  %v7921_v19 = vpop.permute.xlu0 %7920  ;;  %10256 = vmatmul.mubr.msk.f32.vlgmr.msra.gmra.mrb[2].mxu0 %vm354_vm2, %v10247_v6 }
 0x1d0   : > { %v7932_v21 = vsel %vm7930_vm12, %v7919_v9, %v7921_v19  ;;  %8089 = vmatprep.mubr.f32.mxu1 %v10746_v0  ;;  %8018 = vmatprep.mubr.f32.mxu0 %v10746_v0 }
 0x1d1   : > { %10260 = vmatprep.subr.msk.mxu0 %vm358_vm1, %v7932_v21 }
 0x1d2   : > { %10261 = vmatpush1.msk.msra.mxu0 %vm358_vm1, %v7931_v18  ;;  %v7925_v22 = vpop.permute.xlu1 %7924 }
 0x1d3   : > { %v7923_v24 = vpop.permute.xlu0 %7922  ;;  %10262 = vmatmul.mubr.msk.f32.vlgmr.msra.gmra.mrb[0].mxu0 %vm354_vm2, %v10259_v23 }
 0x1d4   : > { %v7933_v25 = vsel %vm7930_vm12, %v7921_v19, %v7923_v24  ;;  %v7934_v26 = vsel %vm7930_vm12, %v7923_v24, %v7925_v22  ;;  %8160 = vmatprep.mubr.f32.mxu0 %v10746_v0 }
 0x1d5   : > { %10263 = vmatprep.subr.msk.mxu1 %vm358_vm1, %v7934_v26 }
 0x1d6   : > { %10264 = vmatpush1.msk.msra.mxu1 %vm358_vm1, %v7933_v25  ;;  %v7929_v27 = vpop.permute.xlu1 %7928 }
 0x1d7   : > { %10265 = vmatmul.mubr.msk.f32.vlgmr.msra.gmra.mrb[0].mxu1 %vm354_vm2, %v10259_v23  ;;  %v7927_v28 = vpop.permute.xlu0 %7926  ;;  %10505 = vmatprep.subr.mxu1 %v10746_v0 }
 0x1d8   : > { %v7935_v29 = vsel %vm7930_vm12, %v7925_v22, %v7927_v28  ;;  %v7936_v30 = vsel %vm7930_vm12, %v7927_v28, %v7929_v27  ;;  %10506 = vmatpush3.msk.msra.mxu1 %vm358_vm1, %v7929_v27  ;;  %10507 = vmatprep.mubr.msk.f32.mxu1 %vm10756_vm3, %v10746_v0  ;;  %v3589_v31 = vpop.f32.mrb[20].mxu1 }
 0x1d9   : > { %10266 = vmatprep.subr.msk.mxu0 %vm358_vm1, %v7936_v30  ;;  %v3599_v32 = vadd.f32 %v3589_v31, %v3265_v61  ;;  %v10439_v33 = vpop.f32.mrb[21].mxu1  ;;  %v10295_v61 = vld [vmem:[%s11953_s1 + $0x68] sm:$0xf] }
 0x1da   : > { %10267 = vmatpush1.msk.msra.mxu0 %vm358_vm1, %v7935_v29  ;;  %v8251_v34 = vpop.permute.xlu1 %8250 }
 0x1db   : > { %10508 = vmatmul.mubr.msk.f32.vlgmr.msra.gmra.mrb[48].mxu1 %vm354_vm2, %v10259_v23  ;;  %v8249_v35 = vpop.permute.xlu0 %8248  ;;  %10268 = vmatmul.mubr.msk.f32.vlgmr.msra.gmra.mrb[2].mxu0 %vm354_vm2, %v10259_v23 }
 0x1dc   : > { %v8262_v36 = vsel %vm8260_vm13, %v8249_v35, %v8251_v34  ;;  %8419 = vmatprep.mubr.f32.mxu1 %v10746_v0  ;;  %8348 = vmatprep.mubr.f32.mxu0 %v10746_v0 }
 0x1dd   : > { %10272 = vmatprep.subr.msk.mxu0 %vm358_vm1, %v8262_v36 }
 0x1de   : > { %v8253_v37 = vpop.permute.xlu1 %8252 }
 0x1df   : > { %v8247_v38 = vpop.permute.xlu0 %8246  ;;  %v8263_v43 = vsel %vm8260_vm13, %v8251_v34, %v8253_v37 }
 0x1e0   : > { %v8261_v2 = vsel %vm8260_vm13, %v8247_v38, %v8249_v35 }
 0x1e1   : > { %10273 = vmatpush1.msk.msra.mxu0 %vm358_vm1, %v8261_v2 }
 0x1e2   : > { %v8257_v40 = vpop.permute.xlu1 %8256  ;;  %10274 = vmatmul.mubr.msk.f32.vlgmr.msra.gmra.mrb[0].mxu0 %vm354_vm2, %v10271_v39 }
 0x1e3   : > { %v8255_v41 = vpop.permute.xlu0 %8254  ;;  %8490 = vmatprep.mubr.f32.mxu0 %v10746_v0 }
 0x1e4   : > { %v8264_v42 = vsel %vm8260_vm13, %v8253_v37, %v8255_v41  ;;  %v8265_v13 = vsel %vm8260_vm13, %v8255_v41, %v8257_v40  ;;  %v9248_v37 = vld [vmem:[%s11956_s4] sm:$0xf] }
 0x1e5   : > { %10275 = vmatprep.subr.msk.mxu1 %vm358_vm1, %v8264_v42  ;;  %9251 = vperm.xlu0 %10730, %v9248_v37  }
 0x1e6   : > { %10276 = vmatpush1.msk.msra.mxu1 %vm358_vm1, %v8263_v43  ;;  %v8579_v44 = vpop.permute.xlu1 %8578 }
 0x1e7   : > { %10277 = vmatmul.mubr.msk.f32.vlgmr.msra.gmra.mrb[0].mxu1 %vm354_vm2, %v10271_v39  ;;  %10510 = vmatprep.subr.mxu1 %v10746_v0  ;;  %v8259_v3 = vpop.permute.xlu0 %8258 }
 0x1e8   : > { %v8266_v45 = vsel %vm8260_vm13, %v8257_v40, %v8259_v3  ;;  %10511 = vmatpush3.msk.msra.mxu1 %vm358_vm1, %v8259_v3  ;;  %10512 = vmatprep.mubr.msk.f32.mxu1 %vm10756_vm3, %v10746_v0 }
 0x1e9   : > { %10278 = vmatprep.subr.msk.mxu0 %vm358_vm1, %v8266_v45  ;;  %v3922_v46 = vpop.f32.mrb[22].mxu1 }
 0x1ea   : > { %10279 = vmatpush1.msk.msra.mxu0 %vm358_vm1, %v8265_v13  ;;  %v8577_v47 = vpop.permute.xlu1 %8576  ;;  %v3932_v48 = vadd.f32 %v3922_v46, %v3599_v32  ;;  %v10444_v49 = vpop.f32.mrb[23].mxu1 }
 0x1eb   : > { %v8591_v4 = vsel %vm8590_vm14, %v8577_v47, %v8579_v44  ;;  %10513 = vmatmul.mubr.msk.f32.vlgmr.msra.gmra.mrb[50].mxu1 %vm354_vm2, %v10271_v39  ;;  %v8581_v50 = vpop.permute.xlu0 %8580  ;;  %10280 = vmatmul.mubr.msk.f32.vlgmr.msra.gmra.mrb[2].mxu0 %vm354_vm2, %v10271_v39 }
 0x1ec   : > { %v8592_v51 = vsel %vm8590_vm14, %v8579_v44, %v8581_v50  ;;  %8749 = vmatprep.mubr.f32.mxu1 %v10746_v0  ;;  %8678 = vmatprep.mubr.f32.mxu0 %v10746_v0 }
 0x1ed   : > { %10284 = vmatprep.subr.msk.mxu0 %vm358_vm1, %v8592_v51 }
 0x1ee   : > { %10285 = vmatpush1.msk.msra.mxu0 %vm358_vm1, %v8591_v4  ;;  %v8585_v59 = vpop.permute.xlu1 %8584 }
 0x1ef   : > { %v8583_v5 = vpop.permute.xlu0 %8582  ;;  %10286 = vmatmul.mubr.msk.f32.vlgmr.msra.gmra.mrb[0].mxu0 %vm354_vm2, %v10283_v52 }
 0x1f0   : > { %v8593_v7 = vsel %vm8590_vm14, %v8581_v50, %v8583_v5  ;;  %v8594_v53 = vsel %vm8590_vm14, %v8583_v5, %v8585_v59  ;;  %8820 = vmatprep.mubr.f32.mxu0 %v10746_v0 }
 0x1f1   : > { %10287 = vmatprep.subr.msk.mxu1 %vm358_vm1, %v8594_v53 }
 0x1f2   : > { %10288 = vmatpush1.msk.msra.mxu1 %vm358_vm1, %v8593_v7  ;;  %v8589_v54 = vpop.permute.xlu1 %8588 }
 0x1f3   : > { %10289 = vmatmul.mubr.msk.f32.vlgmr.msra.gmra.mrb[0].mxu1 %vm354_vm2, %v10283_v52  ;;  %v8587_v1 = vpop.permute.xlu0 %8586  ;;  %10515 = vmatprep.subr.mxu1 %v10746_v0 }
 0x1f4   : > { %v8595_v55 = vsel %vm8590_vm14, %v8585_v59, %v8587_v1  ;;  %v8596_v8 = vsel %vm8590_vm14, %v8587_v1, %v8589_v54  ;;  %10516 = vmatpush3.msk.msra.mxu1 %vm358_vm1, %v8589_v54  ;;  %10517 = vmatprep.mubr.msk.f32.mxu1 %vm10756_vm3, %v10746_v0 }
 0x1f5   : > { %10290 = vmatprep.subr.msk.mxu0 %vm358_vm1, %v8596_v8 }
 0x1f6   : > { %10291 = vmatpush1.msk.msra.mxu0 %vm358_vm1, %v8595_v55  ;;  %v8911_v56 = vpop.permute.xlu1 %8910 }
 0x1f7   : > { %10518 = vmatmul.mubr.msk.f32.vlgmr.msra.gmra.mrb[52].mxu1 %vm354_vm2, %v10283_v52  ;;  %v8909_v6 = vpop.permute.xlu0 %8908  ;;  %10292 = vmatmul.mubr.msk.f32.vlgmr.msra.gmra.mrb[2].mxu0 %vm354_vm2, %v10283_v52 }
 0x1f8   : > { %v8922_v57 = vsel %vm8920_vm15, %v8909_v6, %v8911_v56  ;;  %9008 = vmatprep.mubr.f32.mxu0 %v10746_v0  ;;  %9079 = vmatprep.mubr.f32.mxu1 %v10746_v0 }
 0x1f9   : > { %10296 = vmatprep.subr.msk.mxu0 %vm358_vm1, %v8922_v57  ;;  %v9247_v57 = vld [vmem:[%s11955_s3] sm:$0xf] }
 0x1fa   : > { %v4255_v58 = vpop.f32.mrb[24].mxu1  ;;  %v8913_v63 = vpop.permute.xlu1 %8912 }
 0x1fb   : > { %v8907_v60 = vpop.permute.xlu0 %8906  ;;  %v4265_v62 = vadd.f32 %v4255_v58, %v3932_v48  ;;  %v10449_v15 = vpop.f32.mrb[25].mxu1  ;;  %v8923_v12 = vsel %vm8920_vm15, %v8911_v56, %v8913_v63 }
 0x1fc   : > { %v8921_v9 = vsel %vm8920_vm15, %v8907_v60, %v8909_v6 }
 0x1fd   : > { %10297 = vmatpush1.msk.msra.mxu0 %vm358_vm1, %v8921_v9 }
 0x1fe   : > { %10298 = vmatmul.mubr.msk.f32.vlgmr.msra.gmra.mrb[0].mxu0 %vm354_vm2, %v10295_v61  ;;  %v8917_v14 = vpop.permute.xlu1 %8916 }
 0x1ff   : > { %v8915_v10 = vpop.permute.xlu0 %8914  ;;  %9150 = vmatprep.mubr.f32.mxu0 %v10746_v0 }
 0x200   : > { %v8924_v11 = vsel %vm8920_vm15, %v8913_v63, %v8915_v10  ;;  %v8925_v18 = vsel %vm8920_vm15, %v8915_v10, %v8917_v14 }
 0x201   : > { %10299 = vmatprep.subr.msk.mxu1 %vm358_vm1, %v8924_v11 }
 0x202   : > { %10300 = vmatpush1.msk.msra.mxu1 %vm358_vm1, %v8923_v12 }
 0x203   : > { %10301 = vmatmul.mubr.msk.f32.vlgmr.msra.gmra.mrb[0].mxu1 %vm354_vm2, %v10295_v61  ;;  %10520 = vmatprep.subr.mxu1 %v10746_v0  ;;  %v8919_v16 = vpop.permute.xlu0 %8918 }
 0x204   : > { %v8926_v17 = vsel %vm8920_vm15, %v8917_v14, %v8919_v16  ;;  %10521 = vmatpush3.msk.msra.mxu1 %vm358_vm1, %v8919_v16  ;;  %10522 = vmatprep.mubr.msk.f32.mxu1 %vm10756_vm3, %v10746_v0 }
 0x205   : > { %10302 = vmatprep.subr.msk.mxu0 %vm358_vm1, %v8926_v17  ;;  %v9578_v17 = vld [vmem:[%s11957_s5] sm:$0xf] }
 0x206   : > { %10303 = vmatpush1.msk.msra.mxu0 %vm358_vm1, %v8925_v18 }
 0x207   : > { %10304 = vmatmul.mubr.msk.f32.vlgmr.msra.gmra.mrb[2].mxu0 %vm354_vm2, %v10295_v61  ;;  %10523 = vmatmul.mubr.msk.f32.vlgmr.msra.gmra.mrb[54].mxu1 %vm354_vm2, %v10295_v61 }
 0x208   : > { %9342 = vmatprep.mubr.f32.mxu0 %v10746_v0  ;;  %9413 = vmatprep.mubr.f32.mxu1 %v10746_v0 }
 0x20a   : > { %v4588_v19 = vpop.f32.mrb[26].mxu1 }
 0x20b   : > { %v4598_v20 = vadd.f32 %v4588_v19, %v4265_v62  ;;  %v10454_v21 = vpop.f32.mrb[27].mxu1 }
 0x21a   : > { %v4921_v22 = vpop.f32.mrb[28].mxu1 }
 0x21b   : > { %v4931_v23 = vadd.f32 %v4921_v22, %v4598_v20  ;;  %v10459_v24 = vpop.f32.mrb[29].mxu1 }
 0x21d   : > { %v9238_v1 = vpop.permute.xlu1 %9237 }
 0x22a   : > { %v5254_v25 = vpop.f32.mrb[30].mxu1 }
 0x22b   : > { %v5264_v26 = vadd.f32 %v5254_v25, %v4931_v23  ;;  %v10464_v27 = vpop.f32.mrb[31].mxu1 }
 0x23a   : > { %v5587_v28 = vpop.f32.mrb[32].mxu1 }
 0x23b   : > { %v5597_v29 = vadd.f32 %v5587_v28, %v5264_v26  ;;  %v10469_v30 = vpop.f32.mrb[33].mxu1 }
 0x24a   : > { %v5920_v31 = vpop.f32.mrb[34].mxu1 }
 0x24b   : > { %v5930_v32 = vadd.f32 %v5920_v31, %v5597_v29  ;;  %v10474_v33 = vpop.f32.mrb[35].mxu1 }
 0x25a   : > { %v6253_v34 = vpop.f32.mrb[36].mxu1 }
 0x25b   : > { %v6263_v35 = vadd.f32 %v6253_v34, %v5930_v32  ;;  %v10479_v36 = vpop.f32.mrb[37].mxu1 }
 0x264   : > { %v9252_v18 = vpop.permute.xlu0 %9251 }
 0x26a   : > { %v6583_v38 = vpop.f32.mrb[38].mxu1 }
 0x26b   : > { %v6593_v2 = vadd.f32 %v6583_v38, %v6263_v35  ;;  %v10484_v39 = vpop.f32.mrb[39].mxu1  ;;  %v9583_v35 = vpop.permute.xlu1 %9582 }
 0x276   : > { %v6913_v40 = vpop.f32.mrb[40].mxu1 }
 0x277   : > { %v6923_v41 = vadd.f32 %v6913_v40, %v6593_v2  ;;  %v10489_v42 = vpop.f32.mrb[41].mxu1 }
 0x286   : > { %v7243_v43 = vpop.f32.mrb[42].mxu1 }
 0x287   : > { %v7253_v44 = vadd.f32 %v7243_v43, %v6923_v41  ;;  %v10494_v3 = vpop.f32.mrb[43].mxu1 }
 0x292   : > { %v7573_v45 = vpop.f32.mrb[44].mxu1 }
 0x293   : > { %v7583_v13 = vadd.f32 %v7573_v45, %v7253_v44  ;;  %v10499_v46 = vpop.f32.mrb[45].mxu1 }
 0x2a2   : > { %v7903_v47 = vpop.f32.mrb[46].mxu1 }
 0x2a3   : > { %v7913_v48 = vadd.f32 %v7903_v47, %v7583_v13  ;;  %v10504_v49 = vpop.f32.mrb[47].mxu1 }
 0x2ae   : > { %v8233_v4 = vpop.f32.mrb[48].mxu1 }
 0x2af   : > { %v8243_v50 = vadd.f32 %v8233_v4, %v7913_v48  ;;  %v10509_v51 = vpop.f32.mrb[49].mxu1 }
 0x2be   : > { %v8563_v59 = vpop.f32.mrb[50].mxu1 }
 0x2bf   : > { %v8573_v52 = vadd.f32 %v8563_v59, %v8243_v50  ;;  %v10514_v5 = vpop.f32.mrb[51].mxu1 }
 0x2ca   : > { %v8893_v7 = vpop.f32.mrb[52].mxu1 }
 0x2cb   : > { %v8903_v53 = vadd.f32 %v8893_v7, %v8573_v52  ;;  %v10519_v54 = vpop.f32.mrb[53].mxu1 }
 0x2d1   : > { %v9010_v55 = vpop.f32.mrb[0].mxu0 }
 0x2d2   : > { %v9012_v8 = vpop.f32.mrb[1].mxu0  ;;  %v9240_v6 = vadd.f32 %v9238_v1, %v9010_v55 }
 0x2d3   : > { %v9241_v56 = vadd.f32 %v9238_v1, %v9012_v8 }
 0x2d5   : > { %10307 = vmatprep.subr.msk.mxu0 %vm358_vm1, %v9241_v56 }
 0x2d6   : > { %v9081_v58 = vpop.f32.mrb[0].mxu1  ;;  %10308 = vmatpush1.msk.msra.mxu0 %vm358_vm1, %v9240_v6 }
 0x2d7   : > { %v9083_v60 = vpop.f32.mrb[1].mxu1  ;;  %10309 = vmatmul.mubr.msk.f32.vlgmr.msra.gmra.mrb[4].mxu0 %vm354_vm2, %v9247_v57  ;;  %v9242_v62 = vadd.f32 %v9238_v1, %v9081_v58 }
 0x2d8   : > { %v9243_v61 = vadd.f32 %v9238_v1, %v9083_v60  ;;  %9484 = vmatprep.mubr.f32.mxu0 %v10746_v0 }
 0x2da   : > { %v9152_v15 = vpop.f32.mrb[2].mxu0  ;;  %v9223_v63 = vpop.f32.mrb[54].mxu1  ;;  %10310 = vmatprep.subr.msk.mxu1 %vm358_vm1, %v9243_v61 }
 0x2db   : > { %v9233_v9 = vadd.f32 %v9223_v63, %v8903_v53  ;;  %v9154_v10 = vpop.f32.mrb[3].mxu0  ;;  %10311 = vmatpush1.msk.msra.mxu1 %vm358_vm1, %v9242_v62  ;;  %v10524_v11 = vpop.f32.mrb[55].mxu1  ;;  %v9244_v14 = vadd.f32 %v9238_v1, %v9152_v15 }
 0x2dc   : > { %v9245_v12 = vadd.f32 %v9238_v1, %v9154_v10  ;;  %10312 = vmatmul.mubr.msk.f32.vlgmr.msra.gmra.mrb[56].mxu1 %vm354_vm2, %v9247_v57  ;;  %10525 = vmatprep.subr.mxu1 %v10746_v0 }
 0x2dd   : > { %v9246_v16 = vadd.f32 %v9238_v1, %v9233_v9  ;;  %10527 = vmatprep.mubr.msk.f32.mxu1 %vm10756_vm3, %v10746_v0 }
 0x2de   : > { %10313 = vmatprep.subr.msk.mxu0 %vm358_vm1, %v9245_v12 }
 0x2df   : > { %10314 = vmatpush1.msk.msra.mxu0 %vm358_vm1, %v9244_v14  ;;  %10526 = vmatpush3.msk.msra.mxu1 %vm358_vm1, %v9246_v16 }
 0x2e0   : > { %10315 = vmatmul.mubr.msk.f32.vlgmr.msra.gmra.mrb[6].mxu0 %vm354_vm2, %v9247_v57  ;;  %10528 = vmatmul.mubr.msk.f32.vlgmr.msra.gmra.mrb[58].mxu1 %vm354_vm2, %v9247_v57 }
 0x2e1   : > { %10318 = vmatprep.subr.msk.mxu0 %vm358_vm1, %v9241_v56  ;;  %10321 = vmatprep.subr.msk.mxu1 %vm358_vm1, %v9243_v61 }
 0x2e2   : > { %10319 = vmatpush1.msk.msra.mxu0 %vm358_vm1, %v9240_v6  ;;  %10322 = vmatpush1.msk.msra.mxu1 %vm358_vm1, %v9242_v62 }
 0x2e3   : > { %10324 = vmatprep.subr.msk.mxu0 %vm358_vm1, %v9245_v12  ;;  %9652 = vmatprep.mubr.f32.mxu0 %v10746_v0 }
 0x2e4   : > { %9723 = vmatprep.mubr.f32.mxu1 %v10746_v0  ;;  %10530 = vmatprep.subr.mxu1 %v10746_v0 }
 0x2e5   : > { %10320 = vmatmul.mubr.msk.f32.vlgmr.msra.gmra.mrb[8].mxu0 %vm354_vm2, %v9578_v17  ;;  %10323 = vmatmul.mubr.msk.f32.vlgmr.msra.gmra.mrb[60].mxu1 %vm354_vm2, %v9578_v17 }
 0x2e6   : > { %10325 = vmatpush1.msk.msra.mxu0 %vm358_vm1, %v9244_v14  ;;  %10531 = vmatpush3.msk.msra.mxu1 %vm358_vm1, %v9246_v16  ;;  %vm9576_vm1 = vcmask 257024  }
 0x2e7   : > { %9794 = vmatprep.mubr.f32.mxu0 %v10746_v0  ;;  %10532 = vmatprep.mubr.msk.f32.mxu1 %vm10756_vm3, %v10746_v0 }
 0x2e9   : > { %10326 = vmatmul.mubr.msk.f32.vlgmr.msra.gmra.mrb[10].mxu0 %vm354_vm2, %v9578_v17  ;;  %10533 = vmatmul.mubr.msk.f32.vlgmr.msra.gmra.mrb[62].mxu1 %vm354_vm2, %v9578_v17 }
 0x3aa   : > { %v9344_v19 = vpop.f32.mrb[4].mxu0 }
 0x3ab   : > { %v9346_v20 = vpop.f32.mrb[5].mxu0  ;;  %v9345_v21 = vadd.f32 %v9344_v19, %v9252_v18 }
 0x3ac   : > { %v9347_v22 = vadd.f32 %v9346_v20, %v9252_v18 }
 0x3ae   : > { %v9567_v23 = vcombine.low %v9345_v21, %v9347_v22 }
 0x3af   : > { %v9415_v24 = vpop.f32.mrb[56].mxu1 }
 0x3b0   : > { %v9416_v25 = vadd.f32 %v9415_v24, %v9252_v18  ;;  %v9417_v26 = vpop.f32.mrb[57].mxu1  ;;  %9573 = vst [vmem:[%s313_s25] sm:$0xff] %v9567_v23 }
 0x3b1   : > { %v9418_v0 = vadd.f32 %v9417_v26, %v9252_v18 }
 0x3b3   : > { %v9568_v27 = vcombine.low %v9416_v25, %v9418_v0  ;;  %v9486_v28 = vpop.f32.mrb[6].mxu0  ;;  %v9557_v29 = vpop.f32.mrb[58].mxu1 }
 0x3b4   : > { %v9487_v30 = vadd.f32 %v9486_v28, %v9252_v18  ;;  %v9558_v31 = vadd.f32 %v9557_v29, %v9252_v18  ;;  %v9488_v32 = vpop.f32.mrb[7].mxu0  ;;  %v10529_v33 = vpop.f32.mrb[59].mxu1 }
 0x3b5   : > { %9574 = vst [vmem:[%s313_s25 + $0x8] sm:$0xff] %v9568_v27  ;;  %v9489_v34 = vadd.f32 %v9488_v32, %v9252_v18 }
 0x3b6   : > { %9577 = vst.msk [vmem:[%s313_s25 + $0x18] sm:$0xf] %vm9576_vm1, %v9558_v31 }
 0x3b7   : > { %v9569_v36 = vcombine.low %v9487_v30, %v9489_v34 }
 0x3b8   : > { %v9654_v37 = vpop.f32.mrb[8].mxu0  ;;  %v9725_v38 = vpop.f32.mrb[60].mxu1 }
 0x3b9   : > { %9575 = vst [vmem:[%s313_s25 + $0x10] sm:$0xff] %v9569_v36  ;;  %v9655_v2 = vadd.f32 %v9654_v37, %v9583_v35  ;;  %v9726_v39 = vadd.f32 %v9725_v38, %v9583_v35  ;;  %v9656_v40 = vpop.f32.mrb[9].mxu0  ;;  %v9727_v41 = vpop.f32.mrb[61].mxu1 }
 0x3ba   : > { %v9657_v42 = vadd.f32 %v9656_v40, %v9583_v35  ;;  %v9728_v43 = vadd.f32 %v9727_v41, %v9583_v35 }
 0x3bc   : > { %v9877_v44 = vcombine.low %v9655_v2, %v9657_v42  ;;  %v9878_v3 = vcombine.low %v9726_v39, %v9728_v43  ;;  %v9796_v45 = vpop.f32.mrb[10].mxu0  ;;  %v9867_v13 = vpop.f32.mrb[62].mxu1 }
 0x3bd   : > { %v9797_v46 = vadd.f32 %v9796_v45, %v9583_v35  ;;  %v9868_v47 = vadd.f32 %v9867_v13, %v9583_v35  ;;  %v9798_v48 = vpop.f32.mrb[11].mxu0  ;;  %v10534_v49 = vpop.f32.mrb[63].mxu1 }
 0x3be   : > { %9883 = vst [vmem:[%s318_s30] sm:$0xff] %v9877_v44  ;;  %9884 = vst [vmem:[%s318_s30 + $0x8] sm:$0xff] %v9878_v3  ;;  %v9799_v4 = vadd.f32 %v9798_v48, %v9583_v35 }
 0x3bf   : > { %9886 = vst.msk [vmem:[%s318_s30 + $0x18] sm:$0xf] %vm9576_vm1, %v9868_v47 }
 0x3c0   : > { %v9879_v50 = vcombine.low %v9797_v46, %v9799_v4 }
 0x3c2   : > { %9885 = vst [vmem:[%s318_s30 + $0x10] sm:$0xff] %v9879_v50 }
 0x3c3 PF: > { %s19_s27 = sadd.s32 1, %s10744_s27  }
 0x3c4   : > { %p16_p4 = scmp.ge.s32.totalorder %s19_s27, 4  }
 0x3c6   :  { %18 = sbr.rel (!%p16_p4) target bundleno = 1 (0x1), region = 116 }

</bundles_post_ra>
